<compile_context>
chip_gen: v6e
topology: v6e:2x2x1
jax: 0.10.0
libtpu: 0.0.40
codegen_flags: <defaults>
</compile_context>

<pallas_src>
import functools

import jax
import jax.numpy as jnp
from jax.experimental import pallas as pl
from jax.experimental.pallas import tpu as pltpu

_ROW_TILE = 512                      # rows per grid step (multiple of 8)
_VMEM_LIMIT = 32 * 1024 * 1024       # explicit, v7x-safe scoped VMEM limit
_MODE_BLOCK_CAP = 32                 # max Fourier modes per grid step


def _compiler_params():
    return pltpu.CompilerParams(
        dimension_semantics=("parallel",),
        vmem_limit_bytes=_VMEM_LIMIT,
    )


def _round_up(n, m):
    return ((n + m - 1) // m) * m


def _row_tile(n):
    return min(_ROW_TILE, _round_up(n, 8))


def _mode_block(m):
    mb = min(m, _MODE_BLOCK_CAP)
    while m % mb != 0:
        mb -= 1
    return mb


# ----------------------------- Pallas kernels -------------------------------

def _pointwise_kernel(x_ref, w_ref, b_ref, o_ref):
    # (tile, Cin) @ (Cin, Cout) + (1, Cout)  == nn.Conv2d(k=1) on flat pixels.
    o_ref[...] = (
        jnp.dot(x_ref[...], w_ref[...], preferred_element_type=jnp.float32)
        + b_ref[...]
    ).astype(o_ref.dtype)


def _fused_block_kernel(x_ref, spec_ref, w_ref, b_ref, g_ref, be_ref, o_ref):
    # Fused: skip 1x1 conv + add spectral + LayerNorm2d (channels) + GELU.
    skip = jnp.dot(x_ref[...], w_ref[...], preferred_element_type=jnp.float32)
    y = spec_ref[...].astype(jnp.float32) + skip + b_ref[...]
    mu = jnp.mean(y, axis=-1, keepdims=True)
    var = jnp.mean(jnp.square(y - mu), axis=-1, keepdims=True)
    yhat = (y - mu) * jax.lax.rsqrt(var + 1e-5)
    z = yhat * g_ref[...] + be_ref[...]
    # GELU (tanh approximation; torch.nn.GELU default is exact erf).
    # TODO(synk): switch to erf-based GELU if exact parity with torch is needed.
    c = 0.7978845608028654  # sqrt(2/pi)
    z2 = z * z
    o_ref[...] = (0.5 * z * (1.0 + jnp.tanh(c * (z + 0.044715 * z2 * z)))
                  ).astype(o_ref.dtype)


def _spectral_mix_kernel(x_ref, w_ref, o_ref):
    # Per-mode complex channel mixing as ONE stacked real batched matmul:
    #   x: (Mblk, B, 2Cin)  = [Re | Im]
    #   w: (Mblk, 2Cin, 2Cout) = [[wr, wi], [-wi, wr]]
    #   o: (Mblk, B, 2Cout) = [Re(out) | Im(out)]
    o_ref[...] = jnp.einsum(
        "mbc,mcd->mbd", x_ref[...], w_ref[...],
        preferred_element_type=jnp.float32,
    ).astype(o_ref.dtype)


# ----------------------------- Pallas wrappers -------------------------------

def _pad_rows(x, n_padded):
    n = x.shape[0]
    return x if n_padded == n else jnp.pad(x, ((0, n_padded - n), (0, 0)))


def pointwise_conv_rows(x_rows, w, b):
    """nn.Conv2d(Cin, Cout, kernel_size=1) on (N, Cin) channels-last rows."""
    N, Cin = x_rows.shape
    Cout = w.shape[1]
    tile = _row_tile(N)
    Np = pl.cdiv(N, tile) * tile
    xp = _pad_rows(x_rows, Np)
    out = pl.pallas_call(
        _pointwise_kernel,
        out_shape=jax.ShapeDtypeStruct((Np, Cout), x_rows.dtype),
        grid=(Np // tile,),
        in_specs=[
            pl.BlockSpec((tile, Cin), lambda i: (i, 0)),
            pl.BlockSpec((Cin, Cout), lambda i: (0, 0)),
            pl.BlockSpec((1, Cout), lambda i: (0, 0)),
        ],
        out_specs=pl.BlockSpec((tile, Cout), lambda i: (i, 0)),
        compiler_params=_compiler_params(),
    )(xp, w, b.reshape(1, Cout))
    return out if Np == N else out[:N]


def fused_skip_add_ln_gelu(x_rows, spec_rows, skip_w, skip_b, gamma, beta):
    """GELU(LayerNorm2d(spec + Conv1x1(x))) fused in one kernel (rows layout)."""
    N, Cin = x_rows.shape
    Cout = skip_w.shape[1]
    tile = _row_tile(N)
    Np = pl.cdiv(N, tile) * tile
    xp = _pad_rows(x_rows, Np)
    sp = _pad_rows(spec_rows, Np)
    out = pl.pallas_call(
        _fused_block_kernel,
        out_shape=jax.ShapeDtypeStruct((Np, Cout), x_rows.dtype),
        grid=(Np // tile,),
        in_specs=[
            pl.BlockSpec((tile, Cin), lambda i: (i, 0)),
            pl.BlockSpec((tile, Cout), lambda i: (i, 0)),
            pl.BlockSpec((Cin, Cout), lambda i: (0, 0)),
            pl.BlockSpec((1, Cout), lambda i: (0, 0)),
            pl.BlockSpec((1, Cout), lambda i: (0, 0)),
            pl.BlockSpec((1, Cout), lambda i: (0, 0)),
        ],
        out_specs=pl.BlockSpec((tile, Cout), lambda i: (i, 0)),
        compiler_params=_compiler_params(),
    )(xp, sp, skip_w, skip_b.reshape(1, Cout),
      gamma.reshape(1, Cout), beta.reshape(1, Cout))
    return out if Np == N else out[:N]


def spectral_conv2d_rows(x_rows, w_stacked, B, H, W, m1, m2):
    """FNO spectral conv on rows layout: rfft2 -> Pallas mode mix -> irfft2.

    w_stacked: (M, 2Cin, 2Cout) real stacking of complex per-mode weights,
               M = 2*m1*m2.
    """
    Cin = x_rows.shape[1]
    M, twoCin, twoCout = w_stacked.shape
    Cout = twoCout // 2

    # FFT on the NHWC view (no NCHW transpose); jnp.fft — no Pallas FFT exists.
    x = x_rows.reshape(B, H, W, Cin)
    x_ft = jnp.fft.rfft2(x, axes=(1, 2))                     # (B, H, Wr, Cin)
    sel = jnp.concatenate(
        [x_ft[:, :m1, :m2, :], x_ft[:, H - m1:, :m2, :]], axis=1
    )                                                        # (B, 2m1, m2, Cin)
    sel = jnp.transpose(sel, (1, 2, 0, 3)).reshape(M, B, Cin)
    x_stk = jnp.concatenate([jnp.real(sel), jnp.imag(sel)], axis=-1)  # (M,B,2Cin)

    Mblk = _mode_block(M)
    out = pl.pallas_call(
        _spectral_mix_kernel,
        out_shape=jax.ShapeDtypeStruct((M, B, twoCout), jnp.float32),
        grid=(M // Mblk,),
        in_specs=[
            pl.BlockSpec((Mblk, B, twoCin), lambda m: (m, 0, 0)),
            pl.BlockSpec((Mblk, twoCin, twoCout), lambda m: (m, 0, 0)),
        ],
        out_specs=pl.BlockSpec((Mblk, B, twoCout), lambda m: (m, 0, 0)),
        compiler_params=_compiler_params(),
    )(x_stk, w_stacked)

    o = (out[..., :Cout] + 1j * out[..., Cout:]).astype(jnp.complex64)  # (M,B,Cout)
    o = jnp.transpose(o.reshape(2 * m1, m2, B, Cout), (2, 0, 1, 3))     # (B,2m1,m2,Cout)

    # Build the padded spectrum with concat/pad (no zeros + scatter).
    Wr = W // 2 + 1
    zeros_mid = jnp.zeros((B, H - 2 * m1, m2, Cout), jnp.complex64)
    o_full = jnp.concatenate([o[:, :m1], zeros_mid, o[:, m1:]], axis=1)  # (B,H,m2,Cout)
    out_ft = jnp.pad(o_full, ((0, 0), (0, 0), (0, Wr - m2), (0, 0)))
    y = jnp.fft.irfft2(out_ft, s=(H, W), axes=(1, 2))                   # (B,H,W,Cout)
    return y.reshape(B * H * W, Cout).astype(x_rows.dtype)


# ----------------------------- model (glue) ---------------------------------

def cartesian_embedding_rows(x_rows, B, H, W):
    """Append normalized (y, x) coordinate channels (fixed_pos_encoding)."""
    dt = x_rows.dtype
    gy = jnp.broadcast_to(
        jnp.linspace(0.0, 1.0, H, dtype=dt)[None, :, None, None], (B, H, W, 1))
    gx = jnp.broadcast_to(
        jnp.linspace(0.0, 1.0, W, dtype=dt)[None, None, :, None], (B, H, W, 1))
    coords = jnp.concatenate([gy, gx], axis=-1).reshape(B * H * W, 2)
    return jnp.concatenate([x_rows, coords], axis=-1)


def _conv1x1_init(key, cin, cout):
    kw, kb = jax.random.split(key)
    bound = 1.0 / jnp.sqrt(jnp.float32(cin))
    w = jax.random.uniform(kw, (cin, cout), jnp.float32, -bound, bound)
    b = jax.random.uniform(kb, (cout,), jnp.float32, -bound, bound)
    return w, b


def init_fno_params(key, in_channels, out_channels, modes, hidden_channels):
    m1, m2 = modes
    M = 2 * m1 * m2
    in_c = in_channels + 2  # fixed_pos_encoding=True adds 2 coordinate channels
    params = {}

    key, k = jax.random.split(key)
    params["lifting"] = _conv1x1_init(k, in_c, hidden_channels[0])

    blocks = []
    for i, ch in enumerate(hidden_channels):
        cin = hidden_channels[0] if i == 0 else hidden_channels[i - 1]
        key, k1, k2, k3 = jax.random.split(key, 4)
        scale = 1.0 / (cin * ch)
        wr = scale * jax.random.uniform(k1, (M, cin, ch), jnp.float32)
        wi = scale * jax.random.uniform(k2, (M, cin, ch), jnp.float32)
        # Stacked real form of the complex weight:
        #   [xr | xi] @ [[wr, wi], [-wi, wr]] == [Re(x@w) | Im(x@w)]
        w_stacked = jnp.concatenate(
            [jnp.concatenate([wr, wi], axis=-1),
             jnp.concatenate([-wi, wr], axis=-1)], axis=-2)   # (M, 2cin, 2ch)
        skip_w, skip_b = _conv1x1_init(k3, cin, ch)
        blocks.append(dict(
            spec_w=w_stacked, skip_w=skip_w, skip_b=skip_b,
            ln_gamma=jnp.ones((ch,), jnp.float32),
            ln_beta=jnp.zeros((ch,), jnp.float32),
        ))
    params["blocks"] = blocks

    key, k = jax.random.split(key)
    params["projection"] = _conv1x1_init(k, hidden_channels[-1], out_channels)
    return params


def fno_forward(params, x_nchw, modes):
    m1, m2 = modes
    B, _, H, W = x_nchw.shape
    # Single NCHW -> rows (channels-last) transpose at the model boundary.
    rows = jnp.transpose(x_nchw, (0, 2, 3, 1)).reshape(B * H * W, -1)
    rows = cartesian_embedding_rows(rows, B, H, W)
    # lifting (1x1 conv)
    rows = pointwise_conv_rows(rows, *params["lifting"])
    # FNO blocks: GELU(LN(SpectralConv(x) + Conv1x1(x))), all in rows layout.
    for blk in params["blocks"]:
        spec = spectral_conv2d_rows(rows, blk["spec_w"], B, H, W, m1, m2)
        rows = fused_skip_add_ln_gelu(rows, spec, blk["skip_w"], blk["skip_b"],
                                      blk["ln_gamma"], blk["ln_beta"])
    # projection (1x1 conv)
    rows = pointwise_conv_rows(rows, *params["projection"])
    Cout = rows.shape[1]
    # Single rows -> NCHW transpose at the output boundary.
    return jnp.transpose(rows.reshape(B, H, W, Cout), (0, 3, 1, 2))


# --------------------------------- main --------------------------------------

if __name__ == "__main__":
    key = jax.random.PRNGKey(0)
    kx, kp = jax.random.split(key)

    B, Cin, H, W = 2, 3, 16, 16
    Cout = 2
    modes = (4, 4)
    hidden_channels = (32, 32)

    x = jax.random.normal(kx, (B, Cin, H, W), jnp.float32)
    params = init_fno_params(kp, Cin, Cout, modes, hidden_channels)

    fwd = jax.jit(functools.partial(fno_forward, modes=modes))
    y = fwd(params, x)
    jax.block_until_ready(y)
    assert y.shape == (B, Cout, H, W), y.shape
    assert y.dtype == jnp.float32
    assert bool(jnp.all(jnp.isfinite(y)))
    print("KERNEL_OK")
</pallas_src>

<mosaic_0001>
module attributes {stable_mosaic.version = 11 : i64} {
  func.func @_pointwise_kernel(%arg0: i32, %arg1: memref<512x5xf32, #tpu.memory_space<vmem>>, %arg2: memref<5x32xf32, #tpu.memory_space<vmem>>, %arg3: memref<1x32xf32, #tpu.memory_space<vmem>>, %arg4: memref<512x32xf32, #tpu.memory_space<vmem>>) attributes {dimension_semantics = [#tpu.dimension_semantics<parallel>], iteration_bounds = array<i64: 1>, scalar_prefetch = 0 : i64, scratch_operands = 0 : i64, tpu.core_type = #tpu.core_type<tc>, window_params = [{transform_indices = @transform_0, window_bounds = array<i64: 512, 5>}, {pipeline_mode = #tpu.pipeline_mode<synchronous>, transform_indices = @transform_1, window_bounds = array<i64: 5, 32>}, {pipeline_mode = #tpu.pipeline_mode<synchronous>, transform_indices = @transform_2, window_bounds = array<i64: 1, 32>}, {transform_indices = @transform_3, window_bounds = array<i64: 512, 32>}]} {
    %c0 = arith.constant 0 : index
    %c0_0 = arith.constant 0 : index
    %0 = vector.load %arg1[%c0, %c0_0] : memref<512x5xf32, #tpu.memory_space<vmem>>, vector<512x5xf32>
    %c0_1 = arith.constant 0 : index
    %c0_2 = arith.constant 0 : index
    %1 = vector.load %arg2[%c0_1, %c0_2] : memref<5x32xf32, #tpu.memory_space<vmem>>, vector<5x32xf32>
    %cst = arith.constant dense<0.000000e+00> : vector<512x32xf32>
    %2 = tpu.matmul %0, %1, %cst {dimension_numbers = #tpu.dot_dimension_numbers<[1], [0], [0], [1], [0, 0, 1, 1], [], []>} : vector<512x5xf32>, vector<5x32xf32>, vector<512x32xf32> -> vector<512x32xf32>
    %c0_3 = arith.constant 0 : index
    %c0_4 = arith.constant 0 : index
    %3 = vector.load %arg3[%c0_3, %c0_4] : memref<1x32xf32, #tpu.memory_space<vmem>>, vector<1x32xf32>
    %4 = vector.broadcast %3 : vector<1x32xf32> to vector<512x32xf32>
    %5 = arith.addf %2, %4 : vector<512x32xf32>
    %c0_5 = arith.constant 0 : index
    %c0_6 = arith.constant 0 : index
    %6 = vector.load %arg4[%c0_5, %c0_6] : memref<512x32xf32, #tpu.memory_space<vmem>>, vector<512x32xf32>
    tpu.vector_store %arg4[%c0_5, %c0_6], %5 {strides = array<i32>} : memref<512x32xf32, #tpu.memory_space<vmem>>, vector<512x32xf32>,
    return
  }
  func.func @transform_0(%arg0: i32) -> (i32, i32) {
    %c0_i32 = arith.constant 0 : i32
    %c0_i32_0 = arith.constant 0 : i32
    return %arg0, %c0_i32 : i32, i32
  }
  func.func @transform_1(%arg0: i32) -> (i32, i32) {
    %c0_i32 = arith.constant 0 : i32
    %c0_i32_0 = arith.constant 0 : i32
    %c0_i32_1 = arith.constant 0 : i32
    return %c0_i32, %c0_i32_0 : i32, i32
  }
  func.func @transform_2(%arg0: i32) -> (i32, i32) {
    %c0_i32 = arith.constant 0 : i32
    %c0_i32_0 = arith.constant 0 : i32
    %c0_i32_1 = arith.constant 0 : i32
    return %c0_i32, %c0_i32_0 : i32, i32
  }
  func.func @transform_3(%arg0: i32) -> (i32, i32) {
    %c0_i32 = arith.constant 0 : i32
    %c0_i32_0 = arith.constant 0 : i32
    return %arg0, %c0_i32 : i32, i32
  }
}

module attributes {stable_mosaic.version = 11 : i64} {
  func.func @_spectral_mix_kernel(%arg0: i32, %arg1: memref<32x2x64xf32, #tpu.memory_space<vmem>>, %arg2: memref<32x64x64xf32, #tpu.memory_space<vmem>>, %arg3: memref<32x2x64xf32, #tpu.memory_space<vmem>>) attributes {dimension_semantics = [#tpu.dimension_semantics<parallel>], iteration_bounds = array<i64: 1>, scalar_prefetch = 0 : i64, scratch_operands = 0 : i64, tpu.core_type = #tpu.core_type<tc>, window_params = [{transform_indices = @transform_0, window_bounds = array<i64: 32, 2, 64>}, {transform_indices = @transform_1, window_bounds = array<i64: 32, 64, 64>}, {transform_indices = @transform_2, window_bounds = array<i64: 32, 2, 64>}]} {
    %c0 = arith.constant 0 : index
    %c0_0 = arith.constant 0 : index
    %c0_1 = arith.constant 0 : index
    %0 = vector.load %arg1[%c0, %c0_0, %c0_1] : memref<32x2x64xf32, #tpu.memory_space<vmem>>, vector<32x2x64xf32>
    %c0_2 = arith.constant 0 : index
    %c0_3 = arith.constant 0 : index
    %c0_4 = arith.constant 0 : index
    %1 = vector.load %arg2[%c0_2, %c0_3, %c0_4] : memref<32x64x64xf32, #tpu.memory_space<vmem>>, vector<32x64x64xf32>
    "tpu.trace_start"() <{level = 10 : i32, message = "mbc,mcd->mbd"}> : () -> ()
    %cst = arith.constant dense<0.000000e+00> : vector<32x2x64xf32>
    %2 = tpu.matmul %0, %1, %cst {dimension_numbers = #tpu.dot_dimension_numbers<[2], [1], [1], [2], [0, 0, 0, 1, 1, 2], [0], [0]>} : vector<32x2x64xf32>, vector<32x64x64xf32>, vector<32x2x64xf32> -> vector<32x2x64xf32>
    "tpu.trace_stop"() : () -> ()
    %c0_5 = arith.constant 0 : index
    %c0_6 = arith.constant 0 : index
    %c0_7 = arith.constant 0 : index
    %3 = vector.load %arg3[%c0_5, %c0_6, %c0_7] : memref<32x2x64xf32, #tpu.memory_space<vmem>>, vector<32x2x64xf32>
    tpu.vector_store %arg3[%c0_5, %c0_6, %c0_7], %2 {strides = array<i32>} : memref<32x2x64xf32, #tpu.memory_space<vmem>>, vector<32x2x64xf32>,
    return
  }
  func.func @transform_0(%arg0: i32) -> (i32, i32, i32) {
    %c0_i32 = arith.constant 0 : i32
    %c0_i32_0 = arith.constant 0 : i32
    %c0_i32_1 = arith.constant 0 : i32
    return %arg0, %c0_i32, %c0_i32_0 : i32, i32, i32
  }
  func.func @transform_1(%arg0: i32) -> (i32, i32, i32) {
    %c0_i32 = arith.constant 0 : i32
    %c0_i32_0 = arith.constant 0 : i32
    %c0_i32_1 = arith.constant 0 : i32
    return %arg0, %c0_i32, %c0_i32_0 : i32, i32, i32
  }
  func.func @transform_2(%arg0: i32) -> (i32, i32, i32) {
    %c0_i32 = arith.constant 0 : i32
    %c0_i32_0 = arith.constant 0 : i32
    %c0_i32_1 = arith.constant 0 : i32
    return %arg0, %c0_i32, %c0_i32_0 : i32, i32, i32
  }
}

module attributes {stable_mosaic.version = 11 : i64} {
  func.func @_fused_block_kernel(%arg0: i32, %arg1: memref<512x32xf32, #tpu.memory_space<vmem>>, %arg2: memref<512x32xf32, #tpu.memory_space<vmem>>, %arg3: memref<32x32xf32, #tpu.memory_space<vmem>>, %arg4: memref<1x32xf32, #tpu.memory_space<vmem>>, %arg5: memref<1x32xf32, #tpu.memory_space<vmem>>, %arg6: memref<1x32xf32, #tpu.memory_space<vmem>>, %arg7: memref<512x32xf32, #tpu.memory_space<vmem>>) attributes {dimension_semantics = [#tpu.dimension_semantics<parallel>], iteration_bounds = array<i64: 1>, scalar_prefetch = 0 : i64, scratch_operands = 0 : i64, tpu.core_type = #tpu.core_type<tc>, window_params = [{transform_indices = @transform_0, window_bounds = array<i64: 512, 32>}, {transform_indices = @transform_1, window_bounds = array<i64: 512, 32>}, {pipeline_mode = #tpu.pipeline_mode<synchronous>, transform_indices = @transform_2, window_bounds = array<i64: 32, 32>}, {pipeline_mode = #tpu.pipeline_mode<synchronous>, transform_indices = @transform_3, window_bounds = array<i64: 1, 32>}, {pipeline_mode = #tpu.pipeline_mode<synchronous>, transform_indices = @transform_4, window_bounds = array<i64: 1, 32>}, {pipeline_mode = #tpu.pipeline_mode<synchronous>, transform_indices = @transform_5, window_bounds = array<i64: 1, 32>}, {transform_indices = @transform_6, window_bounds = array<i64: 512, 32>}]} {
    %c0 = arith.constant 0 : index
    %c0_0 = arith.constant 0 : index
    %0 = vector.load %arg1[%c0, %c0_0] : memref<512x32xf32, #tpu.memory_space<vmem>>, vector<512x32xf32>
    %c0_1 = arith.constant 0 : index
    %c0_2 = arith.constant 0 : index
    %1 = vector.load %arg3[%c0_1, %c0_2] : memref<32x32xf32, #tpu.memory_space<vmem>>, vector<32x32xf32>
    %cst = arith.constant dense<0.000000e+00> : vector<512x32xf32>
    %2 = tpu.matmul %0, %1, %cst {dimension_numbers = #tpu.dot_dimension_numbers<[1], [0], [0], [1], [0, 0, 1, 1], [], []>} : vector<512x32xf32>, vector<32x32xf32>, vector<512x32xf32> -> vector<512x32xf32>
    %c0_3 = arith.constant 0 : index
    %c0_4 = arith.constant 0 : index
    %3 = vector.load %arg2[%c0_3, %c0_4] : memref<512x32xf32, #tpu.memory_space<vmem>>, vector<512x32xf32>
    %4 = arith.addf %3, %2 : vector<512x32xf32>
    %c0_5 = arith.constant 0 : index
    %c0_6 = arith.constant 0 : index
    %5 = vector.load %arg4[%c0_5, %c0_6] : memref<1x32xf32, #tpu.memory_space<vmem>>, vector<1x32xf32>
    %6 = vector.broadcast %5 : vector<1x32xf32> to vector<512x32xf32>
    %7 = arith.addf %4, %6 : vector<512x32xf32>
    %cst_7 = arith.constant dense<0.000000e+00> : vector<512xf32>
    %8 = vector.multi_reduction <add>, %7, %cst_7 [1] : vector<512x32xf32> to vector<512xf32>
    %9 = vector.shape_cast %8 : vector<512xf32> to vector<512x1xf32>
    %cst_8 = arith.constant 3.200000e+01 : f32
    %10 = vector.broadcast %cst_8 : f32 to vector<512x1xf32>
    %11 = arith.divf %9, %10 : vector<512x1xf32>
    %12 = vector.broadcast %11 : vector<512x1xf32> to vector<512x32xf32>
    %13 = arith.subf %7, %12 : vector<512x32xf32>
    %14 = arith.mulf %13, %13 : vector<512x32xf32>
    %cst_9 = arith.constant dense<0.000000e+00> : vector<512xf32>
    %15 = vector.multi_reduction <add>, %14, %cst_9 [1] : vector<512x32xf32> to vector<512xf32>
    %16 = vector.shape_cast %15 : vector<512xf32> to vector<512x1xf32>
    %cst_10 = arith.constant 3.200000e+01 : f32
    %17 = vector.broadcast %cst_10 : f32 to vector<512x1xf32>
    %18 = arith.divf %16, %17 : vector<512x1xf32>
    %19 = vector.broadcast %11 : vector<512x1xf32> to vector<512x32xf32>
    %20 = arith.subf %7, %19 : vector<512x32xf32>
    %cst_11 = arith.constant 9.99999974E-6 : f32
    %21 = vector.broadcast %cst_11 : f32 to vector<512x1xf32>
    %22 = arith.addf %18, %21 : vector<512x1xf32>
    %23 = math.rsqrt %22 : vector<512x1xf32>
    %24 = vector.broadcast %23 : vector<512x1xf32> to vector<512x32xf32>
    %25 = arith.mulf %20, %24 : vector<512x32xf32>
    %c0_12 = arith.constant 0 : index
    %c0_13 = arith.constant 0 : index
    %26 = vector.load %arg5[%c0_12, %c0_13] : memref<1x32xf32, #tpu.memory_space<vmem>>, vector<1x32xf32>
    %27 = vector.broadcast %26 : vector<1x32xf32> to vector<512x32xf32>
    %28 = arith.mulf %25, %27 : vector<512x32xf32>
    %c0_14 = arith.constant 0 : index
    %c0_15 = arith.constant 0 : index
    %29 = vector.load %arg6[%c0_14, %c0_15] : memref<1x32xf32, #tpu.memory_space<vmem>>, vector<1x32xf32>
    %30 = vector.broadcast %29 : vector<1x32xf32> to vector<512x32xf32>
    %31 = arith.addf %28, %30 : vector<512x32xf32>
    %32 = arith.mulf %31, %31 : vector<512x32xf32>
    %cst_16 = arith.constant 5.000000e-01 : f32
    %33 = vector.broadcast %cst_16 : f32 to vector<512x32xf32>
    %34 = arith.mulf %33, %31 : vector<512x32xf32>
    %cst_17 = arith.constant 4.471500e-02 : f32
    %35 = vector.broadcast %cst_17 : f32 to vector<512x32xf32>
    %36 = arith.mulf %35, %32 : vector<512x32xf32>
    %37 = arith.mulf %36, %31 : vector<512x32xf32>
    %38 = arith.addf %31, %37 : vector<512x32xf32>
    %cst_18 = arith.constant 0.797884583 : f32
    %39 = vector.broadcast %cst_18 : f32 to vector<512x32xf32>
    %40 = arith.mulf %39, %38 : vector<512x32xf32>
    %41 = math.tanh %40 : vector<512x32xf32>
    %cst_19 = arith.constant 1.000000e+00 : f32
    %42 = vector.broadcast %cst_19 : f32 to vector<512x32xf32>
    %43 = arith.addf %42, %41 : vector<512x32xf32>
    %44 = arith.mulf %34, %43 : vector<512x32xf32>
    %c0_20 = arith.constant 0 : index
    %c0_21 = arith.constant 0 : index
    %45 = vector.load %arg7[%c0_20, %c0_21] : memref<512x32xf32, #tpu.memory_space<vmem>>, vector<512x32xf32>
    tpu.vector_store %arg7[%c0_20, %c0_21], %44 {strides = array<i32>} : memref<512x32xf32, #tpu.memory_space<vmem>>, vector<512x32xf32>,
    return
  }
  func.func @transform_0(%arg0: i32) -> (i32, i32) {
    %c0_i32 = arith.constant 0 : i32
    %c0_i32_0 = arith.constant 0 : i32
    return %arg0, %c0_i32 : i32, i32
  }
  func.func @transform_1(%arg0: i32) -> (i32, i32) {
    %c0_i32 = arith.constant 0 : i32
    %c0_i32_0 = arith.constant 0 : i32
    return %arg0, %c0_i32 : i32, i32
  }
  func.func @transform_2(%arg0: i32) -> (i32, i32) {
    %c0_i32 = arith.constant 0 : i32
    %c0_i32_0 = arith.constant 0 : i32
    %c0_i32_1 = arith.constant 0 : i32
    return %c0_i32, %c0_i32_0 : i32, i32
  }
  func.func @transform_3(%arg0: i32) -> (i32, i32) {
    %c0_i32 = arith.constant 0 : i32
    %c0_i32_0 = arith.constant 0 : i32
    %c0_i32_1 = arith.constant 0 : i32
    return %c0_i32, %c0_i32_0 : i32, i32
  }
  func.func @transform_4(%arg0: i32) -> (i32, i32) {
    %c0_i32 = arith.constant 0 : i32
    %c0_i32_0 = arith.constant 0 : i32
    %c0_i32_1 = arith.constant 0 : i32
    return %c0_i32, %c0_i32_0 : i32, i32
  }
  func.func @transform_5(%arg0: i32) -> (i32, i32) {
    %c0_i32 = arith.constant 0 : i32
    %c0_i32_0 = arith.constant 0 : i32
    %c0_i32_1 = arith.constant 0 : i32
    return %c0_i32, %c0_i32_0 : i32, i32
  }
  func.func @transform_6(%arg0: i32) -> (i32, i32) {
    %c0_i32 = arith.constant 0 : i32
    %c0_i32_0 = arith.constant 0 : i32
    return %arg0, %c0_i32 : i32, i32
  }
}

module attributes {stable_mosaic.version = 11 : i64} {
  func.func @_pointwise_kernel(%arg0: i32, %arg1: memref<512x32xf32, #tpu.memory_space<vmem>>, %arg2: memref<32x2xf32, #tpu.memory_space<vmem>>, %arg3: memref<1x2xf32, #tpu.memory_space<vmem>>, %arg4: memref<512x2xf32, #tpu.memory_space<vmem>>) attributes {dimension_semantics = [#tpu.dimension_semantics<parallel>], iteration_bounds = array<i64: 1>, scalar_prefetch = 0 : i64, scratch_operands = 0 : i64, tpu.core_type = #tpu.core_type<tc>, window_params = [{transform_indices = @transform_0, window_bounds = array<i64: 512, 32>}, {pipeline_mode = #tpu.pipeline_mode<synchronous>, transform_indices = @transform_1, window_bounds = array<i64: 32, 2>}, {pipeline_mode = #tpu.pipeline_mode<synchronous>, transform_indices = @transform_2, window_bounds = array<i64: 1, 2>}, {transform_indices = @transform_3, window_bounds = array<i64: 512, 2>}]} {
    %c0 = arith.constant 0 : index
    %c0_0 = arith.constant 0 : index
    %0 = vector.load %arg1[%c0, %c0_0] : memref<512x32xf32, #tpu.memory_space<vmem>>, vector<512x32xf32>
    %c0_1 = arith.constant 0 : index
    %c0_2 = arith.constant 0 : index
    %1 = vector.load %arg2[%c0_1, %c0_2] : memref<32x2xf32, #tpu.memory_space<vmem>>, vector<32x2xf32>
    %cst = arith.constant dense<0.000000e+00> : vector<512x2xf32>
    %2 = tpu.matmul %0, %1, %cst {dimension_numbers = #tpu.dot_dimension_numbers<[1], [0], [0], [1], [0, 0, 1, 1], [], []>} : vector<512x32xf32>, vector<32x2xf32>, vector<512x2xf32> -> vector<512x2xf32>
    %c0_3 = arith.constant 0 : index
    %c0_4 = arith.constant 0 : index
    %3 = vector.load %arg3[%c0_3, %c0_4] : memref<1x2xf32, #tpu.memory_space<vmem>>, vector<1x2xf32>
    %4 = vector.broadcast %3 : vector<1x2xf32> to vector<512x2xf32>
    %5 = arith.addf %2, %4 : vector<512x2xf32>
    %c0_5 = arith.constant 0 : index
    %c0_6 = arith.constant 0 : index
    %6 = vector.load %arg4[%c0_5, %c0_6] : memref<512x2xf32, #tpu.memory_space<vmem>>, vector<512x2xf32>
    tpu.vector_store %arg4[%c0_5, %c0_6], %5 {strides = array<i32>} : memref<512x2xf32, #tpu.memory_space<vmem>>, vector<512x2xf32>,
    return
  }
  func.func @transform_0(%arg0: i32) -> (i32, i32) {
    %c0_i32 = arith.constant 0 : i32
    %c0_i32_0 = arith.constant 0 : i32
    return %arg0, %c0_i32 : i32, i32
  }
  func.func @transform_1(%arg0: i32) -> (i32, i32) {
    %c0_i32 = arith.constant 0 : i32
    %c0_i32_0 = arith.constant 0 : i32
    %c0_i32_1 = arith.constant 0 : i32
    return %c0_i32, %c0_i32_0 : i32, i32
  }
  func.func @transform_2(%arg0: i32) -> (i32, i32) {
    %c0_i32 = arith.constant 0 : i32
    %c0_i32_0 = arith.constant 0 : i32
    %c0_i32_1 = arith.constant 0 : i32
    return %c0_i32, %c0_i32_0 : i32, i32
  }
  func.func @transform_3(%arg0: i32) -> (i32, i32) {
    %c0_i32 = arith.constant 0 : i32
    %c0_i32_0 = arith.constant 0 : i32
    return %arg0, %c0_i32 : i32, i32
  }
}

</mosaic_0001>

<bundles_post_ra>
// kernel: fno_forward.6
= control target key start
LH: loop header
LB: loop body
LE: loop exit
PB: predicated region body
PF: predicated region fallthrough
CT: control target
= control target key end

     0   :  { %vm279_vm0 = vcmask 1044480   ;;  %vm86_vm1 = vcmask 39936   ;;  %vm668_vm2 = vcmask 261120   ;;  %s1572_s1 = inlined_call_operand.vmem [shape: f32[5,32], index: 1, kind: input, shape index: {}]   ;;  %s1573_s0 = inlined_call_operand.vmem [shape: f32[512,5], index: 0, kind: input, shape index: {}]   ;;  %s1574_s2 = inlined_call_operand.vmem [shape: f32[1,32], index: 2, kind: input, shape index: {}]   ;;  %s1575_s3 = inlined_call_operand.vmem [shape: f32[512,32], index: 3, kind: output, shape index: {}]  }
   0x1   :  { %v78_v0 = vld [vmem:[%s1572_s1] sm:$0x1f]  ;;  %v15_v3 = vld [vmem:[%s1573_s0 + $0x8] sm:$0xff]  ;;  %v16_v5 = vld [vmem:[%s1573_s0 + $0x10] sm:$0xff] }
   0x2   :  { %v14_v1 = vld [vmem:[%s1573_s0] sm:$0xff]  ;;  %868 = vmatprep.subr.msk.mxu0 %vm279_vm0, %v78_v0  ;;  %966 = vmatprep.subr.msk.mxu1 %vm279_vm0, %v78_v0  ;;  %v47_v4 = vld [vmem:[%s1573_s0 + $0x108] sm:$0xff]  ;;  %v48_v6 = vld [vmem:[%s1573_s0 + $0x110] sm:$0xff] }
   0x3   :  { %v46_v2 = vld [vmem:[%s1573_s0 + $0x100] sm:$0xff]  ;;  %869 = vmatpush3.msk.msra.mxu0 %vm279_vm0, %v78_v0  ;;  %967 = vmatpush3.msk.msra.mxu1 %vm279_vm0, %v78_v0  ;;  %v17_v7 = vld [vmem:[%s1573_s0 + $0x18] sm:$0xff]  ;;  %v19_v11 = vld [vmem:[%s1573_s0 + $0x28] sm:$0xff] }
   0x4   :  { %870 = vmatprep.mubr.msk.f32.mxu0 %vm86_vm1, %v14_v1  ;;  %918 = vmatprep.mubr.msk.f32.mxu1 %vm86_vm1, %v46_v2  ;;  %v49_v8 = vld [vmem:[%s1573_s0 + $0x118] sm:$0xff]  ;;  %v18_v9 = vld [vmem:[%s1573_s0 + $0x20] sm:$0xff]  ;;  %v51_v12 = vld [vmem:[%s1573_s0 + $0x128] sm:$0xff] }
   0x5   :  { %871 = vmatmul.mubr.msk.f32.vlgmr.msra.gmra.mxu0 %vm86_vm1, %v15_v3  ;;  %919 = vmatmul.mubr.msk.f32.vlgmr.msra.gmra.mxu1 %vm86_vm1, %v47_v4  ;;  %v50_v10 = vld [vmem:[%s1573_s0 + $0x120] sm:$0xff]  ;;  %v20_v13 = vld [vmem:[%s1573_s0 + $0x30] sm:$0xff]  ;;  %v21_v15 = vld [vmem:[%s1573_s0 + $0x38] sm:$0xff] }
   0x6   :  { %873 = vmatprep.mubr.msk.f32.mxu0 %vm86_vm1, %v16_v5  ;;  %921 = vmatprep.mubr.msk.f32.mxu1 %vm86_vm1, %v48_v6  ;;  %v52_v14 = vld [vmem:[%s1573_s0 + $0x130] sm:$0xff]  ;;  %v53_v16 = vld [vmem:[%s1573_s0 + $0x138] sm:$0xff]  ;;  %v22_v17 = vld [vmem:[%s1573_s0 + $0x40] sm:$0xff] }
   0x7   :  { %v54_v18 = vld [vmem:[%s1573_s0 + $0x140] sm:$0xff]  ;;  %v23_v19 = vld [vmem:[%s1573_s0 + $0x48] sm:$0xff]  ;;  %v24_v21 = vld [vmem:[%s1573_s0 + $0x50] sm:$0xff] }
   0x8   :  { %v55_v20 = vld [vmem:[%s1573_s0 + $0x148] sm:$0xff]  ;;  %v56_v22 = vld [vmem:[%s1573_s0 + $0x150] sm:$0xff]  ;;  %v25_v23 = vld [vmem:[%s1573_s0 + $0x58] sm:$0xff] }
   0x9   :  { %874 = vmatmul.mubr.msk.f32.gmra.mxu0 %vm86_vm1, %v17_v7  ;;  %922 = vmatmul.mubr.msk.f32.gmra.mxu1 %vm86_vm1, %v49_v8  ;;  %v57_v24 = vld [vmem:[%s1573_s0 + $0x158] sm:$0xff]  ;;  %v26_v25 = vld [vmem:[%s1573_s0 + $0x60] sm:$0xff]  ;;  %v27_v27 = vld [vmem:[%s1573_s0 + $0x68] sm:$0xff] }
   0xa   :  { %876 = vmatprep.mubr.msk.f32.mxu0 %vm86_vm1, %v18_v9  ;;  %924 = vmatprep.mubr.msk.f32.mxu1 %vm86_vm1, %v50_v10  ;;  %v58_v26 = vld [vmem:[%s1573_s0 + $0x160] sm:$0xff]  ;;  %v59_v28 = vld [vmem:[%s1573_s0 + $0x168] sm:$0xff]  ;;  %v28_v29 = vld [vmem:[%s1573_s0 + $0x70] sm:$0xff] }
   0xb   :  { %v60_v30 = vld [vmem:[%s1573_s0 + $0x170] sm:$0xff]  ;;  %v29_v31 = vld [vmem:[%s1573_s0 + $0x78] sm:$0xff]  ;;  %v30_v33 = vld [vmem:[%s1573_s0 + $0x80] sm:$0xff] }
   0xc   :  { %v61_v32 = vld [vmem:[%s1573_s0 + $0x178] sm:$0xff]  ;;  %v62_v34 = vld [vmem:[%s1573_s0 + $0x180] sm:$0xff]  ;;  %v31_v35 = vld [vmem:[%s1573_s0 + $0x88] sm:$0xff] }
   0xd   :  { %877 = vmatmul.mubr.msk.f32.gmra.mxu0 %vm86_vm1, %v19_v11  ;;  %925 = vmatmul.mubr.msk.f32.gmra.mxu1 %vm86_vm1, %v51_v12  ;;  %v63_v36 = vld [vmem:[%s1573_s0 + $0x188] sm:$0xff]  ;;  %v32_v37 = vld [vmem:[%s1573_s0 + $0x90] sm:$0xff]  ;;  %v33_v39 = vld [vmem:[%s1573_s0 + $0x98] sm:$0xff] }
   0xe   :  { %879 = vmatprep.mubr.msk.f32.mxu0 %vm86_vm1, %v20_v13  ;;  %927 = vmatprep.mubr.msk.f32.mxu1 %vm86_vm1, %v52_v14  ;;  %v64_v38 = vld [vmem:[%s1573_s0 + $0x190] sm:$0xff]  ;;  %v65_v40 = vld [vmem:[%s1573_s0 + $0x198] sm:$0xff]  ;;  %v34_v41 = vld [vmem:[%s1573_s0 + $0xa0] sm:$0xff] }
   0xf   :  { %v66_v42 = vld [vmem:[%s1573_s0 + $0x1a0] sm:$0xff]  ;;  %v35_v43 = vld [vmem:[%s1573_s0 + $0xa8] sm:$0xff]  ;;  %v36_v45 = vld [vmem:[%s1573_s0 + $0xb0] sm:$0xff] }
  0x10   :  { %v67_v44 = vld [vmem:[%s1573_s0 + $0x1a8] sm:$0xff]  ;;  %v68_v46 = vld [vmem:[%s1573_s0 + $0x1b0] sm:$0xff]  ;;  %v37_v47 = vld [vmem:[%s1573_s0 + $0xb8] sm:$0xff] }
  0x11   :  { %880 = vmatmul.mubr.msk.f32.gmra.mxu0 %vm86_vm1, %v21_v15  ;;  %928 = vmatmul.mubr.msk.f32.gmra.mxu1 %vm86_vm1, %v53_v16  ;;  %v69_v48 = vld [vmem:[%s1573_s0 + $0x1b8] sm:$0xff]  ;;  %v38_v49 = vld [vmem:[%s1573_s0 + $0xc0] sm:$0xff]  ;;  %v39_v51 = vld [vmem:[%s1573_s0 + $0xc8] sm:$0xff] }
  0x12   :  { %882 = vmatprep.mubr.msk.f32.mxu0 %vm86_vm1, %v22_v17  ;;  %930 = vmatprep.mubr.msk.f32.mxu1 %vm86_vm1, %v54_v18  ;;  %v70_v50 = vld [vmem:[%s1573_s0 + $0x1c0] sm:$0xff]  ;;  %v71_v52 = vld [vmem:[%s1573_s0 + $0x1c8] sm:$0xff]  ;;  %v40_v53 = vld [vmem:[%s1573_s0 + $0xd0] sm:$0xff] }
  0x13   :  { %v72_v54 = vld [vmem:[%s1573_s0 + $0x1d0] sm:$0xff]  ;;  %v41_v55 = vld [vmem:[%s1573_s0 + $0xd8] sm:$0xff]  ;;  %v42_v57 = vld [vmem:[%s1573_s0 + $0xe0] sm:$0xff] }
  0x14   :  { %v73_v56 = vld [vmem:[%s1573_s0 + $0x1d8] sm:$0xff]  ;;  %v74_v58 = vld [vmem:[%s1573_s0 + $0x1e0] sm:$0xff]  ;;  %v43_v59 = vld [vmem:[%s1573_s0 + $0xe8] sm:$0xff] }
  0x15   :  { %883 = vmatmul.mubr.msk.f32.gmra.mxu0 %vm86_vm1, %v23_v19  ;;  %931 = vmatmul.mubr.msk.f32.gmra.mxu1 %vm86_vm1, %v55_v20  ;;  %v75_v60 = vld [vmem:[%s1573_s0 + $0x1e8] sm:$0xff]  ;;  %v44_v61 = vld [vmem:[%s1573_s0 + $0xf0] sm:$0xff]  ;;  %v45_v63 = vld [vmem:[%s1573_s0 + $0xf8] sm:$0xff] }
  0x16   :  { %885 = vmatprep.mubr.msk.f32.mxu0 %vm86_vm1, %v24_v21  ;;  %933 = vmatprep.mubr.msk.f32.mxu1 %vm86_vm1, %v56_v22  ;;  %v76_v62 = vld [vmem:[%s1573_s0 + $0x1f0] sm:$0xff]  ;;  %v77_v0 = vld [vmem:[%s1573_s0 + $0x1f8] sm:$0xff]  ;;  %v1250_v1 = vld [vmem:[%s1574_s2] ss:$0 sm:$0xff] }
  0x19   :  { %886 = vmatmul.mubr.msk.f32.gmra.mxu0 %vm86_vm1, %v25_v23  ;;  %934 = vmatmul.mubr.msk.f32.gmra.mxu1 %vm86_vm1, %v57_v24 }
  0x1a   :  { %888 = vmatprep.mubr.msk.f32.mxu0 %vm86_vm1, %v26_v25  ;;  %936 = vmatprep.mubr.msk.f32.mxu1 %vm86_vm1, %v58_v26 }
  0x1d   :  { %889 = vmatmul.mubr.msk.f32.gmra.mxu0 %vm86_vm1, %v27_v27  ;;  %937 = vmatmul.mubr.msk.f32.gmra.mxu1 %vm86_vm1, %v59_v28 }
  0x1e   :  { %891 = vmatprep.mubr.msk.f32.mxu0 %vm86_vm1, %v28_v29  ;;  %939 = vmatprep.mubr.msk.f32.mxu1 %vm86_vm1, %v60_v30 }
  0x21   :  { %892 = vmatmul.mubr.msk.f32.gmra.mxu0 %vm86_vm1, %v29_v31  ;;  %940 = vmatmul.mubr.msk.f32.gmra.mxu1 %vm86_vm1, %v61_v32 }
  0x22   :  { %894 = vmatprep.mubr.msk.f32.mxu0 %vm86_vm1, %v30_v33  ;;  %942 = vmatprep.mubr.msk.f32.mxu1 %vm86_vm1, %v62_v34 }
  0x25   :  { %895 = vmatmul.mubr.msk.f32.gmra.mxu0 %vm86_vm1, %v31_v35  ;;  %943 = vmatmul.mubr.msk.f32.gmra.mxu1 %vm86_vm1, %v63_v36 }
  0x26   :  { %897 = vmatprep.mubr.msk.f32.mxu0 %vm86_vm1, %v32_v37  ;;  %945 = vmatprep.mubr.msk.f32.mxu1 %vm86_vm1, %v64_v38 }
  0x29   :  { %898 = vmatmul.mubr.msk.f32.gmra.mxu0 %vm86_vm1, %v33_v39  ;;  %946 = vmatmul.mubr.msk.f32.gmra.mxu1 %vm86_vm1, %v65_v40 }
  0x2a   :  { %900 = vmatprep.mubr.msk.f32.mxu0 %vm86_vm1, %v34_v41  ;;  %948 = vmatprep.mubr.msk.f32.mxu1 %vm86_vm1, %v66_v42 }
  0x2d   :  { %901 = vmatmul.mubr.msk.f32.gmra.mxu0 %vm86_vm1, %v35_v43  ;;  %949 = vmatmul.mubr.msk.f32.gmra.mxu1 %vm86_vm1, %v67_v44 }
  0x2e   :  { %903 = vmatprep.mubr.msk.f32.mxu0 %vm86_vm1, %v36_v45  ;;  %951 = vmatprep.mubr.msk.f32.mxu1 %vm86_vm1, %v68_v46 }
  0x31   :  { %904 = vmatmul.mubr.msk.f32.gmra.mxu0 %vm86_vm1, %v37_v47  ;;  %952 = vmatmul.mubr.msk.f32.gmra.mxu1 %vm86_vm1, %v69_v48 }
  0x32   :  { %906 = vmatprep.mubr.msk.f32.mxu0 %vm86_vm1, %v38_v49  ;;  %954 = vmatprep.mubr.msk.f32.mxu1 %vm86_vm1, %v70_v50 }
  0x35   :  { %907 = vmatmul.mubr.msk.f32.gmra.mxu0 %vm86_vm1, %v39_v51  ;;  %955 = vmatmul.mubr.msk.f32.gmra.mxu1 %vm86_vm1, %v71_v52 }
  0x36   :  { %909 = vmatprep.mubr.msk.f32.mxu0 %vm86_vm1, %v40_v53  ;;  %957 = vmatprep.mubr.msk.f32.mxu1 %vm86_vm1, %v72_v54 }
  0x39   :  { %910 = vmatmul.mubr.msk.f32.gmra.mxu0 %vm86_vm1, %v41_v55  ;;  %958 = vmatmul.mubr.msk.f32.gmra.mxu1 %vm86_vm1, %v73_v56 }
  0x3a   :  { %912 = vmatprep.mubr.msk.f32.mxu0 %vm86_vm1, %v42_v57  ;;  %960 = vmatprep.mubr.msk.f32.mxu1 %vm86_vm1, %v74_v58 }
  0x3d   :  { %913 = vmatmul.mubr.msk.f32.gmra.mxu0 %vm86_vm1, %v43_v59  ;;  %961 = vmatmul.mubr.msk.f32.gmra.mxu1 %vm86_vm1, %v75_v60 }
  0x3e   :  { %915 = vmatprep.mubr.msk.f32.mxu0 %vm86_vm1, %v44_v61  ;;  %963 = vmatprep.mubr.msk.f32.mxu1 %vm86_vm1, %v76_v62 }
  0x41   :  { %916 = vmatmul.mubr.msk.f32.gmra.mxu0 %vm86_vm1, %v45_v63  ;;  %964 = vmatmul.mubr.msk.f32.gmra.mxu1 %vm86_vm1, %v77_v0 }
  0xc5   :  { %v872_v2 = vpop.f32.mrf.mxu0  ;;  %v920_v3 = vpop.f32.mrf.mxu1 }
  0xc6   :  { %v355_v4 = vadd.f32 %v872_v2, %v1250_v1  ;;  %v515_v5 = vadd.f32 %v920_v3, %v1250_v1 }
  0xc7   :  { %v349_v6 = vpop.f32.mrf.mxu0  ;;  %v509_v7 = vpop.f32.mrf.mxu1 }
  0xc8   :  { %670 = vst.msk [vmem:[%s1575_s3 + $0x8] sm:$0xff] %vm668_vm2, %v355_v4  ;;  %702 = vst.msk [vmem:[%s1575_s3 + $0x108] sm:$0xff] %vm668_vm2, %v515_v5  ;;  %v350_v8 = vadd.f32 %v1250_v1, %v349_v6  ;;  %v510_v9 = vadd.f32 %v1250_v1, %v509_v7 }
  0xc9   :  { %v875_v10 = vpop.f32.mrf.mxu0  ;;  %v923_v11 = vpop.f32.mrf.mxu1 }
  0xca   :  { %669 = vst.msk [vmem:[%s1575_s3] sm:$0xff] %vm668_vm2, %v350_v8  ;;  %701 = vst.msk [vmem:[%s1575_s3 + $0x100] sm:$0xff] %vm668_vm2, %v510_v9  ;;  %v365_v12 = vadd.f32 %v875_v10, %v1250_v1  ;;  %v525_v13 = vadd.f32 %v923_v11, %v1250_v1 }
  0xcb   :  { %v359_v14 = vpop.f32.mrf.mxu0  ;;  %v519_v15 = vpop.f32.mrf.mxu1 }
  0xcc   :  { %672 = vst.msk [vmem:[%s1575_s3 + $0x18] sm:$0xff] %vm668_vm2, %v365_v12  ;;  %704 = vst.msk [vmem:[%s1575_s3 + $0x118] sm:$0xff] %vm668_vm2, %v525_v13  ;;  %v360_v16 = vadd.f32 %v1250_v1, %v359_v14  ;;  %v520_v17 = vadd.f32 %v1250_v1, %v519_v15 }
  0xcd   :  { %v878_v18 = vpop.f32.mrf.mxu0  ;;  %v926_v19 = vpop.f32.mrf.mxu1 }
  0xce   :  { %671 = vst.msk [vmem:[%s1575_s3 + $0x10] sm:$0xff] %vm668_vm2, %v360_v16  ;;  %703 = vst.msk [vmem:[%s1575_s3 + $0x110] sm:$0xff] %vm668_vm2, %v520_v17  ;;  %v375_v20 = vadd.f32 %v878_v18, %v1250_v1  ;;  %v535_v21 = vadd.f32 %v926_v19, %v1250_v1 }
  0xcf   :  { %v369_v22 = vpop.f32.mrf.mxu0  ;;  %v529_v23 = vpop.f32.mrf.mxu1 }
  0xd0   :  { %674 = vst.msk [vmem:[%s1575_s3 + $0x28] sm:$0xff] %vm668_vm2, %v375_v20  ;;  %706 = vst.msk [vmem:[%s1575_s3 + $0x128] sm:$0xff] %vm668_vm2, %v535_v21  ;;  %v370_v24 = vadd.f32 %v1250_v1, %v369_v22  ;;  %v530_v25 = vadd.f32 %v1250_v1, %v529_v23 }
  0xd1   :  { %v881_v26 = vpop.f32.mrf.mxu0  ;;  %v929_v27 = vpop.f32.mrf.mxu1 }
  0xd2   :  { %673 = vst.msk [vmem:[%s1575_s3 + $0x20] sm:$0xff] %vm668_vm2, %v370_v24  ;;  %705 = vst.msk [vmem:[%s1575_s3 + $0x120] sm:$0xff] %vm668_vm2, %v530_v25  ;;  %v385_v28 = vadd.f32 %v881_v26, %v1250_v1  ;;  %v545_v29 = vadd.f32 %v929_v27, %v1250_v1 }
  0xd3   :  { %v379_v30 = vpop.f32.mrf.mxu0  ;;  %v539_v31 = vpop.f32.mrf.mxu1 }
  0xd4   :  { %676 = vst.msk [vmem:[%s1575_s3 + $0x38] sm:$0xff] %vm668_vm2, %v385_v28  ;;  %708 = vst.msk [vmem:[%s1575_s3 + $0x138] sm:$0xff] %vm668_vm2, %v545_v29  ;;  %v380_v32 = vadd.f32 %v1250_v1, %v379_v30  ;;  %v540_v33 = vadd.f32 %v1250_v1, %v539_v31 }
  0xd5   :  { %v884_v34 = vpop.f32.mrf.mxu0  ;;  %v932_v35 = vpop.f32.mrf.mxu1 }
  0xd6   :  { %675 = vst.msk [vmem:[%s1575_s3 + $0x30] sm:$0xff] %vm668_vm2, %v380_v32  ;;  %707 = vst.msk [vmem:[%s1575_s3 + $0x130] sm:$0xff] %vm668_vm2, %v540_v33  ;;  %v395_v36 = vadd.f32 %v884_v34, %v1250_v1  ;;  %v555_v37 = vadd.f32 %v932_v35, %v1250_v1 }
  0xd7   :  { %v389_v38 = vpop.f32.mrf.mxu0  ;;  %v549_v39 = vpop.f32.mrf.mxu1 }
  0xd8   :  { %678 = vst.msk [vmem:[%s1575_s3 + $0x48] sm:$0xff] %vm668_vm2, %v395_v36  ;;  %710 = vst.msk [vmem:[%s1575_s3 + $0x148] sm:$0xff] %vm668_vm2, %v555_v37  ;;  %v390_v40 = vadd.f32 %v1250_v1, %v389_v38  ;;  %v550_v41 = vadd.f32 %v1250_v1, %v549_v39 }
  0xd9   :  { %v887_v42 = vpop.f32.mrf.mxu0  ;;  %v935_v43 = vpop.f32.mrf.mxu1 }
  0xda   :  { %677 = vst.msk [vmem:[%s1575_s3 + $0x40] sm:$0xff] %vm668_vm2, %v390_v40  ;;  %709 = vst.msk [vmem:[%s1575_s3 + $0x140] sm:$0xff] %vm668_vm2, %v550_v41  ;;  %v405_v44 = vadd.f32 %v887_v42, %v1250_v1  ;;  %v565_v45 = vadd.f32 %v935_v43, %v1250_v1 }
  0xdb   :  { %v399_v46 = vpop.f32.mrf.mxu0  ;;  %v559_v47 = vpop.f32.mrf.mxu1 }
  0xdc   :  { %680 = vst.msk [vmem:[%s1575_s3 + $0x58] sm:$0xff] %vm668_vm2, %v405_v44  ;;  %712 = vst.msk [vmem:[%s1575_s3 + $0x158] sm:$0xff] %vm668_vm2, %v565_v45  ;;  %v400_v48 = vadd.f32 %v1250_v1, %v399_v46  ;;  %v560_v49 = vadd.f32 %v1250_v1, %v559_v47 }
  0xdd   :  { %v890_v50 = vpop.f32.mrf.mxu0  ;;  %v938_v51 = vpop.f32.mrf.mxu1 }
  0xde   :  { %679 = vst.msk [vmem:[%s1575_s3 + $0x50] sm:$0xff] %vm668_vm2, %v400_v48  ;;  %711 = vst.msk [vmem:[%s1575_s3 + $0x150] sm:$0xff] %vm668_vm2, %v560_v49  ;;  %v415_v52 = vadd.f32 %v890_v50, %v1250_v1  ;;  %v575_v53 = vadd.f32 %v938_v51, %v1250_v1 }
  0xdf   :  { %v409_v54 = vpop.f32.mrf.mxu0  ;;  %v569_v55 = vpop.f32.mrf.mxu1 }
  0xe0   :  { %682 = vst.msk [vmem:[%s1575_s3 + $0x68] sm:$0xff] %vm668_vm2, %v415_v52  ;;  %714 = vst.msk [vmem:[%s1575_s3 + $0x168] sm:$0xff] %vm668_vm2, %v575_v53  ;;  %v410_v56 = vadd.f32 %v1250_v1, %v409_v54  ;;  %v570_v57 = vadd.f32 %v1250_v1, %v569_v55 }
  0xe1   :  { %v893_v58 = vpop.f32.mrf.mxu0  ;;  %v941_v59 = vpop.f32.mrf.mxu1 }
  0xe2   :  { %681 = vst.msk [vmem:[%s1575_s3 + $0x60] sm:$0xff] %vm668_vm2, %v410_v56  ;;  %713 = vst.msk [vmem:[%s1575_s3 + $0x160] sm:$0xff] %vm668_vm2, %v570_v57  ;;  %v425_v60 = vadd.f32 %v893_v58, %v1250_v1  ;;  %v585_v61 = vadd.f32 %v941_v59, %v1250_v1 }
  0xe3   :  { %v419_v62 = vpop.f32.mrf.mxu0  ;;  %v579_v63 = vpop.f32.mrf.mxu1 }
  0xe4   :  { %684 = vst.msk [vmem:[%s1575_s3 + $0x78] sm:$0xff] %vm668_vm2, %v425_v60  ;;  %716 = vst.msk [vmem:[%s1575_s3 + $0x178] sm:$0xff] %vm668_vm2, %v585_v61  ;;  %v420_v0 = vadd.f32 %v1250_v1, %v419_v62  ;;  %v580_v2 = vadd.f32 %v1250_v1, %v579_v63 }
  0xe5   :  { %v896_v3 = vpop.f32.mrf.mxu0  ;;  %v944_v4 = vpop.f32.mrf.mxu1 }
  0xe6   :  { %683 = vst.msk [vmem:[%s1575_s3 + $0x70] sm:$0xff] %vm668_vm2, %v420_v0  ;;  %715 = vst.msk [vmem:[%s1575_s3 + $0x170] sm:$0xff] %vm668_vm2, %v580_v2  ;;  %v435_v5 = vadd.f32 %v896_v3, %v1250_v1  ;;  %v595_v6 = vadd.f32 %v944_v4, %v1250_v1 }
  0xe7   :  { %v429_v7 = vpop.f32.mrf.mxu0  ;;  %v589_v8 = vpop.f32.mrf.mxu1 }
  0xe8   :  { %686 = vst.msk [vmem:[%s1575_s3 + $0x88] sm:$0xff] %vm668_vm2, %v435_v5  ;;  %718 = vst.msk [vmem:[%s1575_s3 + $0x188] sm:$0xff] %vm668_vm2, %v595_v6  ;;  %v430_v9 = vadd.f32 %v1250_v1, %v429_v7  ;;  %v590_v10 = vadd.f32 %v1250_v1, %v589_v8 }
  0xe9   :  { %v899_v11 = vpop.f32.mrf.mxu0  ;;  %v947_v12 = vpop.f32.mrf.mxu1 }
  0xea   :  { %685 = vst.msk [vmem:[%s1575_s3 + $0x80] sm:$0xff] %vm668_vm2, %v430_v9  ;;  %717 = vst.msk [vmem:[%s1575_s3 + $0x180] sm:$0xff] %vm668_vm2, %v590_v10  ;;  %v445_v13 = vadd.f32 %v899_v11, %v1250_v1  ;;  %v605_v14 = vadd.f32 %v947_v12, %v1250_v1 }
  0xeb   :  { %v439_v15 = vpop.f32.mrf.mxu0  ;;  %v599_v16 = vpop.f32.mrf.mxu1 }
  0xec   :  { %688 = vst.msk [vmem:[%s1575_s3 + $0x98] sm:$0xff] %vm668_vm2, %v445_v13  ;;  %720 = vst.msk [vmem:[%s1575_s3 + $0x198] sm:$0xff] %vm668_vm2, %v605_v14  ;;  %v440_v17 = vadd.f32 %v1250_v1, %v439_v15  ;;  %v600_v18 = vadd.f32 %v1250_v1, %v599_v16 }
  0xed   :  { %v902_v19 = vpop.f32.mrf.mxu0  ;;  %v950_v20 = vpop.f32.mrf.mxu1 }
  0xee   :  { %687 = vst.msk [vmem:[%s1575_s3 + $0x90] sm:$0xff] %vm668_vm2, %v440_v17  ;;  %719 = vst.msk [vmem:[%s1575_s3 + $0x190] sm:$0xff] %vm668_vm2, %v600_v18  ;;  %v455_v21 = vadd.f32 %v902_v19, %v1250_v1  ;;  %v615_v22 = vadd.f32 %v950_v20, %v1250_v1 }
  0xef   :  { %v449_v23 = vpop.f32.mrf.mxu0  ;;  %v609_v24 = vpop.f32.mrf.mxu1 }
  0xf0   :  { %690 = vst.msk [vmem:[%s1575_s3 + $0xa8] sm:$0xff] %vm668_vm2, %v455_v21  ;;  %722 = vst.msk [vmem:[%s1575_s3 + $0x1a8] sm:$0xff] %vm668_vm2, %v615_v22  ;;  %v450_v25 = vadd.f32 %v1250_v1, %v449_v23  ;;  %v610_v26 = vadd.f32 %v1250_v1, %v609_v24 }
  0xf1   :  { %v905_v27 = vpop.f32.mrf.mxu0  ;;  %v953_v28 = vpop.f32.mrf.mxu1 }
  0xf2   :  { %689 = vst.msk [vmem:[%s1575_s3 + $0xa0] sm:$0xff] %vm668_vm2, %v450_v25  ;;  %721 = vst.msk [vmem:[%s1575_s3 + $0x1a0] sm:$0xff] %vm668_vm2, %v610_v26  ;;  %v465_v29 = vadd.f32 %v905_v27, %v1250_v1  ;;  %v625_v30 = vadd.f32 %v953_v28, %v1250_v1 }
  0xf3   :  { %v459_v31 = vpop.f32.mrf.mxu0  ;;  %v619_v32 = vpop.f32.mrf.mxu1 }
  0xf4   :  { %692 = vst.msk [vmem:[%s1575_s3 + $0xb8] sm:$0xff] %vm668_vm2, %v465_v29  ;;  %724 = vst.msk [vmem:[%s1575_s3 + $0x1b8] sm:$0xff] %vm668_vm2, %v625_v30  ;;  %v460_v33 = vadd.f32 %v1250_v1, %v459_v31  ;;  %v620_v34 = vadd.f32 %v1250_v1, %v619_v32 }
  0xf5   :  { %v908_v35 = vpop.f32.mrf.mxu0  ;;  %v956_v36 = vpop.f32.mrf.mxu1 }
  0xf6   :  { %691 = vst.msk [vmem:[%s1575_s3 + $0xb0] sm:$0xff] %vm668_vm2, %v460_v33  ;;  %723 = vst.msk [vmem:[%s1575_s3 + $0x1b0] sm:$0xff] %vm668_vm2, %v620_v34  ;;  %v475_v37 = vadd.f32 %v908_v35, %v1250_v1  ;;  %v635_v38 = vadd.f32 %v956_v36, %v1250_v1 }
  0xf7   :  { %v469_v39 = vpop.f32.mrf.mxu0  ;;  %v629_v40 = vpop.f32.mrf.mxu1 }
  0xf8   :  { %694 = vst.msk [vmem:[%s1575_s3 + $0xc8] sm:$0xff] %vm668_vm2, %v475_v37  ;;  %726 = vst.msk [vmem:[%s1575_s3 + $0x1c8] sm:$0xff] %vm668_vm2, %v635_v38  ;;  %v470_v41 = vadd.f32 %v1250_v1, %v469_v39  ;;  %v630_v42 = vadd.f32 %v1250_v1, %v629_v40 }
  0xf9   :  { %v911_v43 = vpop.f32.mrf.mxu0  ;;  %v959_v44 = vpop.f32.mrf.mxu1 }
  0xfa   :  { %693 = vst.msk [vmem:[%s1575_s3 + $0xc0] sm:$0xff] %vm668_vm2, %v470_v41  ;;  %725 = vst.msk [vmem:[%s1575_s3 + $0x1c0] sm:$0xff] %vm668_vm2, %v630_v42  ;;  %v485_v45 = vadd.f32 %v911_v43, %v1250_v1  ;;  %v645_v46 = vadd.f32 %v959_v44, %v1250_v1 }
  0xfb   :  { %v479_v47 = vpop.f32.mrf.mxu0  ;;  %v639_v48 = vpop.f32.mrf.mxu1 }
  0xfc   :  { %696 = vst.msk [vmem:[%s1575_s3 + $0xd8] sm:$0xff] %vm668_vm2, %v485_v45  ;;  %728 = vst.msk [vmem:[%s1575_s3 + $0x1d8] sm:$0xff] %vm668_vm2, %v645_v46  ;;  %v480_v49 = vadd.f32 %v1250_v1, %v479_v47  ;;  %v640_v50 = vadd.f32 %v1250_v1, %v639_v48 }
  0xfd   :  { %v914_v51 = vpop.f32.mrf.mxu0  ;;  %v962_v52 = vpop.f32.mrf.mxu1 }
  0xfe   :  { %695 = vst.msk [vmem:[%s1575_s3 + $0xd0] sm:$0xff] %vm668_vm2, %v480_v49  ;;  %727 = vst.msk [vmem:[%s1575_s3 + $0x1d0] sm:$0xff] %vm668_vm2, %v640_v50  ;;  %v495_v53 = vadd.f32 %v914_v51, %v1250_v1  ;;  %v655_v54 = vadd.f32 %v962_v52, %v1250_v1 }
  0xff   :  { %v489_v55 = vpop.f32.mrf.mxu0  ;;  %v649_v56 = vpop.f32.mrf.mxu1 }
 0x100   :  { %698 = vst.msk [vmem:[%s1575_s3 + $0xe8] sm:$0xff] %vm668_vm2, %v495_v53  ;;  %730 = vst.msk [vmem:[%s1575_s3 + $0x1e8] sm:$0xff] %vm668_vm2, %v655_v54  ;;  %v490_v57 = vadd.f32 %v1250_v1, %v489_v55  ;;  %v650_v58 = vadd.f32 %v1250_v1, %v649_v56 }
 0x101   :  { %v917_v59 = vpop.f32.mrf.mxu0  ;;  %v965_v60 = vpop.f32.mrf.mxu1 }
 0x102   :  { %697 = vst.msk [vmem:[%s1575_s3 + $0xe0] sm:$0xff] %vm668_vm2, %v490_v57  ;;  %729 = vst.msk [vmem:[%s1575_s3 + $0x1e0] sm:$0xff] %vm668_vm2, %v650_v58  ;;  %v505_v61 = vadd.f32 %v917_v59, %v1250_v1  ;;  %v665_v62 = vadd.f32 %v965_v60, %v1250_v1 }
 0x103   :  { %v499_v63 = vpop.f32.mrf.mxu0  ;;  %v659_v0 = vpop.f32.mrf.mxu1 }
 0x104   :  { %700 = vst.msk [vmem:[%s1575_s3 + $0xf8] sm:$0xff] %vm668_vm2, %v505_v61  ;;  %732 = vst.msk [vmem:[%s1575_s3 + $0x1f8] sm:$0xff] %vm668_vm2, %v665_v62  ;;  %v500_v2 = vadd.f32 %v1250_v1, %v499_v63  ;;  %v660_v3 = vadd.f32 %v1250_v1, %v659_v0 }
 0x106   :  { %699 = vst.msk [vmem:[%s1575_s3 + $0xf0] sm:$0xff] %vm668_vm2, %v500_v2  ;;  %731 = vst.msk [vmem:[%s1575_s3 + $0x1f0] sm:$0xff] %vm668_vm2, %v660_v3 }

// kernel: reverse.4
= control target key start
LH: loop header
LB: loop body
LE: loop exit
PB: predicated region body
PF: predicated region fallthrough
CT: control target
= control target key end

     0   :  { %s344_s0 = inlined_call_operand.vmem [shape: f32[2,32,16,7], index: 0, kind: input, shape index: {}]   ;;  %s345_s1 = inlined_call_operand.vmem [shape: f32[2,32,16,7], index: 1, kind: output, shape index: {}]  }
   0x1   :  { %v112_v0 = vld [vmem:[%s344_s0 + $0x60] sm:$0xff]  ;;  %v113_v1 = vld [vmem:[%s344_s0 + $0xd0] sm:$0xff]  ;;  %v138_v14 = vld [vmem:[%s344_s0 + $0x68] sm:$0xff] }
   0x2   :  { %v115_v2 = vld [vmem:[%s344_s0 + $0x50] sm:$0xff]  ;;  %4 = vst [vmem:[%s345_s1] sm:$0xff] %v112_v0  ;;  %114 = vst [vmem:[%s345_s1 + $0x70] sm:$0xff] %v113_v1  ;;  %v117_v3 = vld [vmem:[%s344_s0 + $0xc0] sm:$0xff] }
   0x3   :  { %116 = vst [vmem:[%s345_s1 + $0x10] sm:$0xff] %v115_v2  ;;  %v119_v4 = vld [vmem:[%s344_s0 + $0x40] sm:$0xff]  ;;  %v121_v5 = vld [vmem:[%s344_s0 + $0xb0] sm:$0xff]  ;;  %118 = vst [vmem:[%s345_s1 + $0x80] sm:$0xff] %v117_v3 }
   0x4   :  { %120 = vst [vmem:[%s345_s1 + $0x20] sm:$0xff] %v119_v4  ;;  %122 = vst [vmem:[%s345_s1 + $0x90] sm:$0xff] %v121_v5  ;;  %v123_v6 = vld [vmem:[%s344_s0 + $0x30] sm:$0xff]  ;;  %v125_v7 = vld [vmem:[%s344_s0 + $0xa0] sm:$0xff] }
   0x5   :  { %v127_v8 = vld [vmem:[%s344_s0 + $0x20] sm:$0xff]  ;;  %124 = vst [vmem:[%s345_s1 + $0x30] sm:$0xff] %v123_v6  ;;  %126 = vst [vmem:[%s345_s1 + $0xa0] sm:$0xff] %v125_v7  ;;  %v129_v9 = vld [vmem:[%s344_s0 + $0x90] sm:$0xff] }
   0x6   :  { %128 = vst [vmem:[%s345_s1 + $0x40] sm:$0xff] %v127_v8  ;;  %v131_v10 = vld [vmem:[%s344_s0 + $0x10] sm:$0xff]  ;;  %v133_v11 = vld [vmem:[%s344_s0 + $0x80] sm:$0xff]  ;;  %130 = vst [vmem:[%s345_s1 + $0xb0] sm:$0xff] %v129_v9 }
   0x7   :  { %132 = vst [vmem:[%s345_s1 + $0x50] sm:$0xff] %v131_v10  ;;  %134 = vst [vmem:[%s345_s1 + $0xc0] sm:$0xff] %v133_v11  ;;  %v49_v12 = vld [vmem:[%s344_s0] sm:$0xff]  ;;  %v136_v13 = vld [vmem:[%s344_s0 + $0x70] sm:$0xff] }
   0x8   :  { %135 = vst [vmem:[%s345_s1 + $0x60] sm:$0xff] %v49_v12  ;;  %137 = vst [vmem:[%s345_s1 + $0xd0] sm:$0xff] %v136_v13  ;;  %v140_v15 = vld [vmem:[%s344_s0 + $0xd8] sm:$0xff]  ;;  %v144_v17 = vld [vmem:[%s344_s0 + $0xc8] sm:$0xff] }
   0x9   :  { %139 = vst [vmem:[%s345_s1 + $0x8] sm:$0xff] %v138_v14  ;;  %v142_v16 = vld [vmem:[%s344_s0 + $0x58] sm:$0xff]  ;;  %141 = vst [vmem:[%s345_s1 + $0x78] sm:$0xff] %v140_v15  ;;  %v146_v18 = vld [vmem:[%s344_s0 + $0x48] sm:$0xff] }
   0xa   :  { %143 = vst [vmem:[%s345_s1 + $0x18] sm:$0xff] %v142_v16  ;;  %145 = vst [vmem:[%s345_s1 + $0x88] sm:$0xff] %v144_v17  ;;  %v148_v19 = vld [vmem:[%s344_s0 + $0xb8] sm:$0xff]  ;;  %v152_v21 = vld [vmem:[%s344_s0 + $0xa8] sm:$0xff] }
   0xb   :  { %v150_v20 = vld [vmem:[%s344_s0 + $0x38] sm:$0xff]  ;;  %147 = vst [vmem:[%s345_s1 + $0x28] sm:$0xff] %v146_v18  ;;  %149 = vst [vmem:[%s345_s1 + $0x98] sm:$0xff] %v148_v19  ;;  %v154_v22 = vld [vmem:[%s344_s0 + $0x28] sm:$0xff] }
   0xc   :  { %151 = vst [vmem:[%s345_s1 + $0x38] sm:$0xff] %v150_v20  ;;  %v156_v23 = vld [vmem:[%s344_s0 + $0x98] sm:$0xff]  ;;  %153 = vst [vmem:[%s345_s1 + $0xa8] sm:$0xff] %v152_v21  ;;  %v160_v25 = vld [vmem:[%s344_s0 + $0x88] sm:$0xff] }
   0xd   :  { %155 = vst [vmem:[%s345_s1 + $0x48] sm:$0xff] %v154_v22  ;;  %157 = vst [vmem:[%s345_s1 + $0xb8] sm:$0xff] %v156_v23  ;;  %v158_v24 = vld [vmem:[%s344_s0 + $0x18] sm:$0xff]  ;;  %v162_v26 = vld [vmem:[%s344_s0 + $0x8] sm:$0xff] }
   0xe   :  { %159 = vst [vmem:[%s345_s1 + $0x58] sm:$0xff] %v158_v24  ;;  %161 = vst [vmem:[%s345_s1 + $0xc8] sm:$0xff] %v160_v25  ;;  %v164_v27 = vld [vmem:[%s344_s0 + $0x78] sm:$0xff] }
   0xf   :  { %163 = vst [vmem:[%s345_s1 + $0x68] sm:$0xff] %v162_v26  ;;  %165 = vst [vmem:[%s345_s1 + $0xd8] sm:$0xff] %v164_v27 }

// kernel: fno_forward.7
= control target key start
LH: loop header
LB: loop body
LE: loop exit
PB: predicated region body
PF: predicated region fallthrough
CT: control target
= control target key end

     0   :  { %v3603_v0 = vmov 0.0   ;;  %vm299_vm0 = vcmask 523264   ;;  %vm3604_vm1 = vmmov 0   ;;  %vm2636_vm2 = vcmask 517120   ;;  %s4964_s1 = inlined_call_operand.vmem [shape: f32[32,64,64], index: 1, kind: input, shape index: {}]   ;;  %s4965_s0 = inlined_call_operand.vmem [shape: f32[32,2,64], index: 0, kind: input, shape index: {}]   ;;  %s4966_s2 = inlined_call_operand.vmem [shape: f32[32,2,64], index: 2, kind: output, shape index: {}]  }
   0x1   :  { %2993 = vmatprep.subr.mxu0 %v3603_v0  ;;  %3012 = vmatprep.subr.mxu1 %v3603_v0  ;;  %v50_v1 = vld [vmem:[%s4964_s1 + $0x38] sm:$0xff]  ;;  %v49_v3 = vld [vmem:[%s4964_s1 + $0x30] sm:$0xff]  ;;  %v48_v5 = vld [vmem:[%s4964_s1 + $0x28] sm:$0xff] }
   0x2   :  { %v58_v2 = vld [vmem:[%s4964_s1 + $0x78] sm:$0xff]  ;;  %2994 = vmatpush3.msra.mxu0 %v50_v1  ;;  %v57_v4 = vld [vmem:[%s4964_s1 + $0x70] sm:$0xff]  ;;  %v56_v6 = vld [vmem:[%s4964_s1 + $0x68] sm:$0xff]  ;;  %3009 = vmatprep.mubr.msk.f32.mxu0 %vm3604_vm1, %v3603_v0 }
   0x3   :  { %3013 = vmatpush3.msra.mxu1 %v58_v2  ;;  %2995 = vmatprep.subr.mxu0 %v3603_v0  ;;  %v47_v7 = vld [vmem:[%s4964_s1 + $0x20] sm:$0xff]  ;;  %v46_v9 = vld [vmem:[%s4964_s1 + $0x18] sm:$0xff]  ;;  %v45_v11 = vld [vmem:[%s4964_s1 + $0x10] sm:$0xff] }
   0x4   :  { %3014 = vmatprep.subr.mxu1 %v3603_v0  ;;  %2996 = vmatpush3.msra.mxu0 %v49_v3  ;;  %v55_v8 = vld [vmem:[%s4964_s1 + $0x60] sm:$0xff]  ;;  %v54_v10 = vld [vmem:[%s4964_s1 + $0x58] sm:$0xff]  ;;  %v53_v12 = vld [vmem:[%s4964_s1 + $0x50] sm:$0xff] }
   0x5   :  { %3015 = vmatpush3.msra.mxu1 %v57_v4  ;;  %2997 = vmatprep.subr.mxu0 %v3603_v0  ;;  %v44_v13 = vld [vmem:[%s4964_s1 + $0x8] sm:$0xff]  ;;  %v43_v15 = vld [vmem:[%s4964_s1] sm:$0xff]  ;;  %v66_v19 = vld [vmem:[%s4964_s1 + $0xb8] sm:$0xff] }
   0x6   :  { %3016 = vmatprep.subr.mxu1 %v3603_v0  ;;  %2998 = vmatpush3.msra.mxu0 %v48_v5  ;;  %v52_v14 = vld [vmem:[%s4964_s1 + $0x48] sm:$0xff]  ;;  %v51_v16 = vld [vmem:[%s4964_s1 + $0x40] sm:$0xff]  ;;  %v74_v20 = vld [vmem:[%s4964_s1 + $0xf8] sm:$0xff] }
   0x7   :  { %3017 = vmatpush3.msra.mxu1 %v56_v6  ;;  %2999 = vmatprep.subr.mxu0 %v3603_v0  ;;  %v11_v17 = vld [vmem:[%s4965_s0] sm:$0x3]  ;;  %v12_v18 = vld [vmem:[%s4965_s0 + $0x2] sm:$0x3]  ;;  %v65_v21 = vld [vmem:[%s4964_s1 + $0xb0] sm:$0xff] }
   0x8   :  { %3018 = vmatprep.subr.mxu1 %v3603_v0  ;;  %3000 = vmatpush3.msra.mxu0 %v47_v7  ;;  %v73_v22 = vld [vmem:[%s4964_s1 + $0xf0] sm:$0xff]  ;;  %v64_v23 = vld [vmem:[%s4964_s1 + $0xa8] sm:$0xff]  ;;  %v63_v25 = vld [vmem:[%s4964_s1 + $0xa0] sm:$0xff] }
   0x9   :  { %3019 = vmatpush3.msra.mxu1 %v55_v8  ;;  %3001 = vmatprep.subr.mxu0 %v3603_v0  ;;  %v72_v24 = vld [vmem:[%s4964_s1 + $0xe8] sm:$0xff]  ;;  %v71_v26 = vld [vmem:[%s4964_s1 + $0xe0] sm:$0xff]  ;;  %v62_v27 = vld [vmem:[%s4964_s1 + $0x98] sm:$0xff] }
   0xa   :  { %3020 = vmatprep.subr.mxu1 %v3603_v0  ;;  %3002 = vmatpush3.msra.mxu0 %v46_v9  ;;  %v70_v28 = vld [vmem:[%s4964_s1 + $0xd8] sm:$0xff]  ;;  %v61_v29 = vld [vmem:[%s4964_s1 + $0x90] sm:$0xff]  ;;  %v60_v31 = vld [vmem:[%s4964_s1 + $0x88] sm:$0xff] }
   0xb   :  { %3021 = vmatpush3.msra.mxu1 %v54_v10  ;;  %3003 = vmatprep.subr.mxu0 %v3603_v0  ;;  %v69_v30 = vld [vmem:[%s4964_s1 + $0xd0] sm:$0xff]  ;;  %v68_v32 = vld [vmem:[%s4964_s1 + $0xc8] sm:$0xff]  ;;  %v59_v33 = vld [vmem:[%s4964_s1 + $0x80] sm:$0xff] }
   0xc   :  { %3022 = vmatprep.subr.mxu1 %v3603_v0  ;;  %3004 = vmatpush3.msra.mxu0 %v45_v11  ;;  %v67_v34 = vld [vmem:[%s4964_s1 + $0xc0] sm:$0xff]  ;;  %v82_v37 = vld [vmem:[%s4964_s1 + $0x138] sm:$0xff]  ;;  %v81_v39 = vld [vmem:[%s4964_s1 + $0x130] sm:$0xff] }
   0xd   :  { %3023 = vmatpush3.msra.mxu1 %v53_v12  ;;  %3005 = vmatprep.subr.mxu0 %v3603_v0  ;;  %v13_v35 = vld [vmem:[%s4965_s0 + $0x4] sm:$0x3]  ;;  %v14_v36 = vld [vmem:[%s4965_s0 + $0x6] sm:$0x3]  ;;  %v90_v38 = vld [vmem:[%s4964_s1 + $0x178] sm:$0xff] }
   0xe   :  { %3024 = vmatprep.subr.mxu1 %v3603_v0  ;;  %3006 = vmatpush3.msra.mxu0 %v44_v13  ;;  %v89_v40 = vld [vmem:[%s4964_s1 + $0x170] sm:$0xff]  ;;  %v80_v41 = vld [vmem:[%s4964_s1 + $0x128] sm:$0xff]  ;;  %v79_v43 = vld [vmem:[%s4964_s1 + $0x120] sm:$0xff] }
   0xf   :  { %3025 = vmatpush3.msra.mxu1 %v52_v14  ;;  %3007 = vmatprep.subr.mxu0 %v3603_v0  ;;  %v88_v42 = vld [vmem:[%s4964_s1 + $0x168] sm:$0xff]  ;;  %v87_v44 = vld [vmem:[%s4964_s1 + $0x160] sm:$0xff]  ;;  %v78_v45 = vld [vmem:[%s4964_s1 + $0x118] sm:$0xff] }
  0x10   :  { %3026 = vmatprep.subr.mxu1 %v3603_v0  ;;  %3008 = vmatpush3.msra.mxu0 %v43_v15  ;;  %v86_v46 = vld [vmem:[%s4964_s1 + $0x158] sm:$0xff]  ;;  %v77_v47 = vld [vmem:[%s4964_s1 + $0x110] sm:$0xff]  ;;  %v76_v49 = vld [vmem:[%s4964_s1 + $0x108] sm:$0xff] }
  0x11   :  { %3027 = vmatpush3.msra.mxu1 %v51_v16  ;;  %3028 = vmatprep.mubr.msk.f32.mxu1 %vm3604_vm1, %v3603_v0  ;;  %v85_v48 = vld [vmem:[%s4964_s1 + $0x150] sm:$0xff]  ;;  %v84_v50 = vld [vmem:[%s4964_s1 + $0x148] sm:$0xff]  ;;  %v75_v51 = vld [vmem:[%s4964_s1 + $0x100] sm:$0xff] }
  0x12   :  { %3010 = vmatmul.mubr.msk.f32.vlgmr.msra.gmra.mxu0 %vm299_vm0, %v11_v17  ;;  %3029 = vmatmul.mubr.msk.f32.vlgmr.msra.gmra.mxu1 %vm299_vm0, %v12_v18  ;;  %v83_v52 = vld [vmem:[%s4964_s1 + $0x140] sm:$0xff]  ;;  %v15_v53 = vld [vmem:[%s4965_s0 + $0x8] sm:$0x3]  ;;  %v16_v54 = vld [vmem:[%s4965_s0 + $0xa] sm:$0x3] }
  0x13   :  { %3031 = vmatprep.subr.mxu0 %v3603_v0  ;;  %3050 = vmatprep.subr.mxu1 %v3603_v0  ;;  %v98_v55 = vld [vmem:[%s4964_s1 + $0x1b8] sm:$0xff]  ;;  %v97_v57 = vld [vmem:[%s4964_s1 + $0x1b0] sm:$0xff]  ;;  %v96_v59 = vld [vmem:[%s4964_s1 + $0x1a8] sm:$0xff] }
  0x14   :  { %3032 = vmatpush3.msra.mxu0 %v66_v19  ;;  %3051 = vmatpush3.msra.mxu1 %v74_v20  ;;  %v106_v56 = vld [vmem:[%s4964_s1 + $0x1f8] sm:$0xff]  ;;  %v105_v58 = vld [vmem:[%s4964_s1 + $0x1f0] sm:$0xff]  ;;  %v104_v60 = vld [vmem:[%s4964_s1 + $0x1e8] sm:$0xff] }
  0x15   :  { %3033 = vmatprep.subr.mxu0 %v3603_v0  ;;  %3052 = vmatprep.subr.mxu1 %v3603_v0  ;;  %v95_v61 = vld [vmem:[%s4964_s1 + $0x1a0] sm:$0xff]  ;;  %v94_v63 = vld [vmem:[%s4964_s1 + $0x198] sm:$0xff]  ;;  %v93_v2 = vld [vmem:[%s4964_s1 + $0x190] sm:$0xff] }
  0x16   :  { %3034 = vmatpush3.msra.mxu0 %v65_v21  ;;  %3053 = vmatpush3.msra.mxu1 %v73_v22  ;;  %v103_v62 = vld [vmem:[%s4964_s1 + $0x1e0] sm:$0xff]  ;;  %v102_v1 = vld [vmem:[%s4964_s1 + $0x1d8] sm:$0xff]  ;;  %v101_v3 = vld [vmem:[%s4964_s1 + $0x1d0] sm:$0xff] }
  0x17   :  { %3035 = vmatprep.subr.mxu0 %v3603_v0  ;;  %3054 = vmatprep.subr.mxu1 %v3603_v0  ;;  %v92_v4 = vld [vmem:[%s4964_s1 + $0x188] sm:$0xff]  ;;  %v91_v6 = vld [vmem:[%s4964_s1 + $0x180] sm:$0xff]  ;;  %v114_v10 = vld [vmem:[%s4964_s1 + $0x238] sm:$0xff] }
  0x18   :  { %3036 = vmatpush3.msra.mxu0 %v64_v23  ;;  %3055 = vmatpush3.msra.mxu1 %v72_v24  ;;  %v100_v5 = vld [vmem:[%s4964_s1 + $0x1c8] sm:$0xff]  ;;  %v99_v7 = vld [vmem:[%s4964_s1 + $0x1c0] sm:$0xff]  ;;  %v122_v11 = vld [vmem:[%s4964_s1 + $0x278] sm:$0xff] }
  0x19   :  { %3037 = vmatprep.subr.mxu0 %v3603_v0  ;;  %3056 = vmatprep.subr.mxu1 %v3603_v0  ;;  %v17_v8 = vld [vmem:[%s4965_s0 + $0xc] sm:$0x3]  ;;  %v18_v9 = vld [vmem:[%s4965_s0 + $0xe] sm:$0x3]  ;;  %v113_v12 = vld [vmem:[%s4964_s1 + $0x230] sm:$0xff] }
  0x1a   :  { %3038 = vmatpush3.msra.mxu0 %v63_v25  ;;  %3057 = vmatpush3.msra.mxu1 %v71_v26  ;;  %v121_v13 = vld [vmem:[%s4964_s1 + $0x270] sm:$0xff]  ;;  %v112_v14 = vld [vmem:[%s4964_s1 + $0x228] sm:$0xff]  ;;  %v111_v16 = vld [vmem:[%s4964_s1 + $0x220] sm:$0xff] }
  0x1b   :  { %3039 = vmatprep.subr.mxu0 %v3603_v0  ;;  %3058 = vmatprep.subr.mxu1 %v3603_v0  ;;  %v120_v15 = vld [vmem:[%s4964_s1 + $0x268] sm:$0xff]  ;;  %v119_v17 = vld [vmem:[%s4964_s1 + $0x260] sm:$0xff]  ;;  %v110_v18 = vld [vmem:[%s4964_s1 + $0x218] sm:$0xff] }
  0x1c   :  { %3040 = vmatpush3.msra.mxu0 %v62_v27  ;;  %3059 = vmatpush3.msra.mxu1 %v70_v28  ;;  %v118_v19 = vld [vmem:[%s4964_s1 + $0x258] sm:$0xff]  ;;  %v109_v20 = vld [vmem:[%s4964_s1 + $0x210] sm:$0xff]  ;;  %v108_v22 = vld [vmem:[%s4964_s1 + $0x208] sm:$0xff] }
  0x1d   :  { %3041 = vmatprep.subr.mxu0 %v3603_v0  ;;  %3060 = vmatprep.subr.mxu1 %v3603_v0  ;;  %v117_v21 = vld [vmem:[%s4964_s1 + $0x250] sm:$0xff]  ;;  %v116_v23 = vld [vmem:[%s4964_s1 + $0x248] sm:$0xff]  ;;  %v107_v24 = vld [vmem:[%s4964_s1 + $0x200] sm:$0xff] }
  0x1e   :  { %3042 = vmatpush3.msra.mxu0 %v61_v29  ;;  %3061 = vmatpush3.msra.mxu1 %v69_v30  ;;  %v115_v25 = vld [vmem:[%s4964_s1 + $0x240] sm:$0xff]  ;;  %v19_v26 = vld [vmem:[%s4965_s0 + $0x10] sm:$0x3]  ;;  %v20_v27 = vld [vmem:[%s4965_s0 + $0x12] sm:$0x3] }
  0x1f   :  { %3043 = vmatprep.subr.mxu0 %v3603_v0  ;;  %3062 = vmatprep.subr.mxu1 %v3603_v0  ;;  %v130_v28 = vld [vmem:[%s4964_s1 + $0x2b8] sm:$0xff]  ;;  %v129_v30 = vld [vmem:[%s4964_s1 + $0x2b0] sm:$0xff] }
  0x20   :  { %3044 = vmatpush3.msra.mxu0 %v60_v31  ;;  %3063 = vmatpush3.msra.mxu1 %v68_v32  ;;  %v138_v29 = vld [vmem:[%s4964_s1 + $0x2f8] sm:$0xff]  ;;  %v137_v31 = vld [vmem:[%s4964_s1 + $0x2f0] sm:$0xff]  ;;  %v128_v32 = vld [vmem:[%s4964_s1 + $0x2a8] sm:$0xff] }
  0x21   :  { %3045 = vmatprep.subr.mxu0 %v3603_v0  ;;  %3064 = vmatprep.subr.mxu1 %v3603_v0 }
  0x22   :  { %3046 = vmatpush3.msra.mxu0 %v59_v33  ;;  %3047 = vmatprep.mubr.msk.f32.mxu0 %vm3604_vm1, %v3603_v0  ;;  %v136_v33 = vld [vmem:[%s4964_s1 + $0x2e8] sm:$0xff] }
  0x23   :  { %3065 = vmatpush3.msra.mxu1 %v67_v34  ;;  %3066 = vmatprep.mubr.msk.f32.mxu1 %vm3604_vm1, %v3603_v0  ;;  %v127_v34 = vld [vmem:[%s4964_s1 + $0x2a0] sm:$0xff] }
  0x24   :  { %3048 = vmatmul.mubr.msk.f32.vlgmr.msra.gmra.mxu0 %vm299_vm0, %v13_v35  ;;  %3067 = vmatmul.mubr.msk.f32.vlgmr.msra.gmra.mxu1 %vm299_vm0, %v14_v36  ;;  %v135_v35 = vld [vmem:[%s4964_s1 + $0x2e0] sm:$0xff]  ;;  %v126_v36 = vld [vmem:[%s4964_s1 + $0x298] sm:$0xff] }
  0x25   :  { %3069 = vmatprep.subr.mxu0 %v3603_v0  ;;  %3088 = vmatprep.subr.mxu1 %v3603_v0 }
  0x26   :  { %3070 = vmatpush3.msra.mxu0 %v82_v37  ;;  %3089 = vmatpush3.msra.mxu1 %v90_v38  ;;  %v134_v37 = vld [vmem:[%s4964_s1 + $0x2d8] sm:$0xff]  ;;  %v125_v38 = vld [vmem:[%s4964_s1 + $0x290] sm:$0xff] }
  0x27   :  { %3071 = vmatprep.subr.mxu0 %v3603_v0  ;;  %3090 = vmatprep.subr.mxu1 %v3603_v0 }
  0x28   :  { %3072 = vmatpush3.msra.mxu0 %v81_v39  ;;  %3091 = vmatpush3.msra.mxu1 %v89_v40  ;;  %v133_v39 = vld [vmem:[%s4964_s1 + $0x2d0] sm:$0xff]  ;;  %v124_v40 = vld [vmem:[%s4964_s1 + $0x288] sm:$0xff] }
  0x29   :  { %3073 = vmatprep.subr.mxu0 %v3603_v0  ;;  %3092 = vmatprep.subr.mxu1 %v3603_v0 }
  0x2a   :  { %3074 = vmatpush3.msra.mxu0 %v80_v41  ;;  %3093 = vmatpush3.msra.mxu1 %v88_v42  ;;  %v132_v41 = vld [vmem:[%s4964_s1 + $0x2c8] sm:$0xff]  ;;  %v123_v42 = vld [vmem:[%s4964_s1 + $0x280] sm:$0xff] }
  0x2b   :  { %3075 = vmatprep.subr.mxu0 %v3603_v0  ;;  %3094 = vmatprep.subr.mxu1 %v3603_v0 }
  0x2c   :  { %3076 = vmatpush3.msra.mxu0 %v79_v43  ;;  %3095 = vmatpush3.msra.mxu1 %v87_v44  ;;  %v131_v43 = vld [vmem:[%s4964_s1 + $0x2c0] sm:$0xff]  ;;  %v21_v44 = vld [vmem:[%s4965_s0 + $0x14] sm:$0x3] }
  0x2d   :  { %3077 = vmatprep.subr.mxu0 %v3603_v0  ;;  %3096 = vmatprep.subr.mxu1 %v3603_v0 }
  0x2e   :  { %3078 = vmatpush3.msra.mxu0 %v78_v45  ;;  %3097 = vmatpush3.msra.mxu1 %v86_v46  ;;  %v22_v45 = vld [vmem:[%s4965_s0 + $0x16] sm:$0x3]  ;;  %v146_v46 = vld [vmem:[%s4964_s1 + $0x338] sm:$0xff] }
  0x2f   :  { %3079 = vmatprep.subr.mxu0 %v3603_v0  ;;  %3098 = vmatprep.subr.mxu1 %v3603_v0 }
  0x30   :  { %3080 = vmatpush3.msra.mxu0 %v77_v47  ;;  %3099 = vmatpush3.msra.mxu1 %v85_v48  ;;  %v154_v47 = vld [vmem:[%s4964_s1 + $0x378] sm:$0xff]  ;;  %v145_v48 = vld [vmem:[%s4964_s1 + $0x330] sm:$0xff] }
  0x31   :  { %3081 = vmatprep.subr.mxu0 %v3603_v0  ;;  %3100 = vmatprep.subr.mxu1 %v3603_v0 }
  0x32   :  { %3082 = vmatpush3.msra.mxu0 %v76_v49  ;;  %3101 = vmatpush3.msra.mxu1 %v84_v50  ;;  %v153_v49 = vld [vmem:[%s4964_s1 + $0x370] sm:$0xff]  ;;  %v144_v50 = vld [vmem:[%s4964_s1 + $0x328] sm:$0xff] }
  0x33   :  { %3083 = vmatprep.subr.mxu0 %v3603_v0  ;;  %3102 = vmatprep.subr.mxu1 %v3603_v0 }
  0x34   :  { %3084 = vmatpush3.msra.mxu0 %v75_v51  ;;  %3085 = vmatprep.mubr.msk.f32.mxu0 %vm3604_vm1, %v3603_v0  ;;  %v152_v51 = vld [vmem:[%s4964_s1 + $0x368] sm:$0xff] }
  0x35   :  { %3103 = vmatpush3.msra.mxu1 %v83_v52  ;;  %3104 = vmatprep.mubr.msk.f32.mxu1 %vm3604_vm1, %v3603_v0  ;;  %v143_v52 = vld [vmem:[%s4964_s1 + $0x320] sm:$0xff] }
  0x36   :  { %3086 = vmatmul.mubr.msk.f32.vlgmr.msra.gmra.mxu0 %vm299_vm0, %v15_v53  ;;  %3105 = vmatmul.mubr.msk.f32.vlgmr.msra.gmra.mxu1 %vm299_vm0, %v16_v54  ;;  %v151_v53 = vld [vmem:[%s4964_s1 + $0x360] sm:$0xff]  ;;  %v142_v54 = vld [vmem:[%s4964_s1 + $0x318] sm:$0xff] }
  0x37   :  { %3107 = vmatprep.subr.mxu0 %v3603_v0  ;;  %3126 = vmatprep.subr.mxu1 %v3603_v0 }
  0x38   :  { %3108 = vmatpush3.msra.mxu0 %v98_v55  ;;  %3127 = vmatpush3.msra.mxu1 %v106_v56  ;;  %v150_v55 = vld [vmem:[%s4964_s1 + $0x358] sm:$0xff]  ;;  %v141_v56 = vld [vmem:[%s4964_s1 + $0x310] sm:$0xff] }
  0x39   :  { %3109 = vmatprep.subr.mxu0 %v3603_v0  ;;  %3128 = vmatprep.subr.mxu1 %v3603_v0 }
  0x3a   :  { %3110 = vmatpush3.msra.mxu0 %v97_v57  ;;  %3129 = vmatpush3.msra.mxu1 %v105_v58  ;;  %v149_v57 = vld [vmem:[%s4964_s1 + $0x350] sm:$0xff]  ;;  %v140_v58 = vld [vmem:[%s4964_s1 + $0x308] sm:$0xff] }
  0x3b   :  { %3111 = vmatprep.subr.mxu0 %v3603_v0  ;;  %3130 = vmatprep.subr.mxu1 %v3603_v0 }
  0x3c   :  { %3112 = vmatpush3.msra.mxu0 %v96_v59  ;;  %3131 = vmatpush3.msra.mxu1 %v104_v60  ;;  %v148_v59 = vld [vmem:[%s4964_s1 + $0x348] sm:$0xff]  ;;  %v139_v60 = vld [vmem:[%s4964_s1 + $0x300] sm:$0xff] }
  0x3d   :  { %3113 = vmatprep.subr.mxu0 %v3603_v0  ;;  %3132 = vmatprep.subr.mxu1 %v3603_v0 }
  0x3e   :  { %3114 = vmatpush3.msra.mxu0 %v95_v61  ;;  %3133 = vmatpush3.msra.mxu1 %v103_v62  ;;  %v147_v61 = vld [vmem:[%s4964_s1 + $0x340] sm:$0xff]  ;;  %v23_v62 = vld [vmem:[%s4965_s0 + $0x18] sm:$0x3] }
  0x3f   :  { %3115 = vmatprep.subr.mxu0 %v3603_v0  ;;  %3134 = vmatprep.subr.mxu1 %v3603_v0 }
  0x40   :  { %3116 = vmatpush3.msra.mxu0 %v94_v63  ;;  %3135 = vmatpush3.msra.mxu1 %v102_v1  ;;  %v24_v63 = vld [vmem:[%s4965_s0 + $0x1a] sm:$0x3] }
  0x41   :  { %3117 = vmatprep.subr.mxu0 %v3603_v0  ;;  %3136 = vmatprep.subr.mxu1 %v3603_v0  ;;  %v162_v1 = vld [vmem:[%s4964_s1 + $0x3b8] sm:$0xff] }
  0x42   :  { %3118 = vmatpush3.msra.mxu0 %v93_v2  ;;  %3137 = vmatpush3.msra.mxu1 %v101_v3  ;;  %v170_v2 = vld [vmem:[%s4964_s1 + $0x3f8] sm:$0xff]  ;;  %v161_v3 = vld [vmem:[%s4964_s1 + $0x3b0] sm:$0xff] }
  0x43   :  { %3119 = vmatprep.subr.mxu0 %v3603_v0  ;;  %3138 = vmatprep.subr.mxu1 %v3603_v0 }
  0x44   :  { %3120 = vmatpush3.msra.mxu0 %v92_v4  ;;  %3139 = vmatpush3.msra.mxu1 %v100_v5  ;;  %v169_v4 = vld [vmem:[%s4964_s1 + $0x3f0] sm:$0xff]  ;;  %v160_v5 = vld [vmem:[%s4964_s1 + $0x3a8] sm:$0xff] }
  0x45   :  { %3121 = vmatprep.subr.mxu0 %v3603_v0  ;;  %3140 = vmatprep.subr.mxu1 %v3603_v0 }
  0x46   :  { %3122 = vmatpush3.msra.mxu0 %v91_v6  ;;  %3123 = vmatprep.mubr.msk.f32.mxu0 %vm3604_vm1, %v3603_v0  ;;  %v168_v6 = vld [vmem:[%s4964_s1 + $0x3e8] sm:$0xff] }
  0x47   :  { %3141 = vmatpush3.msra.mxu1 %v99_v7  ;;  %3142 = vmatprep.mubr.msk.f32.mxu1 %vm3604_vm1, %v3603_v0  ;;  %v159_v7 = vld [vmem:[%s4964_s1 + $0x3a0] sm:$0xff] }
  0x48   :  { %3124 = vmatmul.mubr.msk.f32.vlgmr.msra.gmra.mxu0 %vm299_vm0, %v17_v8  ;;  %3143 = vmatmul.mubr.msk.f32.vlgmr.msra.gmra.mxu1 %vm299_vm0, %v18_v9  ;;  %v167_v8 = vld [vmem:[%s4964_s1 + $0x3e0] sm:$0xff]  ;;  %v158_v9 = vld [vmem:[%s4964_s1 + $0x398] sm:$0xff] }
  0x49   :  { %3145 = vmatprep.subr.mxu0 %v3603_v0  ;;  %3164 = vmatprep.subr.mxu1 %v3603_v0 }
  0x4a   :  { %3146 = vmatpush3.msra.mxu0 %v114_v10  ;;  %3165 = vmatpush3.msra.mxu1 %v122_v11  ;;  %v166_v10 = vld [vmem:[%s4964_s1 + $0x3d8] sm:$0xff]  ;;  %v157_v11 = vld [vmem:[%s4964_s1 + $0x390] sm:$0xff] }
  0x4b   :  { %3147 = vmatprep.subr.mxu0 %v3603_v0  ;;  %3166 = vmatprep.subr.mxu1 %v3603_v0 }
  0x4c   :  { %3148 = vmatpush3.msra.mxu0 %v113_v12  ;;  %3167 = vmatpush3.msra.mxu1 %v121_v13  ;;  %v165_v12 = vld [vmem:[%s4964_s1 + $0x3d0] sm:$0xff]  ;;  %v156_v13 = vld [vmem:[%s4964_s1 + $0x388] sm:$0xff] }
  0x4d   :  { %3149 = vmatprep.subr.mxu0 %v3603_v0  ;;  %3168 = vmatprep.subr.mxu1 %v3603_v0 }
  0x4e   :  { %3150 = vmatpush3.msra.mxu0 %v112_v14  ;;  %3169 = vmatpush3.msra.mxu1 %v120_v15  ;;  %v164_v14 = vld [vmem:[%s4964_s1 + $0x3c8] sm:$0xff]  ;;  %v155_v15 = vld [vmem:[%s4964_s1 + $0x380] sm:$0xff] }
  0x4f   :  { %3151 = vmatprep.subr.mxu0 %v3603_v0  ;;  %3170 = vmatprep.subr.mxu1 %v3603_v0 }
  0x50   :  { %3152 = vmatpush3.msra.mxu0 %v111_v16  ;;  %3171 = vmatpush3.msra.mxu1 %v119_v17  ;;  %v163_v16 = vld [vmem:[%s4964_s1 + $0x3c0] sm:$0xff]  ;;  %v25_v17 = vld [vmem:[%s4965_s0 + $0x1c] sm:$0x3] }
  0x51   :  { %3153 = vmatprep.subr.mxu0 %v3603_v0  ;;  %3172 = vmatprep.subr.mxu1 %v3603_v0 }
  0x52   :  { %3154 = vmatpush3.msra.mxu0 %v110_v18  ;;  %3173 = vmatpush3.msra.mxu1 %v118_v19  ;;  %v26_v18 = vld [vmem:[%s4965_s0 + $0x1e] sm:$0x3] }
  0x53   :  { %3155 = vmatprep.subr.mxu0 %v3603_v0  ;;  %3174 = vmatprep.subr.mxu1 %v3603_v0  ;;  %v178_v19 = vld [vmem:[%s4964_s1 + $0x438] sm:$0xff] }
  0x54   :  { %3156 = vmatpush3.msra.mxu0 %v109_v20  ;;  %3175 = vmatpush3.msra.mxu1 %v117_v21  ;;  %v186_v20 = vld [vmem:[%s4964_s1 + $0x478] sm:$0xff]  ;;  %v177_v21 = vld [vmem:[%s4964_s1 + $0x430] sm:$0xff] }
  0x55   :  { %3157 = vmatprep.subr.mxu0 %v3603_v0  ;;  %3176 = vmatprep.subr.mxu1 %v3603_v0 }
  0x56   :  { %3158 = vmatpush3.msra.mxu0 %v108_v22  ;;  %3177 = vmatpush3.msra.mxu1 %v116_v23  ;;  %v185_v22 = vld [vmem:[%s4964_s1 + $0x470] sm:$0xff]  ;;  %v176_v23 = vld [vmem:[%s4964_s1 + $0x428] sm:$0xff] }
  0x57   :  { %3159 = vmatprep.subr.mxu0 %v3603_v0  ;;  %3178 = vmatprep.subr.mxu1 %v3603_v0 }
  0x58   :  { %3160 = vmatpush3.msra.mxu0 %v107_v24  ;;  %3161 = vmatprep.mubr.msk.f32.mxu0 %vm3604_vm1, %v3603_v0  ;;  %v184_v24 = vld [vmem:[%s4964_s1 + $0x468] sm:$0xff] }
  0x59   :  { %3179 = vmatpush3.msra.mxu1 %v115_v25  ;;  %3180 = vmatprep.mubr.msk.f32.mxu1 %vm3604_vm1, %v3603_v0  ;;  %v175_v25 = vld [vmem:[%s4964_s1 + $0x420] sm:$0xff] }
  0x5a   :  { %3162 = vmatmul.mubr.msk.f32.vlgmr.msra.gmra.mxu0 %vm299_vm0, %v19_v26  ;;  %3181 = vmatmul.mubr.msk.f32.vlgmr.msra.gmra.mxu1 %vm299_vm0, %v20_v27  ;;  %v183_v26 = vld [vmem:[%s4964_s1 + $0x460] sm:$0xff]  ;;  %v174_v27 = vld [vmem:[%s4964_s1 + $0x418] sm:$0xff] }
  0x5b   :  { %3183 = vmatprep.subr.mxu0 %v3603_v0  ;;  %3202 = vmatprep.subr.mxu1 %v3603_v0 }
  0x5c   :  { %3184 = vmatpush3.msra.mxu0 %v130_v28  ;;  %3203 = vmatpush3.msra.mxu1 %v138_v29  ;;  %v182_v28 = vld [vmem:[%s4964_s1 + $0x458] sm:$0xff]  ;;  %v173_v29 = vld [vmem:[%s4964_s1 + $0x410] sm:$0xff] }
  0x5d   :  { %3185 = vmatprep.subr.mxu0 %v3603_v0  ;;  %3204 = vmatprep.subr.mxu1 %v3603_v0 }
  0x5e   :  { %3186 = vmatpush3.msra.mxu0 %v129_v30  ;;  %3205 = vmatpush3.msra.mxu1 %v137_v31  ;;  %v181_v30 = vld [vmem:[%s4964_s1 + $0x450] sm:$0xff]  ;;  %v172_v31 = vld [vmem:[%s4964_s1 + $0x408] sm:$0xff] }
  0x5f   :  { %3187 = vmatprep.subr.mxu0 %v3603_v0  ;;  %3206 = vmatprep.subr.mxu1 %v3603_v0 }
  0x60   :  { %3188 = vmatpush3.msra.mxu0 %v128_v32  ;;  %3207 = vmatpush3.msra.mxu1 %v136_v33  ;;  %v180_v32 = vld [vmem:[%s4964_s1 + $0x448] sm:$0xff]  ;;  %v171_v33 = vld [vmem:[%s4964_s1 + $0x400] sm:$0xff] }
  0x61   :  { %3189 = vmatprep.subr.mxu0 %v3603_v0  ;;  %3208 = vmatprep.subr.mxu1 %v3603_v0 }
  0x62   :  { %3190 = vmatpush3.msra.mxu0 %v127_v34  ;;  %3209 = vmatpush3.msra.mxu1 %v135_v35  ;;  %v179_v34 = vld [vmem:[%s4964_s1 + $0x440] sm:$0xff] }
  0x63   :  { %3191 = vmatprep.subr.mxu0 %v3603_v0  ;;  %3210 = vmatprep.subr.mxu1 %v3603_v0  ;;  %v27_v35 = vld [vmem:[%s4965_s0 + $0x20] sm:$0x3] }
  0x64   :  { %3192 = vmatpush3.msra.mxu0 %v126_v36  ;;  %3211 = vmatpush3.msra.mxu1 %v134_v37  ;;  %v28_v36 = vld [vmem:[%s4965_s0 + $0x22] sm:$0x3]  ;;  %v194_v37 = vld [vmem:[%s4964_s1 + $0x4b8] sm:$0xff] }
  0x65   :  { %3193 = vmatprep.subr.mxu0 %v3603_v0  ;;  %3212 = vmatprep.subr.mxu1 %v3603_v0 }
  0x66   :  { %3194 = vmatpush3.msra.mxu0 %v125_v38  ;;  %3213 = vmatpush3.msra.mxu1 %v133_v39  ;;  %v202_v38 = vld [vmem:[%s4964_s1 + $0x4f8] sm:$0xff]  ;;  %v193_v39 = vld [vmem:[%s4964_s1 + $0x4b0] sm:$0xff] }
  0x67   :  { %3195 = vmatprep.subr.mxu0 %v3603_v0  ;;  %3214 = vmatprep.subr.mxu1 %v3603_v0 }
  0x68   :  { %3196 = vmatpush3.msra.mxu0 %v124_v40  ;;  %3215 = vmatpush3.msra.mxu1 %v132_v41  ;;  %v201_v40 = vld [vmem:[%s4964_s1 + $0x4f0] sm:$0xff]  ;;  %v192_v41 = vld [vmem:[%s4964_s1 + $0x4a8] sm:$0xff] }
  0x69   :  { %3197 = vmatprep.subr.mxu0 %v3603_v0  ;;  %3216 = vmatprep.subr.mxu1 %v3603_v0 }
  0x6a   :  { %3198 = vmatpush3.msra.mxu0 %v123_v42  ;;  %3199 = vmatprep.mubr.msk.f32.mxu0 %vm3604_vm1, %v3603_v0  ;;  %v200_v42 = vld [vmem:[%s4964_s1 + $0x4e8] sm:$0xff] }
  0x6b   :  { %3217 = vmatpush3.msra.mxu1 %v131_v43  ;;  %3218 = vmatprep.mubr.msk.f32.mxu1 %vm3604_vm1, %v3603_v0  ;;  %v191_v43 = vld [vmem:[%s4964_s1 + $0x4a0] sm:$0xff] }
  0x6c   :  { %3200 = vmatmul.mubr.msk.f32.vlgmr.msra.gmra.mxu0 %vm299_vm0, %v21_v44  ;;  %3219 = vmatmul.mubr.msk.f32.vlgmr.msra.gmra.mxu1 %vm299_vm0, %v22_v45  ;;  %v199_v44 = vld [vmem:[%s4964_s1 + $0x4e0] sm:$0xff]  ;;  %v190_v45 = vld [vmem:[%s4964_s1 + $0x498] sm:$0xff] }
  0x6d   :  { %3221 = vmatprep.subr.mxu0 %v3603_v0  ;;  %3240 = vmatprep.subr.mxu1 %v3603_v0 }
  0x6e   :  { %3222 = vmatpush3.msra.mxu0 %v146_v46  ;;  %3241 = vmatpush3.msra.mxu1 %v154_v47  ;;  %v198_v46 = vld [vmem:[%s4964_s1 + $0x4d8] sm:$0xff]  ;;  %v189_v47 = vld [vmem:[%s4964_s1 + $0x490] sm:$0xff] }
  0x6f   :  { %3223 = vmatprep.subr.mxu0 %v3603_v0  ;;  %3242 = vmatprep.subr.mxu1 %v3603_v0 }
  0x70   :  { %3224 = vmatpush3.msra.mxu0 %v145_v48  ;;  %3243 = vmatpush3.msra.mxu1 %v153_v49  ;;  %v197_v48 = vld [vmem:[%s4964_s1 + $0x4d0] sm:$0xff]  ;;  %v188_v49 = vld [vmem:[%s4964_s1 + $0x488] sm:$0xff] }
  0x71   :  { %3225 = vmatprep.subr.mxu0 %v3603_v0  ;;  %3244 = vmatprep.subr.mxu1 %v3603_v0 }
  0x72   :  { %3226 = vmatpush3.msra.mxu0 %v144_v50  ;;  %3245 = vmatpush3.msra.mxu1 %v152_v51  ;;  %v196_v50 = vld [vmem:[%s4964_s1 + $0x4c8] sm:$0xff]  ;;  %v187_v51 = vld [vmem:[%s4964_s1 + $0x480] sm:$0xff] }
  0x73   :  { %3227 = vmatprep.subr.mxu0 %v3603_v0  ;;  %3246 = vmatprep.subr.mxu1 %v3603_v0 }
  0x74   :  { %3228 = vmatpush3.msra.mxu0 %v143_v52  ;;  %3247 = vmatpush3.msra.mxu1 %v151_v53  ;;  %v195_v52 = vld [vmem:[%s4964_s1 + $0x4c0] sm:$0xff] }
  0x75   :  { %3229 = vmatprep.subr.mxu0 %v3603_v0  ;;  %3248 = vmatprep.subr.mxu1 %v3603_v0  ;;  %v29_v53 = vld [vmem:[%s4965_s0 + $0x24] sm:$0x3] }
  0x76   :  { %3230 = vmatpush3.msra.mxu0 %v142_v54  ;;  %3249 = vmatpush3.msra.mxu1 %v150_v55  ;;  %v30_v54 = vld [vmem:[%s4965_s0 + $0x26] sm:$0x3]  ;;  %v210_v55 = vld [vmem:[%s4964_s1 + $0x538] sm:$0xff] }
  0x77   :  { %3231 = vmatprep.subr.mxu0 %v3603_v0  ;;  %3250 = vmatprep.subr.mxu1 %v3603_v0 }
  0x78   :  { %3232 = vmatpush3.msra.mxu0 %v141_v56  ;;  %3251 = vmatpush3.msra.mxu1 %v149_v57  ;;  %v218_v56 = vld [vmem:[%s4964_s1 + $0x578] sm:$0xff]  ;;  %v209_v57 = vld [vmem:[%s4964_s1 + $0x530] sm:$0xff] }
  0x79   :  { %3233 = vmatprep.subr.mxu0 %v3603_v0  ;;  %3252 = vmatprep.subr.mxu1 %v3603_v0 }
  0x7a   :  { %3234 = vmatpush3.msra.mxu0 %v140_v58  ;;  %3253 = vmatpush3.msra.mxu1 %v148_v59  ;;  %v217_v58 = vld [vmem:[%s4964_s1 + $0x570] sm:$0xff]  ;;  %v208_v59 = vld [vmem:[%s4964_s1 + $0x528] sm:$0xff] }
  0x7b   :  { %3235 = vmatprep.subr.mxu0 %v3603_v0  ;;  %3254 = vmatprep.subr.mxu1 %v3603_v0 }
  0x7c   :  { %3236 = vmatpush3.msra.mxu0 %v139_v60  ;;  %3237 = vmatprep.mubr.msk.f32.mxu0 %vm3604_vm1, %v3603_v0  ;;  %v216_v60 = vld [vmem:[%s4964_s1 + $0x568] sm:$0xff] }
  0x7d   :  { %3255 = vmatpush3.msra.mxu1 %v147_v61  ;;  %3256 = vmatprep.mubr.msk.f32.mxu1 %vm3604_vm1, %v3603_v0  ;;  %v207_v61 = vld [vmem:[%s4964_s1 + $0x520] sm:$0xff] }
  0x7e   :  { %3238 = vmatmul.mubr.msk.f32.vlgmr.msra.gmra.mxu0 %vm299_vm0, %v23_v62  ;;  %3257 = vmatmul.mubr.msk.f32.vlgmr.msra.gmra.mxu1 %vm299_vm0, %v24_v63  ;;  %v215_v62 = vld [vmem:[%s4964_s1 + $0x560] sm:$0xff]  ;;  %v206_v63 = vld [vmem:[%s4964_s1 + $0x518] sm:$0xff] }
  0x7f   :  { %3259 = vmatprep.subr.mxu0 %v3603_v0  ;;  %3278 = vmatprep.subr.mxu1 %v3603_v0 }
  0x80   :  { %3260 = vmatpush3.msra.mxu0 %v162_v1  ;;  %3279 = vmatpush3.msra.mxu1 %v170_v2  ;;  %v214_v1 = vld [vmem:[%s4964_s1 + $0x558] sm:$0xff]  ;;  %v205_v2 = vld [vmem:[%s4964_s1 + $0x510] sm:$0xff] }
  0x81   :  { %3261 = vmatprep.subr.mxu0 %v3603_v0  ;;  %3280 = vmatprep.subr.mxu1 %v3603_v0 }
  0x82   :  { %3262 = vmatpush3.msra.mxu0 %v161_v3  ;;  %3281 = vmatpush3.msra.mxu1 %v169_v4  ;;  %v213_v3 = vld [vmem:[%s4964_s1 + $0x550] sm:$0xff]  ;;  %v204_v4 = vld [vmem:[%s4964_s1 + $0x508] sm:$0xff] }
  0x83   :  { %3263 = vmatprep.subr.mxu0 %v3603_v0  ;;  %3282 = vmatprep.subr.mxu1 %v3603_v0 }
  0x84   :  { %3264 = vmatpush3.msra.mxu0 %v160_v5  ;;  %3283 = vmatpush3.msra.mxu1 %v168_v6  ;;  %v212_v5 = vld [vmem:[%s4964_s1 + $0x548] sm:$0xff]  ;;  %v203_v6 = vld [vmem:[%s4964_s1 + $0x500] sm:$0xff] }
  0x85   :  { %3265 = vmatprep.subr.mxu0 %v3603_v0  ;;  %3284 = vmatprep.subr.mxu1 %v3603_v0 }
  0x86   :  { %3266 = vmatpush3.msra.mxu0 %v159_v7  ;;  %3285 = vmatpush3.msra.mxu1 %v167_v8  ;;  %v211_v7 = vld [vmem:[%s4964_s1 + $0x540] sm:$0xff]  ;;  %v31_v8 = vld [vmem:[%s4965_s0 + $0x28] sm:$0x3] }
  0x87   :  { %3267 = vmatprep.subr.mxu0 %v3603_v0  ;;  %3286 = vmatprep.subr.mxu1 %v3603_v0 }
  0x88   :  { %3268 = vmatpush3.msra.mxu0 %v158_v9  ;;  %3287 = vmatpush3.msra.mxu1 %v166_v10  ;;  %v32_v9 = vld [vmem:[%s4965_s0 + $0x2a] sm:$0x3]  ;;  %v226_v10 = vld [vmem:[%s4964_s1 + $0x5b8] sm:$0xff] }
  0x89   :  { %3269 = vmatprep.subr.mxu0 %v3603_v0  ;;  %3288 = vmatprep.subr.mxu1 %v3603_v0 }
  0x8a   :  { %3270 = vmatpush3.msra.mxu0 %v157_v11  ;;  %3289 = vmatpush3.msra.mxu1 %v165_v12  ;;  %v234_v11 = vld [vmem:[%s4964_s1 + $0x5f8] sm:$0xff]  ;;  %v225_v12 = vld [vmem:[%s4964_s1 + $0x5b0] sm:$0xff] }
  0x8b   :  { %3271 = vmatprep.subr.mxu0 %v3603_v0  ;;  %3290 = vmatprep.subr.mxu1 %v3603_v0 }
  0x8c   :  { %3272 = vmatpush3.msra.mxu0 %v156_v13  ;;  %3291 = vmatpush3.msra.mxu1 %v164_v14  ;;  %v233_v13 = vld [vmem:[%s4964_s1 + $0x5f0] sm:$0xff]  ;;  %v224_v14 = vld [vmem:[%s4964_s1 + $0x5a8] sm:$0xff] }
  0x8d   :  { %3273 = vmatprep.subr.mxu0 %v3603_v0  ;;  %3292 = vmatprep.subr.mxu1 %v3603_v0 }
  0x8e   :  { %3274 = vmatpush3.msra.mxu0 %v155_v15  ;;  %3275 = vmatprep.mubr.msk.f32.mxu0 %vm3604_vm1, %v3603_v0  ;;  %v232_v15 = vld [vmem:[%s4964_s1 + $0x5e8] sm:$0xff] }
  0x8f   :  { %3293 = vmatpush3.msra.mxu1 %v163_v16  ;;  %3294 = vmatprep.mubr.msk.f32.mxu1 %vm3604_vm1, %v3603_v0  ;;  %v223_v16 = vld [vmem:[%s4964_s1 + $0x5a0] sm:$0xff] }
  0x90   :  { %3276 = vmatmul.mubr.msk.f32.vlgmr.msra.gmra.mxu0 %vm299_vm0, %v25_v17  ;;  %3295 = vmatmul.mubr.msk.f32.vlgmr.msra.gmra.mxu1 %vm299_vm0, %v26_v18  ;;  %v231_v17 = vld [vmem:[%s4964_s1 + $0x5e0] sm:$0xff]  ;;  %v222_v18 = vld [vmem:[%s4964_s1 + $0x598] sm:$0xff] }
  0x91   :  { %3297 = vmatprep.subr.mxu0 %v3603_v0  ;;  %3316 = vmatprep.subr.mxu1 %v3603_v0 }
  0x92   :  { %3298 = vmatpush3.msra.mxu0 %v178_v19  ;;  %3317 = vmatpush3.msra.mxu1 %v186_v20  ;;  %v230_v19 = vld [vmem:[%s4964_s1 + $0x5d8] sm:$0xff]  ;;  %v221_v20 = vld [vmem:[%s4964_s1 + $0x590] sm:$0xff] }
  0x93   :  { %3299 = vmatprep.subr.mxu0 %v3603_v0  ;;  %3318 = vmatprep.subr.mxu1 %v3603_v0 }
  0x94   :  { %3300 = vmatpush3.msra.mxu0 %v177_v21  ;;  %3319 = vmatpush3.msra.mxu1 %v185_v22  ;;  %v229_v21 = vld [vmem:[%s4964_s1 + $0x5d0] sm:$0xff]  ;;  %v220_v22 = vld [vmem:[%s4964_s1 + $0x588] sm:$0xff] }
  0x95   :  { %3301 = vmatprep.subr.mxu0 %v3603_v0  ;;  %3320 = vmatprep.subr.mxu1 %v3603_v0 }
  0x96   :  { %3302 = vmatpush3.msra.mxu0 %v176_v23  ;;  %3321 = vmatpush3.msra.mxu1 %v184_v24  ;;  %v228_v23 = vld [vmem:[%s4964_s1 + $0x5c8] sm:$0xff] }
  0x97   :  { %3303 = vmatprep.subr.mxu0 %v3603_v0  ;;  %3322 = vmatprep.subr.mxu1 %v3603_v0 }
  0x98   :  { %3304 = vmatpush3.msra.mxu0 %v175_v25  ;;  %3323 = vmatpush3.msra.mxu1 %v183_v26  ;;  %v219_v26 = vld [vmem:[%s4964_s1 + $0x580] sm:$0xff] }
  0x99   :  { %3305 = vmatprep.subr.mxu0 %v3603_v0  ;;  %3324 = vmatprep.subr.mxu1 %v3603_v0 }
  0x9a   :  { %3306 = vmatpush3.msra.mxu0 %v174_v27  ;;  %3325 = vmatpush3.msra.mxu1 %v182_v28  ;;  %v227_v27 = vld [vmem:[%s4964_s1 + $0x5c0] sm:$0xff] }
  0x9b   :  { %3307 = vmatprep.subr.mxu0 %v3603_v0  ;;  %3326 = vmatprep.subr.mxu1 %v3603_v0 }
  0x9c   :  { %3308 = vmatpush3.msra.mxu0 %v173_v29  ;;  %3327 = vmatpush3.msra.mxu1 %v181_v30  ;;  %v33_v30 = vld [vmem:[%s4965_s0 + $0x2c] sm:$0x3] }
  0x9d   :  { %3309 = vmatprep.subr.mxu0 %v3603_v0  ;;  %3328 = vmatprep.subr.mxu1 %v3603_v0 }
  0x9e   :  { %3310 = vmatpush3.msra.mxu0 %v172_v31  ;;  %3329 = vmatpush3.msra.mxu1 %v180_v32  ;;  %v34_v31 = vld [vmem:[%s4965_s0 + $0x2e] sm:$0x3]  ;;  %v242_v32 = vld [vmem:[%s4964_s1 + $0x638] sm:$0xff] }
  0x9f   :  { %3311 = vmatprep.subr.mxu0 %v3603_v0  ;;  %3330 = vmatprep.subr.mxu1 %v3603_v0 }
  0xa0   :  { %3312 = vmatpush3.msra.mxu0 %v171_v33  ;;  %3313 = vmatprep.mubr.msk.f32.mxu0 %vm3604_vm1, %v3603_v0  ;;  %v250_v33 = vld [vmem:[%s4964_s1 + $0x678] sm:$0xff] }
  0xa1   :  { %3331 = vmatpush3.msra.mxu1 %v179_v34  ;;  %3332 = vmatprep.mubr.msk.f32.mxu1 %vm3604_vm1, %v3603_v0  ;;  %v241_v34 = vld [vmem:[%s4964_s1 + $0x630] sm:$0xff] }
  0xa2   :  { %3314 = vmatmul.mubr.msk.f32.vlgmr.msra.gmra.mxu0 %vm299_vm0, %v27_v35  ;;  %3333 = vmatmul.mubr.msk.f32.vlgmr.msra.gmra.mxu1 %vm299_vm0, %v28_v36  ;;  %v249_v35 = vld [vmem:[%s4964_s1 + $0x670] sm:$0xff]  ;;  %v240_v36 = vld [vmem:[%s4964_s1 + $0x628] sm:$0xff] }
  0xa3   :  { %3335 = vmatprep.subr.mxu0 %v3603_v0  ;;  %3354 = vmatprep.subr.mxu1 %v3603_v0 }
  0xa4   :  { %3336 = vmatpush3.msra.mxu0 %v194_v37  ;;  %3355 = vmatpush3.msra.mxu1 %v202_v38  ;;  %v248_v37 = vld [vmem:[%s4964_s1 + $0x668] sm:$0xff]  ;;  %v239_v38 = vld [vmem:[%s4964_s1 + $0x620] sm:$0xff] }
  0xa5   :  { %3337 = vmatprep.subr.mxu0 %v3603_v0  ;;  %3356 = vmatprep.subr.mxu1 %v3603_v0 }
  0xa6   :  { %3338 = vmatpush3.msra.mxu0 %v193_v39  ;;  %3357 = vmatpush3.msra.mxu1 %v201_v40  ;;  %v247_v39 = vld [vmem:[%s4964_s1 + $0x660] sm:$0xff]  ;;  %v238_v40 = vld [vmem:[%s4964_s1 + $0x618] sm:$0xff] }
  0xa7   :  { %3339 = vmatprep.subr.mxu0 %v3603_v0  ;;  %3358 = vmatprep.subr.mxu1 %v3603_v0 }
  0xa8   :  { %3340 = vmatpush3.msra.mxu0 %v192_v41  ;;  %3359 = vmatpush3.msra.mxu1 %v200_v42  ;;  %v246_v41 = vld [vmem:[%s4964_s1 + $0x658] sm:$0xff]  ;;  %v237_v42 = vld [vmem:[%s4964_s1 + $0x610] sm:$0xff] }
  0xa9   :  { %3341 = vmatprep.subr.mxu0 %v3603_v0  ;;  %3360 = vmatprep.subr.mxu1 %v3603_v0 }
  0xaa   :  { %3342 = vmatpush3.msra.mxu0 %v191_v43  ;;  %3361 = vmatpush3.msra.mxu1 %v199_v44  ;;  %v245_v43 = vld [vmem:[%s4964_s1 + $0x650] sm:$0xff]  ;;  %v236_v44 = vld [vmem:[%s4964_s1 + $0x608] sm:$0xff] }
  0xab   :  { %3343 = vmatprep.subr.mxu0 %v3603_v0  ;;  %3362 = vmatprep.subr.mxu1 %v3603_v0 }
  0xac   :  { %3344 = vmatpush3.msra.mxu0 %v190_v45  ;;  %3363 = vmatpush3.msra.mxu1 %v198_v46  ;;  %v244_v45 = vld [vmem:[%s4964_s1 + $0x648] sm:$0xff] }
  0xad   :  { %3345 = vmatprep.subr.mxu0 %v3603_v0  ;;  %3364 = vmatprep.subr.mxu1 %v3603_v0 }
  0xae   :  { %3346 = vmatpush3.msra.mxu0 %v189_v47  ;;  %3365 = vmatpush3.msra.mxu1 %v197_v48  ;;  %v235_v48 = vld [vmem:[%s4964_s1 + $0x600] sm:$0xff] }
  0xaf   :  { %3347 = vmatprep.subr.mxu0 %v3603_v0  ;;  %3366 = vmatprep.subr.mxu1 %v3603_v0 }
  0xb0   :  { %3348 = vmatpush3.msra.mxu0 %v188_v49  ;;  %3367 = vmatpush3.msra.mxu1 %v196_v50  ;;  %v243_v49 = vld [vmem:[%s4964_s1 + $0x640] sm:$0xff] }
  0xb1   :  { %3349 = vmatprep.subr.mxu0 %v3603_v0  ;;  %3368 = vmatprep.subr.mxu1 %v3603_v0 }
  0xb2   :  { %3350 = vmatpush3.msra.mxu0 %v187_v51  ;;  %3351 = vmatprep.mubr.msk.f32.mxu0 %vm3604_vm1, %v3603_v0 }
  0xb3   :  { %3369 = vmatpush3.msra.mxu1 %v195_v52  ;;  %3370 = vmatprep.mubr.msk.f32.mxu1 %vm3604_vm1, %v3603_v0  ;;  %v35_v52 = vld [vmem:[%s4965_s0 + $0x30] sm:$0x3] }
  0xb4   :  { %3352 = vmatmul.mubr.msk.f32.vlgmr.msra.gmra.mxu0 %vm299_vm0, %v29_v53  ;;  %3371 = vmatmul.mubr.msk.f32.vlgmr.msra.gmra.mxu1 %vm299_vm0, %v30_v54  ;;  %v36_v53 = vld [vmem:[%s4965_s0 + $0x32] sm:$0x3]  ;;  %v258_v54 = vld [vmem:[%s4964_s1 + $0x6b8] sm:$0xff] }
  0xb5   :  { %3373 = vmatprep.subr.mxu0 %v3603_v0  ;;  %3392 = vmatprep.subr.mxu1 %v3603_v0 }
  0xb6   :  { %3374 = vmatpush3.msra.mxu0 %v210_v55  ;;  %3393 = vmatpush3.msra.mxu1 %v218_v56  ;;  %v266_v55 = vld [vmem:[%s4964_s1 + $0x6f8] sm:$0xff]  ;;  %v257_v56 = vld [vmem:[%s4964_s1 + $0x6b0] sm:$0xff] }
  0xb7   :  { %3375 = vmatprep.subr.mxu0 %v3603_v0  ;;  %3394 = vmatprep.subr.mxu1 %v3603_v0 }
  0xb8   :  { %3376 = vmatpush3.msra.mxu0 %v209_v57  ;;  %3395 = vmatpush3.msra.mxu1 %v217_v58  ;;  %v265_v57 = vld [vmem:[%s4964_s1 + $0x6f0] sm:$0xff]  ;;  %v256_v58 = vld [vmem:[%s4964_s1 + $0x6a8] sm:$0xff] }
  0xb9   :  { %3377 = vmatprep.subr.mxu0 %v3603_v0  ;;  %3396 = vmatprep.subr.mxu1 %v3603_v0 }
  0xba   :  { %3378 = vmatpush3.msra.mxu0 %v208_v59  ;;  %3397 = vmatpush3.msra.mxu1 %v216_v60  ;;  %v264_v59 = vld [vmem:[%s4964_s1 + $0x6e8] sm:$0xff]  ;;  %v255_v60 = vld [vmem:[%s4964_s1 + $0x6a0] sm:$0xff] }
  0xbb   :  { %3379 = vmatprep.subr.mxu0 %v3603_v0  ;;  %3398 = vmatprep.subr.mxu1 %v3603_v0 }
  0xbc   :  { %3380 = vmatpush3.msra.mxu0 %v207_v61  ;;  %3399 = vmatpush3.msra.mxu1 %v215_v62  ;;  %v263_v61 = vld [vmem:[%s4964_s1 + $0x6e0] sm:$0xff]  ;;  %v254_v62 = vld [vmem:[%s4964_s1 + $0x698] sm:$0xff] }
  0xbd   :  { %3381 = vmatprep.subr.mxu0 %v3603_v0  ;;  %3400 = vmatprep.subr.mxu1 %v3603_v0 }
  0xbe   :  { %3382 = vmatpush3.msra.mxu0 %v206_v63  ;;  %3401 = vmatpush3.msra.mxu1 %v214_v1  ;;  %v262_v63 = vld [vmem:[%s4964_s1 + $0x6d8] sm:$0xff]  ;;  %v253_v1 = vld [vmem:[%s4964_s1 + $0x690] sm:$0xff] }
  0xbf   :  { %3383 = vmatprep.subr.mxu0 %v3603_v0  ;;  %3402 = vmatprep.subr.mxu1 %v3603_v0 }
  0xc0   :  { %3384 = vmatpush3.msra.mxu0 %v205_v2  ;;  %3403 = vmatpush3.msra.mxu1 %v213_v3  ;;  %v261_v2 = vld [vmem:[%s4964_s1 + $0x6d0] sm:$0xff]  ;;  %v252_v3 = vld [vmem:[%s4964_s1 + $0x688] sm:$0xff] }
  0xc1   :  { %3385 = vmatprep.subr.mxu0 %v3603_v0  ;;  %3404 = vmatprep.subr.mxu1 %v3603_v0 }
  0xc2   :  { %3386 = vmatpush3.msra.mxu0 %v204_v4  ;;  %3405 = vmatpush3.msra.mxu1 %v212_v5  ;;  %v260_v4 = vld [vmem:[%s4964_s1 + $0x6c8] sm:$0xff] }
  0xc3   :  { %3387 = vmatprep.subr.mxu0 %v3603_v0  ;;  %3406 = vmatprep.subr.mxu1 %v3603_v0 }
  0xc4   :  { %3388 = vmatpush3.msra.mxu0 %v203_v6  ;;  %3389 = vmatprep.mubr.msk.f32.mxu0 %vm3604_vm1, %v3603_v0 }
  0xc5   :  { %3407 = vmatpush3.msra.mxu1 %v211_v7  ;;  %3408 = vmatprep.mubr.msk.f32.mxu1 %vm3604_vm1, %v3603_v0  ;;  %v251_v7 = vld [vmem:[%s4964_s1 + $0x680] sm:$0xff] }
  0xc6   :  { %3390 = vmatmul.mubr.msk.f32.vlgmr.msra.gmra.mxu0 %vm299_vm0, %v31_v8  ;;  %3409 = vmatmul.mubr.msk.f32.vlgmr.msra.gmra.mxu1 %vm299_vm0, %v32_v9  ;;  %v259_v8 = vld [vmem:[%s4964_s1 + $0x6c0] sm:$0xff] }
  0xc7   :  { %3411 = vmatprep.subr.mxu0 %v3603_v0  ;;  %3430 = vmatprep.subr.mxu1 %v3603_v0 }
  0xc8   :  { %3412 = vmatpush3.msra.mxu0 %v226_v10  ;;  %3431 = vmatpush3.msra.mxu1 %v234_v11  ;;  %v37_v11 = vld [vmem:[%s4965_s0 + $0x34] sm:$0x3] }
  0xc9   :  { %3413 = vmatprep.subr.mxu0 %v3603_v0  ;;  %3432 = vmatprep.subr.mxu1 %v3603_v0 }
  0xca   :  { %3414 = vmatpush3.msra.mxu0 %v225_v12  ;;  %3433 = vmatpush3.msra.mxu1 %v233_v13  ;;  %v38_v12 = vld [vmem:[%s4965_s0 + $0x36] sm:$0x3]  ;;  %v274_v13 = vld [vmem:[%s4964_s1 + $0x738] sm:$0xff] }
  0xcb   :  { %3415 = vmatprep.subr.mxu0 %v3603_v0  ;;  %3434 = vmatprep.subr.mxu1 %v3603_v0 }
  0xcc   :  { %3416 = vmatpush3.msra.mxu0 %v224_v14  ;;  %3435 = vmatpush3.msra.mxu1 %v232_v15  ;;  %v282_v14 = vld [vmem:[%s4964_s1 + $0x778] sm:$0xff]  ;;  %v273_v15 = vld [vmem:[%s4964_s1 + $0x730] sm:$0xff] }
  0xcd   :  { %3417 = vmatprep.subr.mxu0 %v3603_v0  ;;  %3436 = vmatprep.subr.mxu1 %v3603_v0 }
  0xce   :  { %3418 = vmatpush3.msra.mxu0 %v223_v16  ;;  %3437 = vmatpush3.msra.mxu1 %v231_v17  ;;  %v281_v16 = vld [vmem:[%s4964_s1 + $0x770] sm:$0xff]  ;;  %v272_v17 = vld [vmem:[%s4964_s1 + $0x728] sm:$0xff] }
  0xcf   :  { %3419 = vmatprep.subr.mxu0 %v3603_v0  ;;  %3438 = vmatprep.subr.mxu1 %v3603_v0 }
  0xd0   :  { %3420 = vmatpush3.msra.mxu0 %v222_v18  ;;  %3439 = vmatpush3.msra.mxu1 %v230_v19  ;;  %v280_v18 = vld [vmem:[%s4964_s1 + $0x768] sm:$0xff]  ;;  %v271_v19 = vld [vmem:[%s4964_s1 + $0x720] sm:$0xff] }
  0xd1   :  { %3421 = vmatprep.subr.mxu0 %v3603_v0  ;;  %3440 = vmatprep.subr.mxu1 %v3603_v0 }
  0xd2   :  { %3422 = vmatpush3.msra.mxu0 %v221_v20  ;;  %3441 = vmatpush3.msra.mxu1 %v229_v21  ;;  %v369_v24 = vpop.f32.mrf.mxu0  ;;  %v442_v25 = vpop.f32.mrf.mxu1  ;;  %v279_v20 = vld [vmem:[%s4964_s1 + $0x760] sm:$0xff]  ;;  %v270_v21 = vld [vmem:[%s4964_s1 + $0x718] sm:$0xff] }
  0xd3   :  { %3423 = vmatprep.subr.mxu0 %v3603_v0  ;;  %3442 = vmatprep.subr.mxu1 %v3603_v0  ;;  %2637 = vst.msk [vmem:[%s4966_s2] sm:$0x3] %vm2636_vm2, %v369_v24  ;;  %2638 = vst.msk [vmem:[%s4966_s2 + $0x2] sm:$0x3] %vm2636_vm2, %v442_v25  ;;  %v277_v24 = vld [vmem:[%s4964_s1 + $0x750] sm:$0xff]  ;;  %v268_v25 = vld [vmem:[%s4964_s1 + $0x708] sm:$0xff] }
  0xd4   :  { %3424 = vmatpush3.msra.mxu0 %v220_v22  ;;  %3443 = vmatpush3.msra.mxu1 %v228_v23  ;;  %v3011_v28 = vpop.f32.mrf.mxu0  ;;  %v3030_v29 = vpop.f32.mrf.mxu1  ;;  %v278_v22 = vld [vmem:[%s4964_s1 + $0x758] sm:$0xff]  ;;  %v269_v23 = vld [vmem:[%s4964_s1 + $0x710] sm:$0xff] }
  0xd5   :  { %3425 = vmatprep.subr.mxu0 %v3603_v0  ;;  %3444 = vmatprep.subr.mxu1 %v3603_v0  ;;  %v267_v29 = vld [vmem:[%s4964_s1 + $0x700] sm:$0xff] }
  0xd6   :  { %3426 = vmatpush3.msra.mxu0 %v219_v26  ;;  %3427 = vmatprep.mubr.msk.f32.mxu0 %vm3604_vm1, %v3603_v0  ;;  %v276_v26 = vld [vmem:[%s4964_s1 + $0x748] sm:$0xff] }
  0xd7   :  { %3445 = vmatpush3.msra.mxu1 %v227_v27  ;;  %3446 = vmatprep.mubr.msk.f32.mxu1 %vm3604_vm1, %v3603_v0 }
  0xd8   :  { %3428 = vmatmul.mubr.msk.f32.vlgmr.msra.gmra.mxu0 %vm299_vm0, %v33_v30  ;;  %3447 = vmatmul.mubr.msk.f32.vlgmr.msra.gmra.mxu1 %vm299_vm0, %v34_v31  ;;  %v275_v30 = vld [vmem:[%s4964_s1 + $0x740] sm:$0xff] }
  0xd9   :  { %3449 = vmatprep.subr.mxu0 %v3603_v0  ;;  %3468 = vmatprep.subr.mxu1 %v3603_v0 }
  0xda   :  { %3450 = vmatpush3.msra.mxu0 %v242_v32  ;;  %3469 = vmatpush3.msra.mxu1 %v250_v33  ;;  %v39_v33 = vld [vmem:[%s4965_s0 + $0x38] sm:$0x3] }
  0xdb   :  { %3451 = vmatprep.subr.mxu0 %v3603_v0  ;;  %3470 = vmatprep.subr.mxu1 %v3603_v0 }
  0xdc   :  { %3452 = vmatpush3.msra.mxu0 %v241_v34  ;;  %3471 = vmatpush3.msra.mxu1 %v249_v35  ;;  %v40_v34 = vld [vmem:[%s4965_s0 + $0x3a] sm:$0x3] }
  0xdd   :  { %3453 = vmatprep.subr.mxu0 %v3603_v0  ;;  %3472 = vmatprep.subr.mxu1 %v3603_v0  ;;  %v290_v35 = vld [vmem:[%s4964_s1 + $0x7b8] sm:$0xff] }
  0xde   :  { %3454 = vmatpush3.msra.mxu0 %v240_v36  ;;  %3473 = vmatpush3.msra.mxu1 %v248_v37  ;;  %v298_v36 = vld [vmem:[%s4964_s1 + $0x7f8] sm:$0xff]  ;;  %v289_v37 = vld [vmem:[%s4964_s1 + $0x7b0] sm:$0xff] }
  0xdf   :  { %3455 = vmatprep.subr.mxu0 %v3603_v0  ;;  %3474 = vmatprep.subr.mxu1 %v3603_v0 }
  0xe0   :  { %3456 = vmatpush3.msra.mxu0 %v239_v38  ;;  %3475 = vmatpush3.msra.mxu1 %v247_v39  ;;  %v297_v38 = vld [vmem:[%s4964_s1 + $0x7f0] sm:$0xff]  ;;  %v288_v39 = vld [vmem:[%s4964_s1 + $0x7a8] sm:$0xff] }
  0xe1   :  { %3457 = vmatprep.subr.mxu0 %v3603_v0  ;;  %3476 = vmatprep.subr.mxu1 %v3603_v0 }
  0xe2   :  { %3458 = vmatpush3.msra.mxu0 %v238_v40  ;;  %3477 = vmatpush3.msra.mxu1 %v246_v41  ;;  %v296_v40 = vld [vmem:[%s4964_s1 + $0x7e8] sm:$0xff]  ;;  %v287_v41 = vld [vmem:[%s4964_s1 + $0x7a0] sm:$0xff] }
  0xe3   :  { %3459 = vmatprep.subr.mxu0 %v3603_v0  ;;  %3478 = vmatprep.subr.mxu1 %v3603_v0 }
  0xe4   :  { %3460 = vmatpush3.msra.mxu0 %v237_v42  ;;  %3479 = vmatpush3.msra.mxu1 %v245_v43  ;;  %v515_v46 = vpop.f32.mrf.mxu0  ;;  %v588_v47 = vpop.f32.mrf.mxu1  ;;  %v295_v42 = vld [vmem:[%s4964_s1 + $0x7e0] sm:$0xff]  ;;  %v286_v43 = vld [vmem:[%s4964_s1 + $0x798] sm:$0xff] }
  0xe5   :  { %3461 = vmatprep.subr.mxu0 %v3603_v0  ;;  %3480 = vmatprep.subr.mxu1 %v3603_v0  ;;  %2639 = vst.msk [vmem:[%s4966_s2 + $0x4] sm:$0x3] %vm2636_vm2, %v515_v46  ;;  %2640 = vst.msk [vmem:[%s4966_s2 + $0x6] sm:$0x3] %vm2636_vm2, %v588_v47  ;;  %v293_v46 = vld [vmem:[%s4964_s1 + $0x7d0] sm:$0xff]  ;;  %v284_v47 = vld [vmem:[%s4964_s1 + $0x788] sm:$0xff] }
  0xe6   :  { %3462 = vmatpush3.msra.mxu0 %v236_v44  ;;  %3481 = vmatpush3.msra.mxu1 %v244_v45  ;;  %v3049_v50 = vpop.f32.mrf.mxu0  ;;  %v3068_v51 = vpop.f32.mrf.mxu1  ;;  %v294_v44 = vld [vmem:[%s4964_s1 + $0x7d8] sm:$0xff]  ;;  %v285_v45 = vld [vmem:[%s4964_s1 + $0x790] sm:$0xff] }
  0xe7   :  { %3463 = vmatprep.subr.mxu0 %v3603_v0  ;;  %3482 = vmatprep.subr.mxu1 %v3603_v0  ;;  %v283_v51 = vld [vmem:[%s4964_s1 + $0x780] sm:$0xff] }
  0xe8   :  { %3464 = vmatpush3.msra.mxu0 %v235_v48  ;;  %3465 = vmatprep.mubr.msk.f32.mxu0 %vm3604_vm1, %v3603_v0  ;;  %v292_v48 = vld [vmem:[%s4964_s1 + $0x7c8] sm:$0xff] }
  0xe9   :  { %3483 = vmatpush3.msra.mxu1 %v243_v49  ;;  %3484 = vmatprep.mubr.msk.f32.mxu1 %vm3604_vm1, %v3603_v0 }
  0xea   :  { %3466 = vmatmul.mubr.msk.f32.vlgmr.msra.gmra.mxu0 %vm299_vm0, %v35_v52  ;;  %3485 = vmatmul.mubr.msk.f32.vlgmr.msra.gmra.mxu1 %vm299_vm0, %v36_v53  ;;  %v291_v52 = vld [vmem:[%s4964_s1 + $0x7c0] sm:$0xff] }
  0xeb   :  { %3487 = vmatprep.subr.mxu0 %v3603_v0  ;;  %3506 = vmatprep.subr.mxu1 %v3603_v0 }
  0xec   :  { %3488 = vmatpush3.msra.mxu0 %v258_v54  ;;  %3507 = vmatpush3.msra.mxu1 %v266_v55  ;;  %v41_v55 = vld [vmem:[%s4965_s0 + $0x3c] sm:$0x3] }
  0xed   :  { %3489 = vmatprep.subr.mxu0 %v3603_v0  ;;  %3508 = vmatprep.subr.mxu1 %v3603_v0 }
  0xee   :  { %3490 = vmatpush3.msra.mxu0 %v257_v56  ;;  %3509 = vmatpush3.msra.mxu1 %v265_v57  ;;  %v42_v56 = vld [vmem:[%s4965_s0 + $0x3e] sm:$0x3] }
  0xef   :  { %3491 = vmatprep.subr.mxu0 %v3603_v0  ;;  %3510 = vmatprep.subr.mxu1 %v3603_v0 }
  0xf0   :  { %3492 = vmatpush3.msra.mxu0 %v256_v58  ;;  %3511 = vmatpush3.msra.mxu1 %v264_v59 }
  0xf1   :  { %3493 = vmatprep.subr.mxu0 %v3603_v0  ;;  %3512 = vmatprep.subr.mxu1 %v3603_v0 }
  0xf2   :  { %3494 = vmatpush3.msra.mxu0 %v255_v60  ;;  %3513 = vmatpush3.msra.mxu1 %v263_v61 }
  0xf3   :  { %3495 = vmatprep.subr.mxu0 %v3603_v0  ;;  %3514 = vmatprep.subr.mxu1 %v3603_v0 }
  0xf4   :  { %3496 = vmatpush3.msra.mxu0 %v254_v62  ;;  %3515 = vmatpush3.msra.mxu1 %v262_v63 }
  0xf5   :  { %3497 = vmatprep.subr.mxu0 %v3603_v0  ;;  %3516 = vmatprep.subr.mxu1 %v3603_v0 }
  0xf6   :  { %3498 = vmatpush3.msra.mxu0 %v253_v1  ;;  %3517 = vmatpush3.msra.mxu1 %v261_v2  ;;  %v661_v5 = vpop.f32.mrf.mxu0  ;;  %v734_v6 = vpop.f32.mrf.mxu1 }
  0xf7   :  { %3499 = vmatprep.subr.mxu0 %v3603_v0  ;;  %3518 = vmatprep.subr.mxu1 %v3603_v0  ;;  %2641 = vst.msk [vmem:[%s4966_s2 + $0x8] sm:$0x3] %vm2636_vm2, %v661_v5  ;;  %2642 = vst.msk [vmem:[%s4966_s2 + $0xa] sm:$0x3] %vm2636_vm2, %v734_v6 }
  0xf8   :  { %3500 = vmatpush3.msra.mxu0 %v252_v3  ;;  %3519 = vmatpush3.msra.mxu1 %v260_v4  ;;  %v3087_v9 = vpop.f32.mrf.mxu0  ;;  %v3106_v10 = vpop.f32.mrf.mxu1 }
  0xf9   :  { %3501 = vmatprep.subr.mxu0 %v3603_v0  ;;  %3520 = vmatprep.subr.mxu1 %v3603_v0 }
  0xfa   :  { %3502 = vmatpush3.msra.mxu0 %v251_v7  ;;  %3503 = vmatprep.mubr.msk.f32.mxu0 %vm3604_vm1, %v3603_v0 }
  0xfb   :  { %3521 = vmatpush3.msra.mxu1 %v259_v8  ;;  %3522 = vmatprep.mubr.msk.f32.mxu1 %vm3604_vm1, %v3603_v0 }
  0xfc   :  { %3504 = vmatmul.mubr.msk.f32.vlgmr.msra.gmra.mxu0 %vm299_vm0, %v37_v11  ;;  %3523 = vmatmul.mubr.msk.f32.vlgmr.msra.gmra.mxu1 %vm299_vm0, %v38_v12 }
  0xfd   :  { %3525 = vmatprep.subr.mxu0 %v3603_v0  ;;  %3544 = vmatprep.subr.mxu1 %v3603_v0 }
  0xfe   :  { %3526 = vmatpush3.msra.mxu0 %v274_v13  ;;  %3545 = vmatpush3.msra.mxu1 %v282_v14 }
  0xff   :  { %3527 = vmatprep.subr.mxu0 %v3603_v0  ;;  %3546 = vmatprep.subr.mxu1 %v3603_v0 }
 0x100   :  { %3528 = vmatpush3.msra.mxu0 %v273_v15  ;;  %3547 = vmatpush3.msra.mxu1 %v281_v16 }
 0x101   :  { %3529 = vmatprep.subr.mxu0 %v3603_v0  ;;  %3548 = vmatprep.subr.mxu1 %v3603_v0 }
 0x102   :  { %3530 = vmatpush3.msra.mxu0 %v272_v17  ;;  %3549 = vmatpush3.msra.mxu1 %v280_v18 }
 0x103   :  { %3531 = vmatprep.subr.mxu0 %v3603_v0  ;;  %3550 = vmatprep.subr.mxu1 %v3603_v0 }
 0x104   :  { %3532 = vmatpush3.msra.mxu0 %v271_v19  ;;  %3551 = vmatpush3.msra.mxu1 %v279_v20 }
 0x105   :  { %3533 = vmatprep.subr.mxu0 %v3603_v0  ;;  %3552 = vmatprep.subr.mxu1 %v3603_v0 }
 0x106   :  { %3534 = vmatpush3.msra.mxu0 %v270_v21  ;;  %3553 = vmatpush3.msra.mxu1 %v278_v22 }
 0x107   :  { %3535 = vmatprep.subr.mxu0 %v3603_v0  ;;  %3554 = vmatprep.subr.mxu1 %v3603_v0 }
 0x108   :  { %3536 = vmatpush3.msra.mxu0 %v269_v23  ;;  %3555 = vmatpush3.msra.mxu1 %v277_v24  ;;  %v807_v27 = vpop.f32.mrf.mxu0  ;;  %v880_v28 = vpop.f32.mrf.mxu1 }
 0x109   :  { %3537 = vmatprep.subr.mxu0 %v3603_v0  ;;  %3556 = vmatprep.subr.mxu1 %v3603_v0  ;;  %2643 = vst.msk [vmem:[%s4966_s2 + $0xc] sm:$0x3] %vm2636_vm2, %v807_v27  ;;  %2644 = vst.msk [vmem:[%s4966_s2 + $0xe] sm:$0x3] %vm2636_vm2, %v880_v28 }
 0x10a   :  { %3538 = vmatpush3.msra.mxu0 %v268_v25  ;;  %3557 = vmatpush3.msra.mxu1 %v276_v26  ;;  %v3125_v31 = vpop.f32.mrf.mxu0  ;;  %v3144_v32 = vpop.f32.mrf.mxu1 }
 0x10b   :  { %3539 = vmatprep.subr.mxu0 %v3603_v0  ;;  %3558 = vmatprep.subr.mxu1 %v3603_v0 }
 0x10c   :  { %3540 = vmatpush3.msra.mxu0 %v267_v29  ;;  %3541 = vmatprep.mubr.msk.f32.mxu0 %vm3604_vm1, %v3603_v0 }
 0x10d   :  { %3559 = vmatpush3.msra.mxu1 %v275_v30  ;;  %3560 = vmatprep.mubr.msk.f32.mxu1 %vm3604_vm1, %v3603_v0 }
 0x10e   :  { %3542 = vmatmul.mubr.msk.f32.vlgmr.msra.gmra.mxu0 %vm299_vm0, %v39_v33  ;;  %3561 = vmatmul.mubr.msk.f32.vlgmr.msra.gmra.mxu1 %vm299_vm0, %v40_v34 }
 0x10f   :  { %3563 = vmatprep.subr.mxu0 %v3603_v0  ;;  %3582 = vmatprep.subr.mxu1 %v3603_v0 }
 0x110   :  { %3564 = vmatpush3.msra.mxu0 %v290_v35  ;;  %3583 = vmatpush3.msra.mxu1 %v298_v36 }
 0x111   :  { %3565 = vmatprep.subr.mxu0 %v3603_v0  ;;  %3584 = vmatprep.subr.mxu1 %v3603_v0 }
 0x112   :  { %3566 = vmatpush3.msra.mxu0 %v289_v37  ;;  %3585 = vmatpush3.msra.mxu1 %v297_v38 }
 0x113   :  { %3567 = vmatprep.subr.mxu0 %v3603_v0  ;;  %3586 = vmatprep.subr.mxu1 %v3603_v0 }
 0x114   :  { %3568 = vmatpush3.msra.mxu0 %v288_v39  ;;  %3587 = vmatpush3.msra.mxu1 %v296_v40 }
 0x115   :  { %3569 = vmatprep.subr.mxu0 %v3603_v0  ;;  %3588 = vmatprep.subr.mxu1 %v3603_v0 }
 0x116   :  { %3570 = vmatpush3.msra.mxu0 %v287_v41  ;;  %3589 = vmatpush3.msra.mxu1 %v295_v42 }
 0x117   :  { %3571 = vmatprep.subr.mxu0 %v3603_v0  ;;  %3590 = vmatprep.subr.mxu1 %v3603_v0 }
 0x118   :  { %3572 = vmatpush3.msra.mxu0 %v286_v43  ;;  %3591 = vmatpush3.msra.mxu1 %v294_v44 }
 0x119   :  { %3573 = vmatprep.subr.mxu0 %v3603_v0  ;;  %3592 = vmatprep.subr.mxu1 %v3603_v0 }
 0x11a   :  { %3574 = vmatpush3.msra.mxu0 %v285_v45  ;;  %3593 = vmatpush3.msra.mxu1 %v293_v46  ;;  %v953_v49 = vpop.f32.mrf.mxu0  ;;  %v1026_v50 = vpop.f32.mrf.mxu1 }
 0x11b   :  { %3575 = vmatprep.subr.mxu0 %v3603_v0  ;;  %3594 = vmatprep.subr.mxu1 %v3603_v0  ;;  %2645 = vst.msk [vmem:[%s4966_s2 + $0x10] sm:$0x3] %vm2636_vm2, %v953_v49  ;;  %2646 = vst.msk [vmem:[%s4966_s2 + $0x12] sm:$0x3] %vm2636_vm2, %v1026_v50 }
 0x11c   :  { %3576 = vmatpush3.msra.mxu0 %v284_v47  ;;  %3595 = vmatpush3.msra.mxu1 %v292_v48  ;;  %v3163_v53 = vpop.f32.mrf.mxu0  ;;  %v3182_v54 = vpop.f32.mrf.mxu1 }
 0x11d   :  { %3577 = vmatprep.subr.mxu0 %v3603_v0  ;;  %3596 = vmatprep.subr.mxu1 %v3603_v0 }
 0x11e   :  { %3578 = vmatpush3.msra.mxu0 %v283_v51  ;;  %3579 = vmatprep.mubr.msk.f32.mxu0 %vm3604_vm1, %v3603_v0 }
 0x11f   :  { %3597 = vmatpush3.msra.mxu1 %v291_v52  ;;  %3598 = vmatprep.mubr.msk.f32.mxu1 %vm3604_vm1, %v3603_v0 }
 0x120   :  { %3580 = vmatmul.mubr.msk.f32.vlgmr.msra.gmra.mxu0 %vm299_vm0, %v41_v55  ;;  %3599 = vmatmul.mubr.msk.f32.vlgmr.msra.gmra.mxu1 %vm299_vm0, %v42_v56 }
 0x12c   :  { %v1099_v57 = vpop.f32.mrf.mxu0  ;;  %v1172_v58 = vpop.f32.mrf.mxu1 }
 0x12d   :  { %2647 = vst.msk [vmem:[%s4966_s2 + $0x14] sm:$0x3] %vm2636_vm2, %v1099_v57  ;;  %2648 = vst.msk [vmem:[%s4966_s2 + $0x16] sm:$0x3] %vm2636_vm2, %v1172_v58 }
 0x12e   :  { %v3201_v59 = vpop.f32.mrf.mxu0  ;;  %v3220_v60 = vpop.f32.mrf.mxu1 }
 0x13e   :  { %v1245_v61 = vpop.f32.mrf.mxu0  ;;  %v1318_v0 = vpop.f32.mrf.mxu1 }
 0x13f   :  { %2649 = vst.msk [vmem:[%s4966_s2 + $0x18] sm:$0x3] %vm2636_vm2, %v1245_v61  ;;  %2650 = vst.msk [vmem:[%s4966_s2 + $0x1a] sm:$0x3] %vm2636_vm2, %v1318_v0 }
 0x140   :  { %v3239_v62 = vpop.f32.mrf.mxu0  ;;  %v3258_v63 = vpop.f32.mrf.mxu1 }
 0x150   :  { %v1391_v1 = vpop.f32.mrf.mxu0  ;;  %v1464_v2 = vpop.f32.mrf.mxu1 }
 0x151   :  { %2651 = vst.msk [vmem:[%s4966_s2 + $0x1c] sm:$0x3] %vm2636_vm2, %v1391_v1  ;;  %2652 = vst.msk [vmem:[%s4966_s2 + $0x1e] sm:$0x3] %vm2636_vm2, %v1464_v2 }
 0x152   :  { %v3277_v3 = vpop.f32.mrf.mxu0  ;;  %v3296_v4 = vpop.f32.mrf.mxu1 }
 0x162   :  { %v1537_v5 = vpop.f32.mrf.mxu0  ;;  %v1610_v6 = vpop.f32.mrf.mxu1 }
 0x163   :  { %2653 = vst.msk [vmem:[%s4966_s2 + $0x20] sm:$0x3] %vm2636_vm2, %v1537_v5  ;;  %2654 = vst.msk [vmem:[%s4966_s2 + $0x22] sm:$0x3] %vm2636_vm2, %v1610_v6 }
 0x164   :  { %v3315_v7 = vpop.f32.mrf.mxu0  ;;  %v3334_v8 = vpop.f32.mrf.mxu1 }
 0x174   :  { %v1683_v9 = vpop.f32.mrf.mxu0  ;;  %v1756_v10 = vpop.f32.mrf.mxu1 }
 0x175   :  { %2655 = vst.msk [vmem:[%s4966_s2 + $0x24] sm:$0x3] %vm2636_vm2, %v1683_v9  ;;  %2656 = vst.msk [vmem:[%s4966_s2 + $0x26] sm:$0x3] %vm2636_vm2, %v1756_v10 }
 0x176   :  { %v3353_v11 = vpop.f32.mrf.mxu0  ;;  %v3372_v12 = vpop.f32.mrf.mxu1 }
 0x186   :  { %v1829_v13 = vpop.f32.mrf.mxu0  ;;  %v1902_v14 = vpop.f32.mrf.mxu1 }
 0x187   :  { %2657 = vst.msk [vmem:[%s4966_s2 + $0x28] sm:$0x3] %vm2636_vm2, %v1829_v13  ;;  %2658 = vst.msk [vmem:[%s4966_s2 + $0x2a] sm:$0x3] %vm2636_vm2, %v1902_v14 }
 0x188   :  { %v3391_v15 = vpop.f32.mrf.mxu0  ;;  %v3410_v16 = vpop.f32.mrf.mxu1 }
 0x198   :  { %v1975_v17 = vpop.f32.mrf.mxu0  ;;  %v2048_v18 = vpop.f32.mrf.mxu1 }
 0x199   :  { %2659 = vst.msk [vmem:[%s4966_s2 + $0x2c] sm:$0x3] %vm2636_vm2, %v1975_v17  ;;  %2660 = vst.msk [vmem:[%s4966_s2 + $0x2e] sm:$0x3] %vm2636_vm2, %v2048_v18 }
 0x19a   :  { %v3429_v19 = vpop.f32.mrf.mxu0  ;;  %v3448_v20 = vpop.f32.mrf.mxu1 }
 0x1aa   :  { %v2121_v21 = vpop.f32.mrf.mxu0  ;;  %v2194_v22 = vpop.f32.mrf.mxu1 }
 0x1ab   :  { %2661 = vst.msk [vmem:[%s4966_s2 + $0x30] sm:$0x3] %vm2636_vm2, %v2121_v21  ;;  %2662 = vst.msk [vmem:[%s4966_s2 + $0x32] sm:$0x3] %vm2636_vm2, %v2194_v22 }
 0x1ac   :  { %v3467_v23 = vpop.f32.mrf.mxu0  ;;  %v3486_v24 = vpop.f32.mrf.mxu1 }
 0x1bc   :  { %v2267_v25 = vpop.f32.mrf.mxu0  ;;  %v2340_v26 = vpop.f32.mrf.mxu1 }
 0x1bd   :  { %2663 = vst.msk [vmem:[%s4966_s2 + $0x34] sm:$0x3] %vm2636_vm2, %v2267_v25  ;;  %2664 = vst.msk [vmem:[%s4966_s2 + $0x36] sm:$0x3] %vm2636_vm2, %v2340_v26 }
 0x1be   :  { %v3505_v27 = vpop.f32.mrf.mxu0  ;;  %v3524_v28 = vpop.f32.mrf.mxu1 }
 0x1ce   :  { %v2413_v29 = vpop.f32.mrf.mxu0  ;;  %v2486_v30 = vpop.f32.mrf.mxu1 }
 0x1cf   :  { %2665 = vst.msk [vmem:[%s4966_s2 + $0x38] sm:$0x3] %vm2636_vm2, %v2413_v29  ;;  %2666 = vst.msk [vmem:[%s4966_s2 + $0x3a] sm:$0x3] %vm2636_vm2, %v2486_v30 }
 0x1d0   :  { %v3543_v31 = vpop.f32.mrf.mxu0  ;;  %v3562_v32 = vpop.f32.mrf.mxu1 }
 0x1e0   :  { %v2559_v33 = vpop.f32.mrf.mxu0  ;;  %v2632_v34 = vpop.f32.mrf.mxu1 }
 0x1e1   :  { %2667 = vst.msk [vmem:[%s4966_s2 + $0x3c] sm:$0x3] %vm2636_vm2, %v2559_v33  ;;  %2668 = vst.msk [vmem:[%s4966_s2 + $0x3e] sm:$0x3] %vm2636_vm2, %v2632_v34 }
 0x1e2   :  { %v3581_v35 = vpop.f32.mrf.mxu0  ;;  %v3600_v36 = vpop.f32.mrf.mxu1 }

// kernel: fno_forward.8
= control target key start
LH: loop header
LB: loop body
LE: loop exit
PB: predicated region body
PF: predicated region fallthrough
CT: control target
= control target key end

     0   :  { %vm91_vm0 = vcmask 261120   ;;  %s5198_s2 = inlined_call_operand.vmem [shape: f32[32,32], index: 2, kind: input, shape index: {}]   ;;  %s5199_s0 = inlined_call_operand.vmem [shape: f32[512,32], index: 0, kind: input, shape index: {}]   ;;  %s5200_s1 = inlined_call_operand.vmem [shape: f32[512,32], index: 1, kind: input, shape index: {}]   ;;  %s5201_s3 = inlined_call_operand.vmem [shape: f32[1,32], index: 3, kind: input, shape index: {}]   ;;  %s5202_s4 = inlined_call_operand.vmem [shape: f32[1,32], index: 4, kind: input, shape index: {}]   ;;  %s5203_s5 = inlined_call_operand.vmem [shape: f32[1,32], index: 5, kind: input, shape index: {}]   ;;  %s5204_s6 = inlined_call_operand.vmem [shape: f32[512,32], index: 6, kind: output, shape index: {}]  }
   0x1   :  { %v90_v0 = vld [vmem:[%s5198_s2 + $0x18] sm:$0xff]  ;;  %v89_v1 = vld [vmem:[%s5198_s2 + $0x10] sm:$0xff]  ;;  %v88_v2 = vld [vmem:[%s5198_s2 + $0x8] sm:$0xff] }
   0x2   :  { %2622 = vmatprep.subr.mxu0 %v90_v0  ;;  %2726 = vmatprep.subr.mxu1 %v90_v0  ;;  %v87_v3 = vld [vmem:[%s5198_s2] sm:$0xff]  ;;  %v24_v6 = vld [vmem:[%s5199_s0 + $0x8] sm:$0xff]  ;;  %v25_v8 = vld [vmem:[%s5199_s0 + $0x10] sm:$0xff] }
   0x3   :  { %2623 = vmatpush3.msra.mxu0 %v90_v0  ;;  %2730 = vmatpush3.msra.mxu1 %v90_v0  ;;  %v23_v4 = vld [vmem:[%s5199_s0] sm:$0xff]  ;;  %v56_v7 = vld [vmem:[%s5199_s0 + $0x108] sm:$0xff]  ;;  %v57_v9 = vld [vmem:[%s5199_s0 + $0x110] sm:$0xff] }
   0x4   :  { %2624 = vmatprep.subr.mxu0 %v89_v1  ;;  %2727 = vmatprep.subr.mxu1 %v89_v1  ;;  %v55_v5 = vld [vmem:[%s5199_s0 + $0x100] sm:$0xff]  ;;  %v26_v10 = vld [vmem:[%s5199_s0 + $0x18] sm:$0xff]  ;;  %v28_v14 = vld [vmem:[%s5199_s0 + $0x28] sm:$0xff] }
   0x5   :  { %2625 = vmatpush3.msra.mxu0 %v89_v1  ;;  %2731 = vmatpush3.msra.mxu1 %v89_v1  ;;  %v58_v11 = vld [vmem:[%s5199_s0 + $0x118] sm:$0xff]  ;;  %v27_v12 = vld [vmem:[%s5199_s0 + $0x20] sm:$0xff]  ;;  %v60_v15 = vld [vmem:[%s5199_s0 + $0x128] sm:$0xff] }
   0x6   :  { %2626 = vmatprep.subr.mxu0 %v88_v2  ;;  %2728 = vmatprep.subr.mxu1 %v88_v2  ;;  %v59_v13 = vld [vmem:[%s5199_s0 + $0x120] sm:$0xff]  ;;  %v29_v16 = vld [vmem:[%s5199_s0 + $0x30] sm:$0xff]  ;;  %v30_v18 = vld [vmem:[%s5199_s0 + $0x38] sm:$0xff] }
   0x7   :  { %2627 = vmatpush3.msra.mxu0 %v88_v2  ;;  %2732 = vmatpush3.msra.mxu1 %v88_v2  ;;  %v61_v17 = vld [vmem:[%s5199_s0 + $0x130] sm:$0xff]  ;;  %v62_v19 = vld [vmem:[%s5199_s0 + $0x138] sm:$0xff]  ;;  %v31_v20 = vld [vmem:[%s5199_s0 + $0x40] sm:$0xff] }
   0x8   :  { %2628 = vmatprep.subr.mxu0 %v87_v3  ;;  %2729 = vmatprep.subr.mxu1 %v87_v3  ;;  %v63_v21 = vld [vmem:[%s5199_s0 + $0x140] sm:$0xff]  ;;  %v32_v22 = vld [vmem:[%s5199_s0 + $0x48] sm:$0xff]  ;;  %v33_v24 = vld [vmem:[%s5199_s0 + $0x50] sm:$0xff] }
   0x9   :  { %2629 = vmatpush3.msra.mxu0 %v87_v3  ;;  %2733 = vmatpush3.msra.mxu1 %v87_v3  ;;  %v64_v23 = vld [vmem:[%s5199_s0 + $0x148] sm:$0xff]  ;;  %v65_v25 = vld [vmem:[%s5199_s0 + $0x150] sm:$0xff]  ;;  %v34_v26 = vld [vmem:[%s5199_s0 + $0x58] sm:$0xff] }
   0xa   :  { %2630 = vmatprep.mubr.msk.f32.mxu0 %vm91_vm0, %v23_v4  ;;  %2678 = vmatprep.mubr.msk.f32.mxu1 %vm91_vm0, %v55_v5  ;;  %v66_v27 = vld [vmem:[%s5199_s0 + $0x158] sm:$0xff]  ;;  %v35_v28 = vld [vmem:[%s5199_s0 + $0x60] sm:$0xff]  ;;  %v36_v30 = vld [vmem:[%s5199_s0 + $0x68] sm:$0xff] }
   0xb   :  { %2631 = vmatmul.mubr.msk.f32.vlgmr.msra.gmra.mxu0 %vm91_vm0, %v24_v6  ;;  %2679 = vmatmul.mubr.msk.f32.vlgmr.msra.gmra.mxu1 %vm91_vm0, %v56_v7  ;;  %v67_v29 = vld [vmem:[%s5199_s0 + $0x160] sm:$0xff]  ;;  %v68_v31 = vld [vmem:[%s5199_s0 + $0x168] sm:$0xff]  ;;  %v37_v32 = vld [vmem:[%s5199_s0 + $0x70] sm:$0xff] }
   0xc   :  { %2633 = vmatprep.mubr.msk.f32.mxu0 %vm91_vm0, %v25_v8  ;;  %2681 = vmatprep.mubr.msk.f32.mxu1 %vm91_vm0, %v57_v9  ;;  %v69_v33 = vld [vmem:[%s5199_s0 + $0x170] sm:$0xff]  ;;  %v38_v34 = vld [vmem:[%s5199_s0 + $0x78] sm:$0xff]  ;;  %v39_v36 = vld [vmem:[%s5199_s0 + $0x80] sm:$0xff] }
   0xd   :  { %v70_v35 = vld [vmem:[%s5199_s0 + $0x178] sm:$0xff]  ;;  %v71_v37 = vld [vmem:[%s5199_s0 + $0x180] sm:$0xff]  ;;  %v40_v38 = vld [vmem:[%s5199_s0 + $0x88] sm:$0xff] }
   0xe   :  { %v72_v39 = vld [vmem:[%s5199_s0 + $0x188] sm:$0xff]  ;;  %v41_v40 = vld [vmem:[%s5199_s0 + $0x90] sm:$0xff]  ;;  %v42_v42 = vld [vmem:[%s5199_s0 + $0x98] sm:$0xff] }
   0xf   :  { %2634 = vmatmul.mubr.msk.f32.gmra.mxu0 %vm91_vm0, %v26_v10  ;;  %2682 = vmatmul.mubr.msk.f32.gmra.mxu1 %vm91_vm0, %v58_v11  ;;  %v73_v41 = vld [vmem:[%s5199_s0 + $0x190] sm:$0xff]  ;;  %v74_v43 = vld [vmem:[%s5199_s0 + $0x198] sm:$0xff]  ;;  %v43_v44 = vld [vmem:[%s5199_s0 + $0xa0] sm:$0xff] }
  0x10   :  { %2636 = vmatprep.mubr.msk.f32.mxu0 %vm91_vm0, %v27_v12  ;;  %2684 = vmatprep.mubr.msk.f32.mxu1 %vm91_vm0, %v59_v13  ;;  %v75_v45 = vld [vmem:[%s5199_s0 + $0x1a0] sm:$0xff]  ;;  %v44_v46 = vld [vmem:[%s5199_s0 + $0xa8] sm:$0xff]  ;;  %v45_v48 = vld [vmem:[%s5199_s0 + $0xb0] sm:$0xff] }
  0x11   :  { %v76_v47 = vld [vmem:[%s5199_s0 + $0x1a8] sm:$0xff]  ;;  %v77_v49 = vld [vmem:[%s5199_s0 + $0x1b0] sm:$0xff]  ;;  %v46_v50 = vld [vmem:[%s5199_s0 + $0xb8] sm:$0xff] }
  0x12   :  { %v78_v51 = vld [vmem:[%s5199_s0 + $0x1b8] sm:$0xff]  ;;  %v47_v52 = vld [vmem:[%s5199_s0 + $0xc0] sm:$0xff]  ;;  %v48_v54 = vld [vmem:[%s5199_s0 + $0xc8] sm:$0xff] }
  0x13   :  { %2637 = vmatmul.mubr.msk.f32.gmra.mxu0 %vm91_vm0, %v28_v14  ;;  %2685 = vmatmul.mubr.msk.f32.gmra.mxu1 %vm91_vm0, %v60_v15  ;;  %v79_v53 = vld [vmem:[%s5199_s0 + $0x1c0] sm:$0xff]  ;;  %v80_v55 = vld [vmem:[%s5199_s0 + $0x1c8] sm:$0xff]  ;;  %v49_v56 = vld [vmem:[%s5199_s0 + $0xd0] sm:$0xff] }
  0x14   :  { %2639 = vmatprep.mubr.msk.f32.mxu0 %vm91_vm0, %v29_v16  ;;  %2687 = vmatprep.mubr.msk.f32.mxu1 %vm91_vm0, %v61_v17  ;;  %v81_v57 = vld [vmem:[%s5199_s0 + $0x1d0] sm:$0xff]  ;;  %v50_v58 = vld [vmem:[%s5199_s0 + $0xd8] sm:$0xff]  ;;  %v51_v60 = vld [vmem:[%s5199_s0 + $0xe0] sm:$0xff] }
  0x15   :  { %v82_v59 = vld [vmem:[%s5199_s0 + $0x1d8] sm:$0xff]  ;;  %v83_v61 = vld [vmem:[%s5199_s0 + $0x1e0] sm:$0xff]  ;;  %v52_v62 = vld [vmem:[%s5199_s0 + $0xe8] sm:$0xff] }
  0x16   :  { %v84_v63 = vld [vmem:[%s5199_s0 + $0x1e8] sm:$0xff]  ;;  %v53_v0 = vld [vmem:[%s5199_s0 + $0xf0] sm:$0xff]  ;;  %v54_v2 = vld [vmem:[%s5199_s0 + $0xf8] sm:$0xff] }
  0x17   :  { %2640 = vmatmul.mubr.msk.f32.gmra.mxu0 %vm91_vm0, %v30_v18  ;;  %2688 = vmatmul.mubr.msk.f32.gmra.mxu1 %vm91_vm0, %v62_v19  ;;  %v85_v1 = vld [vmem:[%s5199_s0 + $0x1f0] sm:$0xff]  ;;  %v86_v3 = vld [vmem:[%s5199_s0 + $0x1f8] sm:$0xff]  ;;  %v670_v4 = vld [vmem:[%s5200_s1 + $0x8] sm:$0xff] }
  0x18   :  { %2642 = vmatprep.mubr.msk.f32.mxu0 %vm91_vm0, %v31_v20  ;;  %2690 = vmatprep.mubr.msk.f32.mxu1 %vm91_vm0, %v63_v21  ;;  %v702_v5 = vld [vmem:[%s5200_s1 + $0x108] sm:$0xff]  ;;  %v669_v8 = vld [vmem:[%s5200_s1] sm:$0xff]  ;;  %v672_v15 = vld [vmem:[%s5200_s1 + $0x18] sm:$0xff] }
  0x19   :  { %v3309_v9 = vld [vmem:[%s5201_s3] ss:$0 sm:$0xff]  ;;  %v704_v16 = vld [vmem:[%s5200_s1 + $0x118] sm:$0xff] }
  0x1a   :  { %v701_v12 = vld [vmem:[%s5200_s1 + $0x100] sm:$0xff] }
  0x1b   :  { %2643 = vmatmul.mubr.msk.f32.gmra.mxu0 %vm91_vm0, %v32_v22  ;;  %2691 = vmatmul.mubr.msk.f32.gmra.mxu1 %vm91_vm0, %v64_v23 }
  0x1c   :  { %2645 = vmatprep.mubr.msk.f32.mxu0 %vm91_vm0, %v33_v24  ;;  %2693 = vmatprep.mubr.msk.f32.mxu1 %vm91_vm0, %v65_v25 }
  0x1f   :  { %2646 = vmatmul.mubr.msk.f32.gmra.mxu0 %vm91_vm0, %v34_v26  ;;  %2694 = vmatmul.mubr.msk.f32.gmra.mxu1 %vm91_vm0, %v66_v27 }
  0x20   :  { %2648 = vmatprep.mubr.msk.f32.mxu0 %vm91_vm0, %v35_v28  ;;  %2696 = vmatprep.mubr.msk.f32.mxu1 %vm91_vm0, %v67_v29  ;;  %v671_v28 = vld [vmem:[%s5200_s1 + $0x10] sm:$0xff] }
  0x23   :  { %2649 = vmatmul.mubr.msk.f32.gmra.mxu0 %vm91_vm0, %v36_v30  ;;  %2697 = vmatmul.mubr.msk.f32.gmra.mxu1 %vm91_vm0, %v68_v31  ;;  %v703_v30 = vld [vmem:[%s5200_s1 + $0x110] sm:$0xff] }
  0x24   :  { %2651 = vmatprep.mubr.msk.f32.mxu0 %vm91_vm0, %v37_v32  ;;  %2699 = vmatprep.mubr.msk.f32.mxu1 %vm91_vm0, %v69_v33 }
  0x27   :  { %2652 = vmatmul.mubr.msk.f32.gmra.mxu0 %vm91_vm0, %v38_v34  ;;  %2700 = vmatmul.mubr.msk.f32.gmra.mxu1 %vm91_vm0, %v70_v35  ;;  %v674_v34 = vld [vmem:[%s5200_s1 + $0x28] sm:$0xff] }
  0x28   :  { %2654 = vmatprep.mubr.msk.f32.mxu0 %vm91_vm0, %v39_v36  ;;  %2702 = vmatprep.mubr.msk.f32.mxu1 %vm91_vm0, %v71_v37  ;;  %v673_v37 = vld [vmem:[%s5200_s1 + $0x20] sm:$0xff] }
  0x2b   :  { %2655 = vmatmul.mubr.msk.f32.gmra.mxu0 %vm91_vm0, %v40_v38  ;;  %2703 = vmatmul.mubr.msk.f32.gmra.mxu1 %vm91_vm0, %v72_v39 }
  0x2c   :  { %2657 = vmatprep.mubr.msk.f32.mxu0 %vm91_vm0, %v41_v40  ;;  %2705 = vmatprep.mubr.msk.f32.mxu1 %vm91_vm0, %v73_v41 }
  0x2f   :  { %2658 = vmatmul.mubr.msk.f32.gmra.mxu0 %vm91_vm0, %v42_v42  ;;  %2706 = vmatmul.mubr.msk.f32.gmra.mxu1 %vm91_vm0, %v74_v43 }
  0x30   :  { %2660 = vmatprep.mubr.msk.f32.mxu0 %vm91_vm0, %v43_v44  ;;  %2708 = vmatprep.mubr.msk.f32.mxu1 %vm91_vm0, %v75_v45 }
  0x33   :  { %2661 = vmatmul.mubr.msk.f32.gmra.mxu0 %vm91_vm0, %v44_v46  ;;  %2709 = vmatmul.mubr.msk.f32.gmra.mxu1 %vm91_vm0, %v76_v47  ;;  %v706_v47 = vld [vmem:[%s5200_s1 + $0x128] sm:$0xff] }
  0x34   :  { %2663 = vmatprep.mubr.msk.f32.mxu0 %vm91_vm0, %v45_v48  ;;  %2711 = vmatprep.mubr.msk.f32.mxu1 %vm91_vm0, %v77_v49  ;;  %v705_v49 = vld [vmem:[%s5200_s1 + $0x120] sm:$0xff] }
  0x37   :  { %2664 = vmatmul.mubr.msk.f32.gmra.mxu0 %vm91_vm0, %v46_v50  ;;  %2712 = vmatmul.mubr.msk.f32.gmra.mxu1 %vm91_vm0, %v78_v51 }
  0x38   :  { %2666 = vmatprep.mubr.msk.f32.mxu0 %vm91_vm0, %v47_v52  ;;  %2714 = vmatprep.mubr.msk.f32.mxu1 %vm91_vm0, %v79_v53 }
  0x3b   :  { %2667 = vmatmul.mubr.msk.f32.gmra.mxu0 %vm91_vm0, %v48_v54  ;;  %2715 = vmatmul.mubr.msk.f32.gmra.mxu1 %vm91_vm0, %v80_v55 }
  0x3c   :  { %2669 = vmatprep.mubr.msk.f32.mxu0 %vm91_vm0, %v49_v56  ;;  %2717 = vmatprep.mubr.msk.f32.mxu1 %vm91_vm0, %v81_v57 }
  0x3f   :  { %2670 = vmatmul.mubr.msk.f32.gmra.mxu0 %vm91_vm0, %v50_v58  ;;  %2718 = vmatmul.mubr.msk.f32.gmra.mxu1 %vm91_vm0, %v82_v59  ;;  %v676_v58 = vld [vmem:[%s5200_s1 + $0x38] sm:$0xff] }
  0x40   :  { %2672 = vmatprep.mubr.msk.f32.mxu0 %vm91_vm0, %v51_v60  ;;  %2720 = vmatprep.mubr.msk.f32.mxu1 %vm91_vm0, %v83_v61  ;;  %v675_v60 = vld [vmem:[%s5200_s1 + $0x30] sm:$0xff] }
  0x43   :  { %2673 = vmatmul.mubr.msk.f32.gmra.mxu0 %vm91_vm0, %v52_v62  ;;  %2721 = vmatmul.mubr.msk.f32.gmra.mxu1 %vm91_vm0, %v84_v63 }
  0x44   :  { %2675 = vmatprep.mubr.msk.f32.mxu0 %vm91_vm0, %v53_v0  ;;  %2723 = vmatprep.mubr.msk.f32.mxu1 %vm91_vm0, %v85_v1 }
  0x47   :  { %2676 = vmatmul.mubr.msk.f32.gmra.mxu0 %vm91_vm0, %v54_v2  ;;  %2724 = vmatmul.mubr.msk.f32.gmra.mxu1 %vm91_vm0, %v86_v3 }
  0xcb   :  { %v2632_v6 = vpop.f32.mrf.mxu0  ;;  %v2680_v7 = vpop.f32.mrf.mxu1 }
  0xcc   :  { %v734_v10 = vadd.f32 %v2632_v6, %v670_v4  ;;  %v766_v11 = vadd.f32 %v2680_v7, %v702_v5  ;;  %v708_v5 = vld [vmem:[%s5200_s1 + $0x138] sm:$0xff] }
  0xcd   :  { %v350_v13 = vpop.f32.mrf.mxu0  ;;  %v510_v14 = vpop.f32.mrf.mxu1 }
  0xce   :  { %v733_v17 = vadd.f32 %v669_v8, %v350_v13  ;;  %v3321_v18 = vadd.f32 %v3309_v9, %v766_v11  ;;  %v3324_v19 = vadd.f32 %v3309_v9, %v734_v10  ;;  %v765_v20 = vadd.f32 %v701_v12, %v510_v14  ;;  %v707_v8 = vld [vmem:[%s5200_s1 + $0x130] sm:$0xff] }
  0xcf   :  { %v2635_v21 = vpop.f32.mrf.mxu0  ;;  %v2683_v22 = vpop.f32.mrf.mxu1 }
  0xd0   :  { %v736_v23 = vadd.f32 %v2635_v21, %v672_v15  ;;  %v967_v24 = vsel %vm91_vm0, %v3321_v18, 0.0  ;;  %v768_v25 = vadd.f32 %v2683_v22, %v704_v16  ;;  %v871_v26 = vsel %vm91_vm0, %v3324_v19, 0.0  ;;  %v677_v21 = vld [vmem:[%s5200_s1 + $0x40] sm:$0xff] }
  0xd1   :  { %968 = vadd.xlane.f32.xlu1 %v967_v24  ;;  %872 = vadd.xlane.f32.xlu0 %v871_v26  ;;  %v360_v27 = vpop.f32.mrf.mxu0  ;;  %v520_v29 = vpop.f32.mrf.mxu1  ;;  %v3337_v31 = vadd.f32 %v3309_v9, %v733_v17  ;;  %v3349_v35 = vadd.f32 %v3309_v9, %v765_v20  ;;  %v678_v17 = vld [vmem:[%s5200_s1 + $0x48] sm:$0xff] }
  0xd2   :  { %v3340_v32 = vadd.f32 %v3309_v9, %v736_v23  ;;  %v3343_v33 = vadd.f32 %v3309_v9, %v768_v25  ;;  %v735_v39 = vadd.f32 %v671_v28, %v360_v27  ;;  %v767_v40 = vadd.f32 %v703_v30, %v520_v29  ;;  %v710_v28 = vld [vmem:[%s5200_s1 + $0x148] sm:$0xff] }
  0xd3   :  { %v2638_v36 = vpop.f32.mrf.mxu0  ;;  %v2686_v38 = vpop.f32.mrf.mxu1  ;;  %v868_v41 = vsel %vm91_vm0, %v3337_v31, 0.0  ;;  %v964_v51 = vsel %vm91_vm0, %v3349_v35, 0.0 }
  0xd4   :  { %v877_v42 = vsel %vm91_vm0, %v3340_v32, 0.0  ;;  %v738_v43 = vadd.f32 %v2638_v36, %v674_v34  ;;  %v973_v45 = vsel %vm91_vm0, %v3343_v33, 0.0  ;;  %v3369_v52 = vadd.f32 %v3309_v9, %v767_v40  ;;  %v709_v34 = vld [vmem:[%s5200_s1 + $0x140] sm:$0xff] }
  0xd5   :  { %869 = vadd.xlane.f32.xlu0 %v868_v41  ;;  %878 = vadd.xlane.f32.xlu1 %v877_v42  ;;  %v370_v44 = vpop.f32.mrf.mxu0  ;;  %v530_v48 = vpop.f32.mrf.mxu1  ;;  %v3372_v53 = vadd.f32 %v3309_v9, %v735_v39  ;;  %v770_v54 = vadd.f32 %v2686_v38, %v706_v47 }
  0xd6   :  { %v737_v46 = vadd.f32 %v673_v37, %v370_v44  ;;  %v3375_v55 = vadd.f32 %v3309_v9, %v738_v43  ;;  %v769_v56 = vadd.f32 %v705_v49, %v530_v48  ;;  %v970_v62 = vsel %vm91_vm0, %v3369_v52, 0.0  ;;  %v680_v43 = vld [vmem:[%s5200_s1 + $0x58] sm:$0xff] }
  0xd7   :  { %v2641_v50 = vpop.f32.mrf.mxu0  ;;  %v2689_v61 = vpop.f32.mrf.mxu1  ;;  %v874_v63 = vsel %vm91_vm0, %v3372_v53, 0.0  ;;  %v3393_v1 = vadd.f32 %v3309_v9, %v770_v54  ;;  %v712_v54 = vld [vmem:[%s5200_s1 + $0x158] sm:$0xff] }
  0xd8   :  { %v3378_v57 = vadd.f32 %v3309_v9, %v737_v46  ;;  %v883_v0 = vsel %vm91_vm0, %v3375_v55, 0.0  ;;  %v740_v3 = vadd.f32 %v2641_v50, %v676_v58  ;;  %v3401_v6 = vadd.f32 %v3309_v9, %v769_v56 }
  0xd9   :  { %965 = vadd.xlane.f32.xlu0 %v964_v51  ;;  %974 = vadd.xlane.f32.xlu1 %v973_v45  ;;  %v380_v59 = vpop.f32.mrf.mxu0  ;;  %v540_v7 = vpop.f32.mrf.mxu1  ;;  %v772_v11 = vadd.f32 %v2689_v61, %v708_v5  ;;  %v979_v12 = vsel %vm91_vm0, %v3393_v1, 0.0  ;;  %v679_v45 = vld [vmem:[%s5200_s1 + $0x50] sm:$0xff] }
  0xda   :  { %v880_v2 = vsel %vm91_vm0, %v3378_v57, 0.0  ;;  %v739_v4 = vadd.f32 %v675_v60, %v380_v59  ;;  %v976_v13 = vsel %vm91_vm0, %v3401_v6, 0.0  ;;  %v771_v14 = vadd.f32 %v707_v8, %v540_v7  ;;  %v711_v59 = vld [vmem:[%s5200_s1 + $0x150] sm:$0xff]  ;;  %v681_v7 = vld [vmem:[%s5200_s1 + $0x60] sm:$0xff] }
  0xdb   :  { %v2644_v10 = vpop.f32.mrf.mxu0  ;;  %v3411_v15 = vadd.f32 %v3309_v9, %v740_v3  ;;  %v2692_v22 = vpop.f32.mrf.mxu1  ;;  %v3423_v24 = vadd.f32 %v3309_v9, %v772_v11 }
  0xdc   :  { %v3414_v16 = vadd.f32 %v3309_v9, %v739_v4  ;;  %v742_v23 = vadd.f32 %v2644_v10, %v678_v17  ;;  %v3433_v29 = vadd.f32 %v3309_v9, %v771_v14  ;;  %v774_v37 = vadd.f32 %v2692_v22, %v710_v28  ;;  %v682_v4 = vld [vmem:[%s5200_s1 + $0x68] sm:$0xff]  ;;  %v713_v22 = vld [vmem:[%s5200_s1 + $0x160] sm:$0xff] }
  0xdd   :  { %971 = vadd.xlane.f32.xlu0 %v970_v62  ;;  %875 = vadd.xlane.f32.xlu1 %v874_v63  ;;  %v390_v20 = vpop.f32.mrf.mxu0  ;;  %v889_v25 = vsel %vm91_vm0, %v3411_v15, 0.0  ;;  %v550_v30 = vpop.f32.mrf.mxu1  ;;  %v985_v39 = vsel %vm91_vm0, %v3423_v24, 0.0  ;;  %v714_v17 = vld [vmem:[%s5200_s1 + $0x168] sm:$0xff] }
  0xde   :  { %v886_v26 = vsel %vm91_vm0, %v3414_v16, 0.0  ;;  %v741_v27 = vadd.f32 %v677_v21, %v390_v20  ;;  %v3439_v38 = vadd.f32 %v3309_v9, %v742_v23  ;;  %v982_v40 = vsel %vm91_vm0, %v3433_v29, 0.0 }
  0xdf   :  { %v2647_v36 = vpop.f32.mrf.mxu0  ;;  %v773_v41 = vadd.f32 %v709_v34, %v550_v30  ;;  %v2695_v46 = vpop.f32.mrf.mxu1  ;;  %v3457_v48 = vadd.f32 %v3309_v9, %v774_v37 }
  0xe0   :  { %v3446_v42 = vadd.f32 %v3309_v9, %v741_v27  ;;  %v895_v47 = vsel %vm91_vm0, %v3439_v38, 0.0  ;;  %v744_v50 = vadd.f32 %v2647_v36, %v680_v43  ;;  %v776_v61 = vadd.f32 %v2695_v46, %v712_v54  ;;  %v684_v36 = vld [vmem:[%s5200_s1 + $0x78] sm:$0xff] }
  0xe1   :  { %884 = vadd.xlane.f32.xlu1 %v883_v0  ;;  %881 = vadd.xlane.f32.xlu0 %v880_v2  ;;  %v400_v44 = vpop.f32.mrf.mxu0  ;;  %v3465_v56 = vadd.f32 %v3309_v9, %v773_v41  ;;  %v560_v58 = vpop.f32.mrf.mxu1  ;;  %v991_v62 = vsel %vm91_vm0, %v3457_v48, 0.0 }
  0xe2   :  { %v892_v49 = vsel %vm91_vm0, %v3446_v42, 0.0  ;;  %v743_v51 = vadd.f32 %v679_v45, %v400_v44  ;;  %v775_v0 = vadd.f32 %v711_v59, %v560_v58  ;;  %v3475_v2 = vadd.f32 %v3309_v9, %v744_v50 }
  0xe3   :  { %v2650_v60 = vpop.f32.mrf.mxu0  ;;  %v988_v63 = vsel %vm91_vm0, %v3465_v56, 0.0  ;;  %v2698_v8 = vpop.f32.mrf.mxu1  ;;  %v3487_v11 = vadd.f32 %v3309_v9, %v776_v61 }
  0xe4   :  { %v3478_v3 = vadd.f32 %v3309_v9, %v743_v51  ;;  %v746_v10 = vadd.f32 %v2650_v60, %v682_v4  ;;  %v3497_v20 = vadd.f32 %v3309_v9, %v775_v0  ;;  %v715_v51 = vld [vmem:[%s5200_s1 + $0x170] sm:$0xff]  ;;  %v686_v0 = vld [vmem:[%s5200_s1 + $0x88] sm:$0xff] }
  0xe5   :  { %980 = vadd.xlane.f32.xlu1 %v979_v12  ;;  %977 = vadd.xlane.f32.xlu0 %v976_v13  ;;  %v410_v5 = vpop.f32.mrf.mxu0  ;;  %v901_v12 = vsel %vm91_vm0, %v3475_v2, 0.0  ;;  %v570_v21 = vpop.f32.mrf.mxu1  ;;  %v997_v27 = vsel %vm91_vm0, %v3487_v11, 0.0 }
  0xe6   :  { %v898_v13 = vsel %vm91_vm0, %v3478_v3, 0.0  ;;  %v745_v14 = vadd.f32 %v681_v7, %v410_v5  ;;  %v994_v28 = vsel %vm91_vm0, %v3497_v20, 0.0  ;;  %v777_v30 = vadd.f32 %v713_v22, %v570_v21  ;;  %v685_v5 = vld [vmem:[%s5200_s1 + $0x80] sm:$0xff] }
  0xe7   :  { %v2653_v23 = vpop.f32.mrf.mxu0 }
  0xe8   :  { %v3510_v34 = vadd.f32 %v3309_v9, %v745_v14  ;;  %v748_v45 = vadd.f32 %v2653_v23, %v684_v36  ;;  %v717_v23 = vld [vmem:[%s5200_s1 + $0x180] sm:$0xff] }
  0xe9   :  { %890 = vadd.xlane.f32.xlu1 %v889_v25  ;;  %887 = vadd.xlane.f32.xlu0 %v886_v26  ;;  %v778_v25 = vadd.f32 %v2698_v8, %v714_v17  ;;  %v3503_v26 = vadd.f32 %v3309_v9, %v746_v10  ;;  %v420_v37 = vpop.f32.mrf.mxu0  ;;  %v718_v17 = vld [vmem:[%s5200_s1 + $0x188] sm:$0xff] }
  0xea   :  { %v904_v44 = vsel %vm91_vm0, %v3510_v34, 0.0 }
  0xeb   :  { %v907_v41 = vsel %vm91_vm0, %v3503_v26, 0.0  ;;  %v3521_v43 = vadd.f32 %v3309_v9, %v778_v25  ;;  %v2656_v54 = vpop.f32.mrf.mxu0 }
  0xec   :  { %v750_v8 = vadd.f32 %v2656_v54, %v686_v0 }
  0xed   :  { %986 = vadd.xlane.f32.xlu1 %v985_v39  ;;  %983 = vadd.xlane.f32.xlu0 %v982_v40  ;;  %v683_v39 = vld [vmem:[%s5200_s1 + $0x70] sm:$0xff]  ;;  %v2701_v40 = vpop.f32.mrf.mxu1  ;;  %v1003_v59 = vsel %vm91_vm0, %v3521_v43, 0.0  ;;  %v430_v4 = vpop.f32.mrf.mxu0 }
  0xee   :  { %v747_v46 = vadd.f32 %v683_v39, %v420_v37  ;;  %v749_v14 = vadd.f32 %v685_v5, %v430_v4 }
  0xef   :  { %v580_v50 = vpop.f32.mrf.mxu1  ;;  %v2659_v25 = vpop.f32.mrf.mxu0 }
  0xf0   :  { %v779_v61 = vadd.f32 %v715_v51, %v580_v50  ;;  %v3574_v39 = vadd.f32 %v3309_v9, %v749_v14  ;;  %v690_v14 = vld [vmem:[%s5200_s1 + $0xa8] sm:$0xff] }
  0xf1   :  { %896 = vadd.xlane.f32.xlu1 %v895_v47  ;;  %893 = vadd.xlane.f32.xlu0 %v892_v49  ;;  %v716_v47 = vld [vmem:[%s5200_s1 + $0x178] sm:$0xff]  ;;  %v3529_v49 = vadd.f32 %v3309_v9, %v777_v30  ;;  %v2704_v7 = vpop.f32.mrf.mxu1 }
  0xf2   :  { %v780_v58 = vadd.f32 %v2701_v40, %v716_v47  ;;  %v3561_v21 = vadd.f32 %v3309_v9, %v779_v61  ;;  %v688_v40 = vld [vmem:[%s5200_s1 + $0x98] sm:$0xff]  ;;  %v916_v50 = vsel %vm91_vm0, %v3574_v39, 0.0  ;;  %v719_v61 = vld [vmem:[%s5200_s1 + $0x190] sm:$0xff] }
  0xf3   :  { %v1000_v60 = vsel %vm91_vm0, %v3529_v49, 0.0  ;;  %v590_v22 = vpop.f32.mrf.mxu1  ;;  %v752_v51 = vadd.f32 %v2659_v25, %v688_v40  ;;  %v722_v40 = vld [vmem:[%s5200_s1 + $0x1a8] sm:$0xff] }
  0xf4   :  { %v3551_v10 = vadd.f32 %v3309_v9, %v780_v58  ;;  %v1006_v36 = vsel %vm91_vm0, %v3561_v21, 0.0  ;;  %v781_v37 = vadd.f32 %v717_v23, %v590_v22  ;;  %v720_v58 = vld [vmem:[%s5200_s1 + $0x198] sm:$0xff]  ;;  %v689_v22 = vld [vmem:[%s5200_s1 + $0xa0] sm:$0xff] }
  0xf5   :  { %992 = vadd.xlane.f32.xlu1 %v991_v62  ;;  %989 = vadd.xlane.f32.xlu0 %v988_v63  ;;  %v3539_v62 = vadd.f32 %v3309_v9, %v748_v45  ;;  %v3542_v63 = vadd.f32 %v3309_v9, %v747_v46  ;;  %v2707_v45 = vpop.f32.mrf.mxu1 }
  0xf6   :  { %v1009_v30 = vsel %vm91_vm0, %v3551_v10, 0.0  ;;  %v784_v4 = vadd.f32 %v2707_v45, %v720_v58  ;;  %v721_v45 = vld [vmem:[%s5200_s1 + $0x1a0] sm:$0xff] }
  0xf9   :  { %902 = vadd.xlane.f32.xlu1 %v901_v12  ;;  %899 = vadd.xlane.f32.xlu0 %v898_v13  ;;  %v913_v12 = vsel %vm91_vm0, %v3539_v62, 0.0  ;;  %v910_v13 = vsel %vm91_vm0, %v3542_v63, 0.0 }
  0xfd   :  { %998 = vadd.xlane.f32.xlu1 %v997_v27  ;;  %995 = vadd.xlane.f32.xlu0 %v994_v28  ;;  %v782_v27 = vadd.f32 %v2704_v7, %v718_v17  ;;  %v3567_v28 = vadd.f32 %v3309_v9, %v750_v8 }
  0xff   :  { %v919_v46 = vsel %vm91_vm0, %v3567_v28, 0.0  ;;  %v3585_v47 = vadd.f32 %v3309_v9, %v782_v27  ;;  %v3615_v27 = vadd.f32 %v3309_v9, %v784_v4 }
 0x101   :  { %908 = vadd.xlane.f32.xlu1 %v907_v41  ;;  %905 = vadd.xlane.f32.xlu0 %v904_v44  ;;  %v440_v41 = vpop.f32.mrf.mxu0  ;;  %v687_v44 = vld [vmem:[%s5200_s1 + $0x90] sm:$0xff]  ;;  %v1015_v5 = vsel %vm91_vm0, %v3585_v47, 0.0 }
 0x102   :  { %v751_v54 = vadd.f32 %v687_v44, %v440_v41 }
 0x103   :  { %v2662_v0 = vpop.f32.mrf.mxu0 }
 0x104   :  { %v754_v25 = vadd.f32 %v2662_v0, %v690_v14  ;;  %v692_v0 = vld [vmem:[%s5200_s1 + $0xb8] sm:$0xff] }
 0x105   :  { %1004 = vadd.xlane.f32.xlu1 %v1003_v59  ;;  %1001 = vadd.xlane.f32.xlu0 %v1000_v60  ;;  %v3593_v59 = vadd.f32 %v3309_v9, %v781_v37  ;;  %v600_v60 = vpop.f32.mrf.mxu1  ;;  %v450_v17 = vpop.f32.mrf.mxu0 }
 0x106   :  { %v783_v8 = vadd.f32 %v719_v61, %v600_v60  ;;  %v753_v37 = vadd.f32 %v689_v22, %v450_v17 }
 0x107   :  { %v1012_v7 = vsel %vm91_vm0, %v3593_v59, 0.0  ;;  %v2710_v23 = vpop.f32.mrf.mxu1 }
 0x108   :  { %v3625_v41 = vadd.f32 %v3309_v9, %v783_v8  ;;  %v3638_v61 = vadd.f32 %v3309_v9, %v753_v37  ;;  %v723_v37 = vld [vmem:[%s5200_s1 + $0x1b0] sm:$0xff] }
 0x109   :  { %914 = vadd.xlane.f32.xlu1 %v913_v12  ;;  %911 = vadd.xlane.f32.xlu0 %v910_v13  ;;  %v3603_v12 = vadd.f32 %v3309_v9, %v752_v51  ;;  %v3606_v13 = vadd.f32 %v3309_v9, %v751_v54  ;;  %v610_v44 = vpop.f32.mrf.mxu1  ;;  %v3631_v51 = vadd.f32 %v3309_v9, %v754_v25  ;;  %v1021_v54 = vsel %vm91_vm0, %v3615_v27, 0.0  ;;  %v724_v25 = vld [vmem:[%s5200_s1 + $0x1b8] sm:$0xff] }
 0x10a   :  { %v1018_v58 = vsel %vm91_vm0, %v3625_v41, 0.0  ;;  %v785_v60 = vadd.f32 %v721_v45, %v610_v44  ;;  %v928_v17 = vsel %vm91_vm0, %v3638_v61, 0.0 }
 0x10b   :  { %v931_v8 = vsel %vm91_vm0, %v3631_v51, 0.0 }
 0x10d   :  { %1010 = vadd.xlane.f32.xlu1 %v1009_v30  ;;  %1007 = vadd.xlane.f32.xlu0 %v1006_v36  ;;  %v925_v30 = vsel %vm91_vm0, %v3603_v12, 0.0  ;;  %v922_v36 = vsel %vm91_vm0, %v3606_v13, 0.0 }
 0x111   :  { %920 = vadd.xlane.f32.xlu1 %v919_v46  ;;  %917 = vadd.xlane.f32.xlu0 %v916_v50  ;;  %v2665_v46 = vpop.f32.mrf.mxu0  ;;  %v786_v50 = vadd.f32 %v2710_v23, %v722_v40 }
 0x112   :  { %v756_v22 = vadd.f32 %v2665_v46, %v692_v0 }
 0x113   :  { %v460_v4 = vpop.f32.mrf.mxu0  ;;  %v3649_v14 = vadd.f32 %v3309_v9, %v786_v50 }
 0x115   :  { %1016 = vadd.xlane.f32.xlu1 %v1015_v5  ;;  %1013 = vadd.xlane.f32.xlu0 %v1012_v7  ;;  %v691_v5 = vld [vmem:[%s5200_s1 + $0xb0] sm:$0xff]  ;;  %v2713_v7 = vpop.f32.mrf.mxu1  ;;  %v2668_v40 = vpop.f32.mrf.mxu0  ;;  %v1027_v45 = vsel %vm91_vm0, %v3649_v14, 0.0 }
 0x116   :  { %v755_v23 = vadd.f32 %v691_v5, %v460_v4  ;;  %v788_v44 = vadd.f32 %v2713_v7, %v724_v25  ;;  %v693_v4 = vld [vmem:[%s5200_s1 + $0xc0] sm:$0xff]  ;;  %v726_v25 = vld [vmem:[%s5200_s1 + $0x1c8] sm:$0xff] }
 0x117   :  { %v470_v0 = vpop.f32.mrf.mxu0 }
 0x119   :  { %926 = vadd.xlane.f32.xlu1 %v925_v30  ;;  %923 = vadd.xlane.f32.xlu0 %v922_v36  ;;  %v3657_v30 = vadd.f32 %v3309_v9, %v785_v60  ;;  %v620_v36 = vpop.f32.mrf.mxu1  ;;  %v694_v60 = vld [vmem:[%s5200_s1 + $0xc8] sm:$0xff] }
 0x11a   :  { %v787_v50 = vadd.f32 %v723_v37, %v620_v36  ;;  %v758_v7 = vadd.f32 %v2668_v40, %v694_v60  ;;  %v725_v40 = vld [vmem:[%s5200_s1 + $0x1c0] sm:$0xff] }
 0x11b   :  { %v1024_v46 = vsel %vm91_vm0, %v3657_v30, 0.0  ;;  %v2716_v5 = vpop.f32.mrf.mxu1 }
 0x11c   :  { %v3689_v36 = vadd.f32 %v3309_v9, %v787_v50 }
 0x11d   :  { %1022 = vadd.xlane.f32.xlu1 %v1021_v54  ;;  %1019 = vadd.xlane.f32.xlu0 %v1018_v58  ;;  %v3667_v54 = vadd.f32 %v3309_v9, %v756_v22  ;;  %v3670_v58 = vadd.f32 %v3309_v9, %v755_v23  ;;  %v757_v23 = vadd.f32 %v693_v4, %v470_v0  ;;  %v630_v37 = vpop.f32.mrf.mxu1 }
 0x11e   :  { %5253 = vst [vmem:[#allocation4_spill] sm:$0xff] %v3689_v36  ;;  %v1030_v0 = vsel %vm91_vm0, %v3689_v36, 0.0  ;;  %v789_v50 = vadd.f32 %v725_v40, %v630_v37  ;;  %v728_v36 = vld [vmem:[%s5200_s1 + $0x1d8] sm:$0xff] }
 0x11f   :  { %5251 = vst [vmem:[#allocation2_spill] sm:$0xff] %v3670_v58  ;;  %v934_v22 = vsel %vm91_vm0, %v3670_v58, 0.0  ;;  %v3702_v4 = vadd.f32 %v3309_v9, %v757_v23  ;;  %v696_v58 = vld [vmem:[%s5200_s1 + $0xd8] sm:$0xff] }
 0x121   :  { %932 = vadd.xlane.f32.xlu1 %v931_v8  ;;  %929 = vadd.xlane.f32.xlu0 %v928_v17  ;;  %v3679_v8 = vadd.f32 %v3309_v9, %v788_v44  ;;  %v937_v17 = vsel %vm91_vm0, %v3667_v54, 0.0  ;;  %v2671_v44 = vpop.f32.mrf.mxu0  ;;  %5255 = vst [vmem:[#allocation6_spill] sm:$0xff] %v3702_v4  ;;  %v940_v23 = vsel %vm91_vm0, %v3702_v4, 0.0  ;;  %v698_v4 = vld [vmem:[%s5200_s1 + $0xe8] sm:$0xff] }
 0x122   :  { %v760_v37 = vadd.f32 %v2671_v44, %v696_v58 }
 0x123   :  { %5252 = vst [vmem:[#allocation3_spill] sm:$0xff] %v3679_v8  ;;  %v1033_v60 = vsel %vm91_vm0, %v3679_v8, 0.0  ;;  %v3721_v8 = vadd.f32 %v3309_v9, %v789_v50 }
 0x125   :  { %1028 = vadd.xlane.f32.xlu1 %v1027_v45  ;;  %1025 = vadd.xlane.f32.xlu0 %v1024_v46  ;;  %v790_v45 = vadd.f32 %v2716_v5, %v726_v25  ;;  %v3695_v46 = vadd.f32 %v3309_v9, %v758_v7  ;;  %v695_v5 = vld [vmem:[%s5200_s1 + $0xd0] sm:$0xff]  ;;  %v2719_v7 = vpop.f32.mrf.mxu1  ;;  %5257 = vst [vmem:[#allocation8_spill] sm:$0xff] %v3721_v8  ;;  %v1036_v44 = vsel %vm91_vm0, %v3721_v8, 0.0  ;;  %v730_v8 = vld [vmem:[%s5200_s1 + $0x1e8] sm:$0xff] }
 0x127   :  { %5254 = vst [vmem:[#allocation5_spill] sm:$0xff] %v3695_v46  ;;  %v3713_v25 = vadd.f32 %v3309_v9, %v790_v45  ;;  %v792_v45 = vadd.f32 %v2719_v7, %v728_v36  ;;  %v697_v36 = vld [vmem:[%s5200_s1 + $0xe0] sm:$0xff] }
 0x129   :  { %938 = vadd.xlane.f32.xlu1 %v937_v17  ;;  %935 = vadd.xlane.f32.xlu0 %v934_v22  ;;  %v480_v17 = vpop.f32.mrf.mxu0  ;;  %v943_v22 = vsel %vm91_vm0, %v3695_v46, 0.0  ;;  %5256 = vst [vmem:[#allocation7_spill] sm:$0xff] %v3713_v25  ;;  %v1039_v58 = vsel %vm91_vm0, %v3713_v25, 0.0 }
 0x12a   :  { %v759_v40 = vadd.f32 %v695_v5, %v480_v17  ;;  %v3731_v5 = vadd.f32 %v3309_v9, %v760_v37 }
 0x12b   :  { %v2674_v46 = vpop.f32.mrf.mxu0 }
 0x12c   :  { %5258 = vst [vmem:[#allocation9_spill] sm:$0xff] %v3731_v5  ;;  %v3734_v50 = vadd.f32 %v3309_v9, %v759_v40  ;;  %v949_v37 = vsel %vm91_vm0, %v3731_v5, 0.0  ;;  %v700_v5 = vld [vmem:[%s5200_s1 + $0xf8] sm:$0xff] }
 0x12d   :  { %1034 = vadd.xlane.f32.xlu1 %v1033_v60  ;;  %1031 = vadd.xlane.f32.xlu0 %v1030_v0  ;;  %v640_v60 = vpop.f32.mrf.mxu1  ;;  %v727_v0 = vld [vmem:[%s5200_s1 + $0x1d0] sm:$0xff] }
 0x12e   :  { %v791_v17 = vadd.f32 %v727_v0, %v640_v60  ;;  %5259 = vst [vmem:[#allocation10_spill] sm:$0xff] %v3734_v50  ;;  %v3743_v60 = vadd.f32 %v3309_v9, %v792_v45  ;;  %v946_v40 = vsel %vm91_vm0, %v3734_v50, 0.0 }
 0x12f   :  { %v2722_v7 = vpop.f32.mrf.mxu1 }
 0x130   :  { %5260 = vst [vmem:[#allocation11_spill] sm:$0xff] %v3743_v60  ;;  %v3753_v25 = vadd.f32 %v3309_v9, %v791_v17  ;;  %v794_v45 = vadd.f32 %v2722_v7, %v730_v8  ;;  %v699_v8 = vld [vmem:[%s5200_s1 + $0xf0] sm:$0xff] }
 0x131   :  { %944 = vadd.xlane.f32.xlu1 %v943_v22  ;;  %941 = vadd.xlane.f32.xlu0 %v940_v23  ;;  %v490_v22 = vpop.f32.mrf.mxu0  ;;  %v762_v23 = vadd.f32 %v2674_v46, %v698_v4  ;;  %v729_v46 = vld [vmem:[%s5200_s1 + $0x1e0] sm:$0xff] }
 0x132   :  { %v761_v0 = vadd.f32 %v697_v36, %v490_v22  ;;  %5261 = vst [vmem:[#allocation12_spill] sm:$0xff] %v3753_v25  ;;  %v1045_v22 = vsel %vm91_vm0, %v3743_v60, 0.0  ;;  %v1042_v36 = vsel %vm91_vm0, %v3753_v25, 0.0  ;;  %v732_v25 = vld [vmem:[%s5200_s1 + $0x1f8] sm:$0xff] }
 0x133   :  { %v2677_v4 = vpop.f32.mrf.mxu0 }
 0x134   :  { %v3766_v50 = vadd.f32 %v3309_v9, %v761_v0 }
 0x135   :  { %1040 = vadd.xlane.f32.xlu1 %v1039_v58  ;;  %1037 = vadd.xlane.f32.xlu0 %v1036_v44  ;;  %v650_v58 = vpop.f32.mrf.mxu1  ;;  %v3759_v44 = vadd.f32 %v3309_v9, %v762_v23 }
 0x136   :  { %v793_v17 = vadd.f32 %v729_v46, %v650_v58  ;;  %5262 = vst [vmem:[#allocation13_spill] sm:$0xff] %v3766_v50  ;;  %v952_v0 = vsel %vm91_vm0, %v3766_v50, 0.0  ;;  %v764_v58 = vadd.f32 %v2677_v4, %v700_v5 }
 0x137   :  { %v2725_v7 = vpop.f32.mrf.mxu1  ;;  %v955_v23 = vsel %vm91_vm0, %v3759_v44, 0.0 }
 0x138   :  { %v3785_v60 = vadd.f32 %v3309_v9, %v793_v17 }
 0x139   :  { %950 = vadd.xlane.f32.xlu1 %v949_v37  ;;  %947 = vadd.xlane.f32.xlu0 %v946_v40  ;;  %v500_v37 = vpop.f32.mrf.mxu0  ;;  %v3777_v40 = vadd.f32 %v3309_v9, %v794_v45  ;;  %v796_v45 = vadd.f32 %v2725_v7, %v732_v25 }
 0x13a   :  { %v763_v46 = vadd.f32 %v699_v8, %v500_v37  ;;  %v1048_v5 = vsel %vm91_vm0, %v3785_v60, 0.0  ;;  %v3795_v37 = vadd.f32 %v3309_v9, %v764_v58 }
 0x13b   :  { %v1051_v50 = vsel %vm91_vm0, %v3777_v40, 0.0  ;;  %v3805_v7 = vadd.f32 %v3309_v9, %v796_v45 }
 0x13c   :  { %v3798_v17 = vadd.f32 %v3309_v9, %v763_v46  ;;  %v961_v8 = vsel %vm91_vm0, %v3795_v37, 0.0 }
 0x13d   :  { %1046 = vadd.xlane.f32.xlu1 %v1045_v22  ;;  %1043 = vadd.xlane.f32.xlu0 %v1042_v36  ;;  %v660_v22 = vpop.f32.mrf.mxu1  ;;  %v731_v36 = vld [vmem:[%s5200_s1 + $0x1f0] sm:$0xff]  ;;  %5263 = vst [vmem:[#allocation14_spill] sm:$0xff] %v3805_v7 }
 0x13e   :  { %v795_v4 = vadd.f32 %v731_v36, %v660_v22  ;;  %v958_v25 = vsel %vm91_vm0, %v3798_v17, 0.0 }
 0x141   :  { %956 = vadd.xlane.f32.xlu1 %v955_v23  ;;  %953 = vadd.xlane.f32.xlu0 %v952_v0  ;;  %v3808_v23 = vadd.f32 %v3309_v9, %v795_v4  ;;  %v1057_v0 = vsel %vm91_vm0, %v3805_v7, 0.0 }
 0x145   :  { %1052 = vadd.xlane.f32.xlu1 %v1051_v50  ;;  %1049 = vadd.xlane.f32.xlu0 %v1048_v5  ;;  %v1054_v50 = vsel %vm91_vm0, %v3808_v23, 0.0 }
 0x149   :  { %962 = vadd.xlane.f32.xlu1 %v961_v8  ;;  %959 = vadd.xlane.f32.xlu0 %v958_v25 }
 0x14d   :  { %1058 = vadd.xlane.f32.xlu1 %v1057_v0  ;;  %1055 = vadd.xlane.f32.xlu0 %v1054_v50 }
 0x15a   :  { %v969_v58 = vpop.xlane.xlu1 %968  ;;  %v873_v46 = vpop.xlane.xlu0 %872 }
 0x15b   :  { %v1094_v22 = vmul.f32 0.03125, %v969_v58  ;;  %v1062_v36 = vmul.f32 0.03125, %v873_v46 }
 0x15d   :  { %v3815_v45 = vsub.f32 %v3321_v18, %v1094_v22  ;;  %v3818_v9 = vsub.f32 %v3324_v19, %v1062_v36 }
 0x15e   :  { %v870_v5 = vpop.xlane.xlu0 %869  ;;  %v879_v4 = vpop.xlane.xlu1 %878 }
 0x15f   :  { %v1061_v8 = vmul.f32 0.03125, %v870_v5  ;;  %v1064_v25 = vmul.f32 0.03125, %v879_v4  ;;  %v1190_v7 = vmul.f32 %v3818_v9, %v3818_v9  ;;  %v1222_v18 = vmul.f32 %v3815_v45, %v3815_v45 }
 0x161   :  { %v3823_v0 = vsub.f32 %v3337_v31, %v1061_v8  ;;  %v3826_v50 = vsub.f32 %v3340_v32, %v1064_v25  ;;  %v1256_v58 = vsel %vm91_vm0, %v1190_v7, 0.0  ;;  %v1352_v7 = vsel %vm91_vm0, %v1222_v18, 0.0 }
 0x162   :  { %v966_v19 = vpop.xlane.xlu0 %965  ;;  %v975_v46 = vpop.xlane.xlu1 %974  ;;  %1257 = vadd.xlane.f32.xlu1 %v1256_v58 }
 0x163   :  { %5264 = vst [vmem:[#allocation15_spill] sm:$0xff] %v3823_v0  ;;  %5265 = vst [vmem:[#allocation16_spill] sm:$0xff] %v3826_v50  ;;  %v1093_v22 = vmul.f32 0.03125, %v966_v19  ;;  %v1096_v36 = vmul.f32 0.03125, %v975_v46  ;;  %v1189_v5 = vmul.f32 %v3823_v0, %v3823_v0  ;;  %v1192_v31 = vmul.f32 %v3826_v50, %v3826_v50 }
 0x165   :  { %v3836_v4 = vsub.f32 %v3349_v35, %v1093_v22  ;;  %v3839_v32 = vsub.f32 %v3343_v33, %v1096_v36  ;;  %v1253_v8 = vsel %vm91_vm0, %v1189_v5, 0.0  ;;  %v1262_v50 = vsel %vm91_vm0, %v1192_v31, 0.0 }
 0x166   :  { %v972_v25 = vpop.xlane.xlu0 %971  ;;  %v876_v58 = vpop.xlane.xlu1 %875  ;;  %1353 = vadd.xlane.f32.xlu1 %v1352_v7  ;;  %1254 = vadd.xlane.f32.xlu0 %v1253_v8 }
 0x167   :  { %v1095_v19 = vmul.f32 0.03125, %v972_v25  ;;  %v1063_v46 = vmul.f32 0.03125, %v876_v58  ;;  %v1221_v0 = vmul.f32 %v3836_v4, %v3836_v4  ;;  %v1224_v22 = vmul.f32 %v3839_v32, %v3839_v32 }
 0x169   :  { %v3847_v35 = vsub.f32 %v3369_v52, %v1095_v19  ;;  %v3850_v33 = vsub.f32 %v3372_v53, %v1063_v46  ;;  %v1349_v18 = vsel %vm91_vm0, %v1221_v0, 0.0  ;;  %v1358_v25 = vsel %vm91_vm0, %v1224_v22, 0.0 }
 0x16a   :  { %v885_v36 = vpop.xlane.xlu1 %884  ;;  %v882_v5 = vpop.xlane.xlu0 %881  ;;  %1263 = vadd.xlane.f32.xlu1 %v1262_v50  ;;  %1350 = vadd.xlane.f32.xlu0 %v1349_v18 }
 0x16b   :  { %v1066_v7 = vmul.f32 0.03125, %v885_v36  ;;  %v1065_v8 = vmul.f32 0.03125, %v882_v5  ;;  %v1191_v31 = vmul.f32 %v3850_v33, %v3850_v33  ;;  %v1223_v52 = vmul.f32 %v3847_v35, %v3847_v35 }
 0x16d   :  { %v3860_v53 = vsub.f32 %v3375_v55, %v1066_v7  ;;  %v3863_v0 = vsub.f32 %v3378_v57, %v1065_v8  ;;  %v1259_v58 = vsel %vm91_vm0, %v1191_v31, 0.0  ;;  %v1355_v5 = vsel %vm91_vm0, %v1223_v52, 0.0 }
 0x16e   :  { %v981_v50 = vpop.xlane.xlu1 %980  ;;  %v978_v19 = vpop.xlane.xlu0 %977  ;;  %1359 = vadd.xlane.f32.xlu1 %v1358_v25  ;;  %1260 = vadd.xlane.f32.xlu0 %v1259_v58 }
 0x16f   :  { %v1098_v46 = vmul.f32 0.03125, %v981_v50  ;;  %v1097_v18 = vmul.f32 0.03125, %v978_v19  ;;  %v1194_v36 = vmul.f32 %v3860_v53, %v3860_v53  ;;  %v1193_v7 = vmul.f32 %v3863_v0, %v3863_v0 }
 0x171   :  { %v3871_v55 = vsub.f32 %v3393_v1, %v1098_v46  ;;  %v3874_v57 = vsub.f32 %v3401_v6, %v1097_v18  ;;  %v1268_v22 = vsel %vm91_vm0, %v1194_v36, 0.0  ;;  %v1265_v46 = vsel %vm91_vm0, %v1193_v7, 0.0 }
 0x172   :  { %v891_v8 = vpop.xlane.xlu1 %890  ;;  %v888_v31 = vpop.xlane.xlu0 %887  ;;  %1269 = vadd.xlane.f32.xlu1 %v1268_v22  ;;  %1356 = vadd.xlane.f32.xlu0 %v1355_v5 }
 0x173   :  { %v1068_v25 = vmul.f32 0.03125, %v891_v8  ;;  %v1067_v58 = vmul.f32 0.03125, %v888_v31  ;;  %v1226_v52 = vmul.f32 %v3871_v55, %v3871_v55  ;;  %v1225_v1 = vmul.f32 %v3874_v57, %v3874_v57 }
 0x175   :  { %v3884_v6 = vsub.f32 %v3411_v15, %v1068_v25  ;;  %v3887_v50 = vsub.f32 %v3414_v16, %v1067_v58  ;;  %v1364_v19 = vsel %vm91_vm0, %v1226_v52, 0.0  ;;  %v1361_v31 = vsel %vm91_vm0, %v1225_v1, 0.0 }
 0x176   :  { %v987_v18 = vpop.xlane.xlu1 %986  ;;  %v984_v36 = vpop.xlane.xlu0 %983  ;;  %1365 = vadd.xlane.f32.xlu1 %v1364_v19  ;;  %1266 = vadd.xlane.f32.xlu0 %v1265_v46 }
 0x177   :  { %v1100_v5 = vmul.f32 0.03125, %v987_v18  ;;  %v1099_v22 = vmul.f32 0.03125, %v984_v36  ;;  %v1196_v8 = vmul.f32 %v3884_v6, %v3884_v6  ;;  %v1195_v7 = vmul.f32 %v3887_v50, %v3887_v50 }
 0x179   :  { %v3895_v15 = vsub.f32 %v3423_v24, %v1100_v5  ;;  %v3898_v16 = vsub.f32 %v3433_v29, %v1099_v22  ;;  %v1274_v25 = vsel %vm91_vm0, %v1196_v8, 0.0  ;;  %v1271_v5 = vsel %vm91_vm0, %v1195_v7, 0.0 }
 0x17a   :  { %v897_v58 = vpop.xlane.xlu1 %896  ;;  %v894_v52 = vpop.xlane.xlu0 %893  ;;  %1275 = vadd.xlane.f32.xlu1 %v1274_v25  ;;  %1362 = vadd.xlane.f32.xlu0 %v1361_v31 }
 0x17b   :  { %v1070_v19 = vmul.f32 0.03125, %v897_v58  ;;  %v1069_v46 = vmul.f32 0.03125, %v894_v52  ;;  %v1228_v1 = vmul.f32 %v3895_v15, %v3895_v15  ;;  %v1227_v24 = vmul.f32 %v3898_v16, %v3898_v16 }
 0x17d   :  { %v3908_v29 = vsub.f32 %v3439_v38, %v1070_v19  ;;  %v3911_v18 = vsub.f32 %v3446_v42, %v1069_v46  ;;  %v1370_v36 = vsel %vm91_vm0, %v1228_v1, 0.0  ;;  %v1367_v52 = vsel %vm91_vm0, %v1227_v24, 0.0 }
 0x17e   :  { %v993_v22 = vpop.xlane.xlu1 %992  ;;  %v990_v8 = vpop.xlane.xlu0 %989  ;;  %1371 = vadd.xlane.f32.xlu1 %v1370_v36  ;;  %1272 = vadd.xlane.f32.xlu0 %v1271_v5 }
 0x17f   :  { %v1102_v31 = vmul.f32 0.03125, %v993_v22  ;;  %v1101_v25 = vmul.f32 0.03125, %v990_v8  ;;  %v1198_v58 = vmul.f32 %v3908_v29, %v3908_v29  ;;  %v1197_v7 = vmul.f32 %v3911_v18, %v3911_v18 }
 0x181   :  { %v3919_v38 = vsub.f32 %v3457_v48, %v1102_v31  ;;  %v3922_v42 = vsub.f32 %v3465_v56, %v1101_v25  ;;  %v1280_v19 = vsel %vm91_vm0, %v1198_v58, 0.0  ;;  %v1277_v31 = vsel %vm91_vm0, %v1197_v7, 0.0 }
 0x182   :  { %v903_v46 = vpop.xlane.xlu1 %902  ;;  %v900_v1 = vpop.xlane.xlu0 %899  ;;  %1281 = vadd.xlane.f32.xlu1 %v1280_v19  ;;  %1368 = vadd.xlane.f32.xlu0 %v1367_v52 }
 0x183   :  { %v1072_v36 = vmul.f32 0.03125, %v903_v46  ;;  %v1071_v5 = vmul.f32 0.03125, %v900_v1  ;;  %v1230_v24 = vmul.f32 %v3919_v38, %v3919_v38  ;;  %v1229_v48 = vmul.f32 %v3922_v42, %v3922_v42 }
 0x185   :  { %v3932_v56 = vsub.f32 %v3475_v2, %v1072_v36  ;;  %v3935_v22 = vsub.f32 %v3478_v3, %v1071_v5  ;;  %v1376_v8 = vsel %vm91_vm0, %v1230_v24, 0.0  ;;  %v1373_v1 = vsel %vm91_vm0, %v1229_v48, 0.0 }
 0x186   :  { %v999_v25 = vpop.xlane.xlu1 %998  ;;  %v996_v58 = vpop.xlane.xlu0 %995  ;;  %1377 = vadd.xlane.f32.xlu1 %v1376_v8  ;;  %1278 = vadd.xlane.f32.xlu0 %v1277_v31 }
 0x187   :  { %v1104_v52 = vmul.f32 0.03125, %v999_v25  ;;  %v1103_v19 = vmul.f32 0.03125, %v996_v58  ;;  %v1200_v46 = vmul.f32 %v3932_v56, %v3932_v56  ;;  %v1199_v7 = vmul.f32 %v3935_v22, %v3935_v22 }
 0x189   :  { %v3943_v2 = vsub.f32 %v3487_v11, %v1104_v52  ;;  %v3946_v3 = vsub.f32 %v3497_v20, %v1103_v19  ;;  %v1286_v36 = vsel %vm91_vm0, %v1200_v46, 0.0  ;;  %v1283_v52 = vsel %vm91_vm0, %v1199_v7, 0.0 }
 0x18a   :  { %v909_v5 = vpop.xlane.xlu1 %908  ;;  %v906_v24 = vpop.xlane.xlu0 %905  ;;  %1287 = vadd.xlane.f32.xlu1 %v1286_v36  ;;  %1374 = vadd.xlane.f32.xlu0 %v1373_v1 }
 0x18b   :  { %v1074_v8 = vmul.f32 0.03125, %v909_v5  ;;  %v1073_v31 = vmul.f32 0.03125, %v906_v24  ;;  %v1232_v48 = vmul.f32 %v3943_v2, %v3943_v2  ;;  %v1231_v11 = vmul.f32 %v3946_v3, %v3946_v3 }
 0x18d   :  { %v3956_v20 = vsub.f32 %v3503_v26, %v1074_v8  ;;  %v3959_v25 = vsub.f32 %v3510_v34, %v1073_v31  ;;  %v1382_v58 = vsel %vm91_vm0, %v1232_v48, 0.0  ;;  %v1379_v24 = vsel %vm91_vm0, %v1231_v11, 0.0 }
 0x18e   :  { %v1005_v19 = vpop.xlane.xlu1 %1004  ;;  %v1002_v46 = vpop.xlane.xlu0 %1001  ;;  %1383 = vadd.xlane.f32.xlu1 %v1382_v58  ;;  %1284 = vadd.xlane.f32.xlu0 %v1283_v52 }
 0x18f   :  { %v1106_v1 = vmul.f32 0.03125, %v1005_v19  ;;  %v1105_v36 = vmul.f32 0.03125, %v1002_v46  ;;  %v1202_v5 = vmul.f32 %v3956_v20, %v3956_v20  ;;  %v1201_v7 = vmul.f32 %v3959_v25, %v3959_v25 }
 0x191   :  { %v3967_v26 = vsub.f32 %v3521_v43, %v1106_v1  ;;  %v3970_v34 = vsub.f32 %v3529_v49, %v1105_v36  ;;  %v1292_v8 = vsel %vm91_vm0, %v1202_v5, 0.0  ;;  %v1289_v1 = vsel %vm91_vm0, %v1201_v7, 0.0 }
 0x192   :  { %v915_v31 = vpop.xlane.xlu1 %914  ;;  %v912_v48 = vpop.xlane.xlu0 %911  ;;  %1293 = vadd.xlane.f32.xlu1 %v1292_v8  ;;  %1380 = vadd.xlane.f32.xlu0 %v1379_v24 }
 0x193   :  { %v1076_v58 = vmul.f32 0.03125, %v915_v31  ;;  %v1075_v52 = vmul.f32 0.03125, %v912_v48  ;;  %v1234_v11 = vmul.f32 %v3967_v26, %v3967_v26  ;;  %v1233_v43 = vmul.f32 %v3970_v34, %v3970_v34 }
 0x195   :  { %v3980_v49 = vsub.f32 %v3539_v62, %v1076_v58  ;;  %v3983_v19 = vsub.f32 %v3542_v63, %v1075_v52  ;;  %v1388_v46 = vsel %vm91_vm0, %v1234_v11, 0.0  ;;  %v1385_v48 = vsel %vm91_vm0, %v1233_v43, 0.0 }
 0x196   :  { %v1011_v36 = vpop.xlane.xlu1 %1010  ;;  %v1008_v5 = vpop.xlane.xlu0 %1007  ;;  %1389 = vadd.xlane.f32.xlu1 %v1388_v46  ;;  %1290 = vadd.xlane.f32.xlu0 %v1289_v1 }
 0x197   :  { %v1108_v24 = vmul.f32 0.03125, %v1011_v36  ;;  %v1107_v8 = vmul.f32 0.03125, %v1008_v5  ;;  %v1204_v31 = vmul.f32 %v3980_v49, %v3980_v49  ;;  %v1203_v7 = vmul.f32 %v3983_v19, %v3983_v19 }
 0x199   :  { %v3991_v62 = vsub.f32 %v3551_v10, %v1108_v24  ;;  %v3994_v63 = vsub.f32 %v3561_v21, %v1107_v8  ;;  %v1298_v58 = vsel %vm91_vm0, %v1204_v31, 0.0  ;;  %v1295_v24 = vsel %vm91_vm0, %v1203_v7, 0.0 }
 0x19a   :  { %v921_v52 = vpop.xlane.xlu1 %920  ;;  %v918_v11 = vpop.xlane.xlu0 %917  ;;  %1299 = vadd.xlane.f32.xlu1 %v1298_v58  ;;  %1386 = vadd.xlane.f32.xlu0 %v1385_v48 }
 0x19b   :  { %v1078_v46 = vmul.f32 0.03125, %v921_v52  ;;  %v1077_v1 = vmul.f32 0.03125, %v918_v11  ;;  %v1236_v43 = vmul.f32 %v3991_v62, %v3991_v62  ;;  %v1235_v10 = vmul.f32 %v3994_v63, %v3994_v63 }
 0x19d   :  { %v4004_v21 = vsub.f32 %v3567_v28, %v1078_v46  ;;  %v4007_v36 = vsub.f32 %v3574_v39, %v1077_v1  ;;  %v1394_v5 = vsel %vm91_vm0, %v1236_v43, 0.0  ;;  %v1391_v11 = vsel %vm91_vm0, %v1235_v10, 0.0 }
 0x19e   :  { %v1017_v8 = vpop.xlane.xlu1 %1016  ;;  %v1014_v31 = vpop.xlane.xlu0 %1013  ;;  %1395 = vadd.xlane.f32.xlu1 %v1394_v5  ;;  %1296 = vadd.xlane.f32.xlu0 %v1295_v24 }
 0x19f   :  { %5266 = vst [vmem:[#allocation17_spill] sm:$0xff] %v4007_v36  ;;  %v1110_v48 = vmul.f32 0.03125, %v1017_v8  ;;  %v1109_v58 = vmul.f32 0.03125, %v1014_v31  ;;  %v1206_v52 = vmul.f32 %v4004_v21, %v4004_v21  ;;  %v1205_v7 = vmul.f32 %v4007_v36, %v4007_v36 }
 0x1a1   :  { %v4015_v28 = vsub.f32 %v3585_v47, %v1110_v48  ;;  %v4018_v39 = vsub.f32 %v3593_v59, %v1109_v58  ;;  %v1304_v46 = vsel %vm91_vm0, %v1206_v52, 0.0  ;;  %v1301_v48 = vsel %vm91_vm0, %v1205_v7, 0.0 }
 0x1a2   :  { %v927_v1 = vpop.xlane.xlu1 %926  ;;  %v924_v43 = vpop.xlane.xlu0 %923  ;;  %1305 = vadd.xlane.f32.xlu1 %v1304_v46  ;;  %1392 = vadd.xlane.f32.xlu0 %v1391_v11 }
 0x1a3   :  { %5267 = vst [vmem:[#allocation18_spill] sm:$0xff] %v4015_v28  ;;  %5268 = vst [vmem:[#allocation19_spill] sm:$0xff] %v4018_v39  ;;  %v1080_v5 = vmul.f32 0.03125, %v927_v1  ;;  %v1079_v24 = vmul.f32 0.03125, %v924_v43  ;;  %v1238_v10 = vmul.f32 %v4015_v28, %v4015_v28  ;;  %v1237_v47 = vmul.f32 %v4018_v39, %v4018_v39 }
 0x1a5   :  { %v4028_v59 = vsub.f32 %v3603_v12, %v1080_v5  ;;  %v4031_v8 = vsub.f32 %v3606_v13, %v1079_v24  ;;  %v1400_v31 = vsel %vm91_vm0, %v1238_v10, 0.0  ;;  %v1397_v43 = vsel %vm91_vm0, %v1237_v47, 0.0 }
 0x1a6   :  { %v1023_v58 = vpop.xlane.xlu1 %1022  ;;  %v1020_v52 = vpop.xlane.xlu0 %1019  ;;  %1401 = vadd.xlane.f32.xlu1 %v1400_v31  ;;  %1302 = vadd.xlane.f32.xlu0 %v1301_v48 }
 0x1a7   :  { %5269 = vst [vmem:[#allocation20_spill] sm:$0xff] %v4028_v59  ;;  %5270 = vst [vmem:[#allocation21_spill] sm:$0xff] %v4031_v8  ;;  %v1112_v11 = vmul.f32 0.03125, %v1023_v58  ;;  %v1111_v46 = vmul.f32 0.03125, %v1020_v52  ;;  %v1208_v1 = vmul.f32 %v4028_v59, %v4028_v59  ;;  %v1207_v7 = vmul.f32 %v4031_v8, %v4031_v8 }
 0x1a9   :  { %v4039_v12 = vsub.f32 %v3615_v27, %v1112_v11  ;;  %v4042_v13 = vsub.f32 %v3625_v41, %v1111_v46  ;;  %v1310_v5 = vsel %vm91_vm0, %v1208_v1, 0.0  ;;  %v1307_v11 = vsel %vm91_vm0, %v1207_v7, 0.0 }
 0x1aa   :  { %v933_v24 = vpop.xlane.xlu1 %932  ;;  %v930_v10 = vpop.xlane.xlu0 %929  ;;  %1311 = vadd.xlane.f32.xlu1 %v1310_v5  ;;  %1398 = vadd.xlane.f32.xlu0 %v1397_v43 }
 0x1ab   :  { %5271 = vst [vmem:[#allocation22_spill] sm:$0xff] %v4039_v12  ;;  %5272 = vst [vmem:[#allocation23_spill] sm:$0xff] %v4042_v13  ;;  %v1082_v31 = vmul.f32 0.03125, %v933_v24  ;;  %v1081_v48 = vmul.f32 0.03125, %v930_v10  ;;  %v1240_v47 = vmul.f32 %v4039_v12, %v4039_v12  ;;  %v1239_v27 = vmul.f32 %v4042_v13, %v4042_v13 }
 0x1ad   :  { %v4052_v41 = vsub.f32 %v3631_v51, %v1082_v31  ;;  %v4055_v58 = vsub.f32 %v3638_v61, %v1081_v48  ;;  %v1406_v52 = vsel %vm91_vm0, %v1240_v47, 0.0  ;;  %v1403_v10 = vsel %vm91_vm0, %v1239_v27, 0.0 }
 0x1ae   :  { %v1029_v46 = vpop.xlane.xlu1 %1028  ;;  %v1026_v1 = vpop.xlane.xlu0 %1025  ;;  %1407 = vadd.xlane.f32.xlu1 %v1406_v52  ;;  %1308 = vadd.xlane.f32.xlu0 %v1307_v11 }
 0x1af   :  { %5273 = vst [vmem:[#allocation24_spill] sm:$0xff] %v4052_v41  ;;  %5274 = vst [vmem:[#allocation25_spill] sm:$0xff] %v4055_v58  ;;  %v1114_v43 = vmul.f32 0.03125, %v1029_v46  ;;  %v1113_v5 = vmul.f32 0.03125, %v1026_v1  ;;  %v1210_v24 = vmul.f32 %v4052_v41, %v4052_v41  ;;  %v1209_v7 = vmul.f32 %v4055_v58, %v4055_v58  ;;  %v5278_v46 = vld [vmem:[#allocation2_spill] sm:$0xff] }
 0x1b1   :  { %v4063_v51 = vsub.f32 %v3649_v14, %v1114_v43  ;;  %v4066_v61 = vsub.f32 %v3657_v30, %v1113_v5  ;;  %v1316_v31 = vsel %vm91_vm0, %v1210_v24, 0.0  ;;  %v1313_v5 = vsel %vm91_vm0, %v1209_v7, 0.0 }
 0x1b2   :  { %v939_v48 = vpop.xlane.xlu1 %938  ;;  %v936_v47 = vpop.xlane.xlu0 %935  ;;  %1317 = vadd.xlane.f32.xlu1 %v1316_v31  ;;  %1404 = vadd.xlane.f32.xlu0 %v1403_v10 }
 0x1b3   :  { %5275 = vst [vmem:[#allocation26_spill] sm:$0xff] %v4063_v51  ;;  %5276 = vst [vmem:[#allocation27_spill] sm:$0xff] %v4066_v61  ;;  %v1084_v52 = vmul.f32 0.03125, %v939_v48  ;;  %v1083_v11 = vmul.f32 0.03125, %v936_v47  ;;  %v1242_v27 = vmul.f32 %v4063_v51, %v4063_v51  ;;  %v1241_v14 = vmul.f32 %v4066_v61, %v4066_v61 }
 0x1b5   :  { %v4076_v30 = vsub.f32 %v3667_v54, %v1084_v52  ;;  %v4079_v1 = vsub.f32 %v5278_v46, %v1083_v11  ;;  %v1412_v43 = vsel %vm91_vm0, %v1242_v27, 0.0  ;;  %v1409_v61 = vsel %vm91_vm0, %v1241_v14, 0.0  ;;  %v5280_v54 = vld [vmem:[#allocation3_spill] sm:$0xff]  ;;  %v5282_v11 = vld [vmem:[#allocation4_spill] sm:$0xff] }
 0x1b6   :  { %v1035_v24 = vpop.xlane.xlu1 %1034  ;;  %v1032_v10 = vpop.xlane.xlu0 %1031  ;;  %1413 = vadd.xlane.f32.xlu1 %v1412_v43  ;;  %1314 = vadd.xlane.f32.xlu0 %v1313_v5 }
 0x1b7   :  { %5277 = vst [vmem:[#allocation28_spill] sm:$0xff] %v4076_v30  ;;  %5279 = vst [vmem:[#allocation2_spill] sm:$0xff] %v4079_v1  ;;  %v1116_v31 = vmul.f32 0.03125, %v1035_v24  ;;  %v1115_v48 = vmul.f32 0.03125, %v1032_v10  ;;  %v1212_v47 = vmul.f32 %v4076_v30, %v4076_v30  ;;  %v1211_v7 = vmul.f32 %v4079_v1, %v4079_v1 }
 0x1b9   :  { %v4087_v52 = vsub.f32 %v5280_v54, %v1116_v31  ;;  %v4090_v46 = vsub.f32 %v5282_v11, %v1115_v48  ;;  %v1322_v27 = vsel %vm91_vm0, %v1212_v47, 0.0  ;;  %v5284_v54 = vld [vmem:[#allocation5_spill] sm:$0xff]  ;;  %v5286_v11 = vld [vmem:[#allocation6_spill] sm:$0xff]  ;;  %v1319_v30 = vsel %vm91_vm0, %v1211_v7, 0.0 }
 0x1ba   :  { %v945_v43 = vpop.xlane.xlu1 %944  ;;  %v942_v5 = vpop.xlane.xlu0 %941  ;;  %1323 = vadd.xlane.f32.xlu1 %v1322_v27  ;;  %1410 = vadd.xlane.f32.xlu0 %v1409_v61 }
 0x1bb   :  { %5281 = vst [vmem:[#allocation3_spill] sm:$0xff] %v4087_v52  ;;  %5283 = vst [vmem:[#allocation4_spill] sm:$0xff] %v4090_v46  ;;  %v1086_v24 = vmul.f32 0.03125, %v945_v43  ;;  %v1085_v10 = vmul.f32 0.03125, %v942_v5  ;;  %v1244_v14 = vmul.f32 %v4087_v52, %v4087_v52  ;;  %v1243_v31 = vmul.f32 %v4090_v46, %v4090_v46 }
 0x1bd   :  { %v4100_v48 = vsub.f32 %v5284_v54, %v1086_v24  ;;  %v4103_v47 = vsub.f32 %v5286_v11, %v1085_v10  ;;  %v1418_v1 = vsel %vm91_vm0, %v1244_v14, 0.0  ;;  %v1415_v46 = vsel %vm91_vm0, %v1243_v31, 0.0  ;;  %v5288_v24 = vld [vmem:[#allocation7_spill] sm:$0xff]  ;;  %v5290_v10 = vld [vmem:[#allocation8_spill] sm:$0xff] }
 0x1be   :  { %v1041_v27 = vpop.xlane.xlu1 %1040  ;;  %v1038_v61 = vpop.xlane.xlu0 %1037  ;;  %1419 = vadd.xlane.f32.xlu1 %v1418_v1  ;;  %1320 = vadd.xlane.f32.xlu0 %v1319_v30 }
 0x1bf   :  { %5285 = vst [vmem:[#allocation5_spill] sm:$0xff] %v4100_v48  ;;  %5287 = vst [vmem:[#allocation6_spill] sm:$0xff] %v4103_v47  ;;  %v1118_v43 = vmul.f32 0.03125, %v1041_v27  ;;  %v1117_v5 = vmul.f32 0.03125, %v1038_v61  ;;  %v1214_v52 = vmul.f32 %v4100_v48, %v4100_v48  ;;  %v1213_v7 = vmul.f32 %v4103_v47, %v4103_v47 }
 0x1c1   :  { %v4111_v54 = vsub.f32 %v5288_v24, %v1118_v43  ;;  %v4114_v11 = vsub.f32 %v5290_v10, %v1117_v5  ;;  %v1328_v14 = vsel %vm91_vm0, %v1214_v52, 0.0  ;;  %v5292_v24 = vld [vmem:[#allocation9_spill] sm:$0xff]  ;;  %v5294_v10 = vld [vmem:[#allocation10_spill] sm:$0xff]  ;;  %v1325_v48 = vsel %vm91_vm0, %v1213_v7, 0.0 }
 0x1c2   :  { %v951_v1 = vpop.xlane.xlu1 %950  ;;  %v948_v30 = vpop.xlane.xlu0 %947  ;;  %1329 = vadd.xlane.f32.xlu1 %v1328_v14  ;;  %1416 = vadd.xlane.f32.xlu0 %v1415_v46 }
 0x1c3   :  { %5289 = vst [vmem:[#allocation7_spill] sm:$0xff] %v4111_v54  ;;  %5291 = vst [vmem:[#allocation8_spill] sm:$0xff] %v4114_v11  ;;  %v1088_v27 = vmul.f32 0.03125, %v951_v1  ;;  %v1087_v61 = vmul.f32 0.03125, %v948_v30  ;;  %v1246_v31 = vmul.f32 %v4111_v54, %v4111_v54  ;;  %v1245_v43 = vmul.f32 %v4114_v11, %v4114_v11 }
 0x1c5   :  { %v4124_v5 = vsub.f32 %v5292_v24, %v1088_v27  ;;  %v4127_v52 = vsub.f32 %v5294_v10, %v1087_v61  ;;  %v1424_v47 = vsel %vm91_vm0, %v1246_v31, 0.0  ;;  %v1421_v11 = vsel %vm91_vm0, %v1245_v43, 0.0  ;;  %v5296_v27 = vld [vmem:[#allocation11_spill] sm:$0xff]  ;;  %v5298_v61 = vld [vmem:[#allocation12_spill] sm:$0xff] }
 0x1c6   :  { %v1047_v14 = vpop.xlane.xlu1 %1046  ;;  %v1044_v46 = vpop.xlane.xlu0 %1043  ;;  %1425 = vadd.xlane.f32.xlu1 %v1424_v47  ;;  %1326 = vadd.xlane.f32.xlu0 %v1325_v48 }
 0x1c7   :  { %5293 = vst [vmem:[#allocation9_spill] sm:$0xff] %v4124_v5  ;;  %5295 = vst [vmem:[#allocation10_spill] sm:$0xff] %v4127_v52  ;;  %v1120_v1 = vmul.f32 0.03125, %v1047_v14  ;;  %v1119_v30 = vmul.f32 0.03125, %v1044_v46  ;;  %v1216_v54 = vmul.f32 %v4124_v5, %v4124_v5  ;;  %v1215_v7 = vmul.f32 %v4127_v52, %v4127_v52 }
 0x1c9   :  { %v4135_v24 = vsub.f32 %v5296_v27, %v1120_v1  ;;  %v4138_v10 = vsub.f32 %v5298_v61, %v1119_v30  ;;  %v1334_v31 = vsel %vm91_vm0, %v1216_v54, 0.0  ;;  %v5301_v27 = vld [vmem:[#allocation13_spill] sm:$0xff]  ;;  %v1331_v52 = vsel %vm91_vm0, %v1215_v7, 0.0 }
 0x1ca   :  { %v957_v47 = vpop.xlane.xlu1 %956  ;;  %v954_v48 = vpop.xlane.xlu0 %953  ;;  %1335 = vadd.xlane.f32.xlu1 %v1334_v31  ;;  %1422 = vadd.xlane.f32.xlu0 %v1421_v11 }
 0x1cb   :  { %5297 = vst [vmem:[#allocation11_spill] sm:$0xff] %v4135_v24  ;;  %5299 = vst [vmem:[#allocation12_spill] sm:$0xff] %v4138_v10  ;;  %v1090_v14 = vmul.f32 0.03125, %v957_v47  ;;  %v1089_v46 = vmul.f32 0.03125, %v954_v48  ;;  %v1248_v43 = vmul.f32 %v4135_v24, %v4135_v24  ;;  %v1247_v1 = vmul.f32 %v4138_v10, %v4138_v10 }
 0x1cd   :  { %v4148_v30 = vsub.f32 %v3759_v44, %v1090_v14  ;;  %v4151_v54 = vsub.f32 %v5301_v27, %v1089_v46  ;;  %v1430_v61 = vsel %vm91_vm0, %v1248_v43, 0.0  ;;  %v1427_v10 = vsel %vm91_vm0, %v1247_v1, 0.0 }
 0x1ce   :  { %v1053_v31 = vpop.xlane.xlu1 %1052  ;;  %v1050_v11 = vpop.xlane.xlu0 %1049  ;;  %1431 = vadd.xlane.f32.xlu1 %v1430_v61  ;;  %1332 = vadd.xlane.f32.xlu0 %v1331_v52 }
 0x1cf   :  { %5300 = vst [vmem:[#allocation29_spill] sm:$0xff] %v4148_v30  ;;  %5302 = vst [vmem:[#allocation13_spill] sm:$0xff] %v4151_v54  ;;  %v1122_v47 = vmul.f32 0.03125, %v1053_v31  ;;  %v1121_v48 = vmul.f32 0.03125, %v1050_v11  ;;  %v1218_v24 = vmul.f32 %v4148_v30, %v4148_v30  ;;  %v1217_v7 = vmul.f32 %v4151_v54, %v4151_v54 }
 0x1d1   :  { %v4159_v44 = vsub.f32 %v3777_v40, %v1122_v47  ;;  %v4162_v14 = vsub.f32 %v3785_v60, %v1121_v48  ;;  %v1340_v46 = vsel %vm91_vm0, %v1218_v24, 0.0  ;;  %v1337_v11 = vsel %vm91_vm0, %v1217_v7, 0.0 }
 0x1d2   :  { %1341 = vadd.xlane.f32.xlu1 %v1340_v46  ;;  %v963_v52 = vpop.xlane.xlu1 %962  ;;  %1428 = vadd.xlane.f32.xlu0 %v1427_v10  ;;  %v960_v43 = vpop.xlane.xlu0 %959 }
 0x1d3   :  { %5303 = vst [vmem:[#allocation30_spill] sm:$0xff] %v4159_v44  ;;  %5304 = vst [vmem:[#allocation31_spill] sm:$0xff] %v4162_v14  ;;  %v1092_v27 = vmul.f32 0.03125, %v963_v52  ;;  %v1091_v61 = vmul.f32 0.03125, %v960_v43  ;;  %v1250_v1 = vmul.f32 %v4159_v44, %v4159_v44  ;;  %v1249_v40 = vmul.f32 %v4162_v14, %v4162_v14 }
 0x1d5   :  { %v4172_v60 = vsub.f32 %v3795_v37, %v1092_v27  ;;  %v4175_v24 = vsub.f32 %v3798_v17, %v1091_v61  ;;  %v1436_v31 = vsel %vm91_vm0, %v1250_v1, 0.0  ;;  %v1433_v43 = vsel %vm91_vm0, %v1249_v40, 0.0  ;;  %v5307_v37 = vld [vmem:[#allocation14_spill] sm:$0xff] }
 0x1d6   :  { %1437 = vadd.xlane.f32.xlu1 %v1436_v31  ;;  %v1059_v10 = vpop.xlane.xlu1 %1058  ;;  %1338 = vadd.xlane.f32.xlu0 %v1337_v11  ;;  %v1056_v47 = vpop.xlane.xlu0 %1055 }
 0x1d7   :  { %5305 = vst [vmem:[#allocation32_spill] sm:$0xff] %v4172_v60  ;;  %5306 = vst [vmem:[#allocation33_spill] sm:$0xff] %v4175_v24  ;;  %v1124_v48 = vmul.f32 0.03125, %v1059_v10  ;;  %v1123_v46 = vmul.f32 0.03125, %v1056_v47  ;;  %v1220_v52 = vmul.f32 %v4172_v60, %v4172_v60  ;;  %v1219_v7 = vmul.f32 %v4175_v24, %v4175_v24 }
 0x1d9   :  { %v4183_v27 = vsub.f32 %v5307_v37, %v1124_v48  ;;  %v4186_v17 = vsub.f32 %v3808_v23, %v1123_v46  ;;  %v1346_v61 = vsel %vm91_vm0, %v1220_v52, 0.0  ;;  %v1343_v40 = vsel %vm91_vm0, %v1219_v7, 0.0 }
 0x1da   :  { %1347 = vadd.xlane.f32.xlu1 %v1346_v61  ;;  %1434 = vadd.xlane.f32.xlu0 %v1433_v43 }
 0x1db   :  { %5308 = vst [vmem:[#allocation14_spill] sm:$0xff] %v4183_v27  ;;  %5309 = vst [vmem:[#allocation34_spill] sm:$0xff] %v4186_v17  ;;  %v1252_v1 = vmul.f32 %v4183_v27, %v4183_v27  ;;  %v1251_v11 = vmul.f32 %v4186_v17, %v4186_v17 }
 0x1dd   :  { %v1442_v31 = vsel %vm91_vm0, %v1252_v1, 0.0  ;;  %v1439_v23 = vsel %vm91_vm0, %v1251_v11, 0.0 }
 0x1de   :  { %1443 = vadd.xlane.f32.xlu1 %v1442_v31  ;;  %1344 = vadd.xlane.f32.xlu0 %v1343_v40 }
 0x1e2   :  { %1440 = vadd.xlane.f32.xlu0 %v1439_v23 }
 0x1eb   :  { %v1258_v10 = vpop.xlane.xlu1 %1257 }
 0x1ec   :  { %v1446_v47 = vmul.f32 0.03125, %v1258_v10 }
 0x1ee   :  { %v1510_v48 = vadd.f32 1e-05, %v1446_v47 }
 0x1ef   :  { %v1354_v46 = vpop.xlane.xlu1 %1353  ;;  %v1255_v52 = vpop.xlane.xlu0 %1254 }
 0x1f0   :  { %2734 = vrsqrt.f32 %v1510_v48  ;;  %v1478_v43 = vmul.f32 0.03125, %v1354_v46  ;;  %v1445_v37 = vmul.f32 0.03125, %v1255_v52 }
 0x1f2   :  { %v1542_v61 = vadd.f32 1e-05, %v1478_v43  ;;  %v1509_v1 = vadd.f32 1e-05, %v1445_v37 }
 0x1f3   :  { %v1264_v24 = vpop.xlane.xlu1 %1263  ;;  %v1351_v7 = vpop.xlane.xlu0 %1350 }
 0x1f4   :  { %2736 = vrsqrt.f32 %v1542_v61  ;;  %v1448_v27 = vmul.f32 0.03125, %v1264_v24  ;;  %v1477_v17 = vmul.f32 0.03125, %v1351_v7  ;;  %v4201_v24 = vld [vmem:[%s5202_s4] ss:$0 sm:$0xff] }
 0x1f5   :  { %2738 = vrsqrt.f32 %v1509_v1  ;;  %v4207_v1 = vld [vmem:[%s5203_s5] ss:$0 sm:$0xff] }
 0x1f6   :  { %v1512_v31 = vadd.f32 1e-05, %v1448_v27  ;;  %v1541_v40 = vadd.f32 1e-05, %v1477_v17 }
 0x1f7   :  { %v1360_v11 = vpop.xlane.xlu1 %1359  ;;  %v1261_v23 = vpop.xlane.xlu0 %1260 }
 0x1f8   :  { %2740 = vrsqrt.f32 %v1512_v31  ;;  %v1480_v10 = vmul.f32 0.03125, %v1360_v11  ;;  %v1447_v47 = vmul.f32 0.03125, %v1261_v23 }
 0x1f9   :  { %2742 = vrsqrt.f32 %v1541_v40 }
 0x1fa   :  { %v1544_v14 = vadd.f32 1e-05, %v1480_v10  ;;  %v1511_v48 = vadd.f32 1e-05, %v1447_v47 }
 0x1fb   :  { %v1270_v46 = vpop.xlane.xlu1 %1269  ;;  %v1357_v52 = vpop.xlane.xlu0 %1356 }
 0x1fc   :  { %2744 = vrsqrt.f32 %v1544_v14  ;;  %v1450_v43 = vmul.f32 0.03125, %v1270_v46  ;;  %v1479_v37 = vmul.f32 0.03125, %v1357_v52  ;;  %v5310_v46 = vld [vmem:[#allocation15_spill] sm:$0xff] }
 0x1fd   :  { %v2735_v60 = vpop.eup %2734  ;;  %2746 = vrsqrt.f32 %v1511_v48 }
 0x1fe   :  { %v1638_v27 = vmul.f32 %v2735_v60, %v3818_v9  ;;  %v1514_v17 = vadd.f32 1e-05, %v1450_v43  ;;  %v1543_v61 = vadd.f32 1e-05, %v1479_v37 }
 0x1ff   :  { %v1366_v7 = vpop.xlane.xlu1 %1365  ;;  %v1267_v14 = vpop.xlane.xlu0 %1266 }
 0x200   :  { %v1709_v31 = vmul.f32 %v4201_v24, %v1638_v27  ;;  %2748 = vrsqrt.f32 %v1514_v17  ;;  %v1482_v40 = vmul.f32 0.03125, %v1366_v7  ;;  %v1449_v11 = vmul.f32 0.03125, %v1267_v14 }
 0x201   :  { %v2737_v23 = vpop.eup %2736  ;;  %2750 = vrsqrt.f32 %v1543_v61 }
 0x202   :  { %v2739_v10 = vpop.eup %2738  ;;  %v1780_v47 = vadd.f32 %v4207_v1, %v1709_v31  ;;  %v1670_v9 = vmul.f32 %v2737_v23, %v3815_v45  ;;  %v1546_v60 = vadd.f32 1e-05, %v1482_v40  ;;  %v1513_v48 = vadd.f32 1e-05, %v1449_v11  ;;  %v5311_v40 = vld [vmem:[#allocation16_spill] sm:$0xff] }
 0x203   :  { %v1637_v52 = vmul.f32 %v2739_v10, %v5310_v46  ;;  %v1276_v43 = vpop.xlane.xlu1 %1275  ;;  %v1363_v37 = vpop.xlane.xlu0 %1362 }
 0x204   :  { %v1844_v54 = vmul.f32 %v1780_v47, %v1780_v47  ;;  %v1741_v44 = vmul.f32 %v4201_v24, %v1670_v9  ;;  %2752 = vrsqrt.f32 %v1546_v60  ;;  %v1452_v61 = vmul.f32 0.03125, %v1276_v43 }
 0x205   :  { %v2741_v27 = vpop.eup %2740  ;;  %v1708_v17 = vmul.f32 %v4201_v24, %v1637_v52  ;;  %2754 = vrsqrt.f32 %v1513_v48  ;;  %v1481_v7 = vmul.f32 0.03125, %v1363_v37  ;;  %v4233_v51 = vmul.f32 0.5, %v1780_v47 }
 0x206   :  { %v2743_v14 = vpop.eup %2742  ;;  %v1972_v31 = vmul.f32 0.044715, %v1844_v54  ;;  %v1812_v45 = vadd.f32 %v4207_v1, %v1741_v44  ;;  %v1640_v11 = vmul.f32 %v2741_v27, %v5311_v40  ;;  %v1516_v46 = vadd.f32 1e-05, %v1452_v61 }
 0x207   :  { %v1779_v23 = vadd.f32 %v4207_v1, %v1708_v17  ;;  %v1669_v10 = vmul.f32 %v2743_v14, %v3836_v4  ;;  %v4219_v30 = vpop.xlane.xlu1 %1371  ;;  %v4221_v9 = vpop.xlane.xlu0 %1272  ;;  %v1545_v44 = vadd.f32 1e-05, %v1481_v7 }
 0x208   :  { %v2036_v60 = vmul.f32 %v1972_v31, %v1780_v47  ;;  %v1876_v52 = vmul.f32 %v1812_v45, %v1812_v45  ;;  %v1711_v48 = vmul.f32 %v4201_v24, %v1640_v11  ;;  %2756 = vrsqrt.f32 %v1516_v46 }
 0x209   :  { %v2745_v43 = vpop.eup %2744  ;;  %v1843_v37 = vmul.f32 %v1779_v23, %v1779_v23  ;;  %v1740_v54 = vmul.f32 %v4201_v24, %v1669_v10  ;;  %2758 = vrsqrt.f32 %v1545_v44 }
 0x20a   :  { %v2747_v27 = vpop.eup %2746  ;;  %v2100_v40 = vadd.f32 %v2036_v60, %v1780_v47  ;;  %v2004_v17 = vmul.f32 0.044715, %v1876_v52  ;;  %v1782_v4 = vadd.f32 %v4207_v1, %v1711_v48  ;;  %v1672_v61 = vmul.f32 %v2745_v43, %v3839_v32 }
 0x20b   :  { %v1971_v14 = vmul.f32 0.044715, %v1843_v37  ;;  %v1811_v5 = vadd.f32 %v4207_v1, %v1740_v54  ;;  %v1639_v31 = vmul.f32 %v2747_v27, %v3850_v33  ;;  %v4229_v58 = vpop.xlane.xlu1 %1281  ;;  %v4231_v11 = vpop.xlane.xlu0 %1368 }
 0x20c   :  { %v2164_v10 = vmul.f32 0.7978846, %v2100_v40  ;;  %v2068_v7 = vmul.f32 %v2004_v17, %v1812_v45  ;;  %v1846_v46 = vmul.f32 %v1782_v4, %v1782_v4  ;;  %v1743_v48 = vmul.f32 %v4201_v24, %v1672_v61 }
 0x20d   :  { %v2749_v60 = vpop.eup %2748  ;;  %v2035_v52 = vmul.f32 %v1971_v14, %v1779_v23  ;;  %v1875_v13 = vmul.f32 %v1811_v5, %v1811_v5  ;;  %v1710_v33 = vmul.f32 %v4201_v24, %v1639_v31 }
 0x20e   :  { %v2751_v32 = vpop.eup %2750  ;;  %2760 = vtanh.f32 %v2164_v10  ;;  %v2132_v43 = vadd.f32 %v2068_v7, %v1812_v45  ;;  %v1974_v37 = vmul.f32 0.044715, %v1846_v46  ;;  %v1814_v47 = vadd.f32 %v4207_v1, %v1743_v48 }
 0x20f   :  { %v2099_v54 = vadd.f32 %v2035_v52, %v1779_v23  ;;  %v2003_v27 = vmul.f32 0.044715, %v1875_v13  ;;  %v1642_v40 = vmul.f32 %v2749_v60, %v3860_v53  ;;  %v4239_v17 = vpop.xlane.xlu1 %1377  ;;  %v1781_v8 = vadd.f32 %v4207_v1, %v1710_v33  ;;  %v4243_v61 = vpop.xlane.xlu0 %1278 }
 0x210   :  { %v2196_v41 = vmul.f32 0.7978846, %v2132_v43  ;;  %v2038_v14 = vmul.f32 %v1974_v37, %v1782_v4  ;;  %v1671_v44 = vmul.f32 %v2751_v32, %v3847_v35  ;;  %v4245_v7 = vmul.f32 0.5, %v1812_v45 }
 0x211   :  { %v2753_v10 = vpop.eup %2752  ;;  %v2163_v31 = vmul.f32 0.7978846, %v2099_v54  ;;  %v2067_v46 = vmul.f32 %v2003_v27, %v1811_v5  ;;  %v1878_v13 = vmul.f32 %v1814_v47, %v1814_v47  ;;  %v4247_v48 = vmul.f32 0.5, %v1779_v23 }
 0x212   :  { %v2755_v52 = vpop.eup %2754  ;;  %2762 = vtanh.f32 %v2196_v41  ;;  %v2102_v53 = vadd.f32 %v2038_v14, %v1782_v4  ;;  %v1845_v60 = vmul.f32 %v1781_v8, %v1781_v8  ;;  %v1713_v33 = vmul.f32 %v4201_v24, %v1642_v40 }
 0x213   :  { %2764 = vtanh.f32 %v2163_v31  ;;  %v2131_v43 = vadd.f32 %v2067_v46, %v1811_v5  ;;  %v2006_v37 = vmul.f32 0.044715, %v1878_v13  ;;  %v4250_v35 = vpop.xlane.xlu1 %1287  ;;  %v1742_v45 = vmul.f32 %v4201_v24, %v1671_v44  ;;  %v4260_v13 = vpop.xlane.xlu0 %1374 }
 0x214   :  { %v2166_v32 = vmul.f32 0.7978846, %v2102_v53  ;;  %v1973_v12 = vmul.f32 0.044715, %v1845_v60  ;;  %v1674_v54 = vmul.f32 %v2753_v10, %v3871_v55  ;;  %v1784_v41 = vadd.f32 %v4207_v1, %v1713_v33 }
 0x215   :  { %v2195_v27 = vmul.f32 0.7978846, %v2131_v43  ;;  %v2070_v39 = vmul.f32 %v2006_v37, %v1814_v47  ;;  %v1641_v23 = vmul.f32 %v2755_v52, %v3863_v0  ;;  %v2757_v14 = vpop.eup %2756  ;;  %v4257_v46 = vadd.f32 %v4207_v1, %v1742_v45 }
 0x216   :  { %2766 = vtanh.f32 %v2166_v32  ;;  %v2037_v31 = vmul.f32 %v1973_v12, %v1781_v8  ;;  %v1745_v40 = vmul.f32 %v4201_v24, %v1674_v54  ;;  %v4262_v53 = vmul.f32 0.5, %v1782_v4  ;;  %v2759_v32 = vpop.eup %2758 }
 0x217   :  { %2768 = vtanh.f32 %v2195_v27  ;;  %v2134_v55 = vadd.f32 %v2070_v39, %v1814_v47  ;;  %v1848_v44 = vmul.f32 %v1784_v41, %v1784_v41  ;;  %v4264_v10 = vmul.f32 0.5, %v1811_v5  ;;  %v4273_v4 = vpop.xlane.xlu1 %1383 }
 0x218   :  { %v2101_v60 = vadd.f32 %v2037_v31, %v1781_v8  ;;  %v1877_v0 = vmul.f32 %v4257_v46, %v4257_v46  ;;  %v4269_v12 = vadd.f32 %v4207_v1, %v1745_v40  ;;  %v1712_v37 = vmul.f32 %v4201_v24, %v1641_v23 }
 0x219   :  { %v2198_v52 = vmul.f32 0.7978846, %v2134_v55  ;;  %v1976_v43 = vmul.f32 0.044715, %v1848_v44  ;;  %v1644_v33 = vmul.f32 %v2757_v14, %v3884_v6  ;;  %v4275_v39 = vmul.f32 0.5, %v1814_v47  ;;  %v4284_v47 = vpop.xlane.xlu0 %1284 }
 0x21a   :  { %v2165_v5 = vmul.f32 0.7978846, %v2101_v60  ;;  %v2005_v45 = vmul.f32 0.044715, %v1877_v0  ;;  %v1880_v54 = vmul.f32 %v4269_v12, %v4269_v12  ;;  %v4280_v40 = vadd.f32 %v4207_v1, %v1712_v37 }
 0x21b   :  { %v2761_v27 = vpop.eup %2760  ;;  %2770 = vtanh.f32 %v2198_v52  ;;  %v2040_v31 = vmul.f32 %v1976_v43, %v1784_v41  ;;  %v1715_v23 = vmul.f32 %v4201_v24, %v1644_v33  ;;  %v4286_v44 = vmul.f32 0.5, %v1781_v8  ;;  %v4301_v59 = vpop.xlane.xlu1 %1293 }
 0x21c   :  { %v2292_v55 = vadd.f32 1.0, %v2761_v27  ;;  %2772 = vtanh.f32 %v2165_v5  ;;  %v2069_v6 = vmul.f32 %v2005_v45, %v4257_v46  ;;  %v2008_v14 = vmul.f32 0.044715, %v1880_v54 }
 0x21d   :  { %v2104_v60 = vadd.f32 %v2040_v31, %v1784_v41  ;;  %v1847_v0 = vmul.f32 %v4280_v40, %v4280_v40  ;;  %v4291_v52 = vadd.f32 %v4207_v1, %v1715_v23  ;;  %v1673_v5 = vmul.f32 %v2759_v32, %v3874_v57  ;;  %v1381_v28 = vpop.xlane.xlu0 %1380 }
 0x21e   :  { %v2356_v43 = vmul.f32 %v2292_v55, %v4233_v51  ;;  %v2133_v37 = vadd.f32 %v2069_v6, %v4257_v46  ;;  %v2072_v33 = vmul.f32 %v2008_v14, %v4269_v12  ;;  %v4297_v54 = vmul.f32 0.5, %v1784_v41 }
 0x21f   :  { %v2763_v45 = vpop.eup %2762  ;;  %v2168_v8 = vmul.f32 0.7978846, %v2104_v60  ;;  %v1975_v27 = vmul.f32 0.044715, %v1847_v0  ;;  %v1850_v31 = vmul.f32 %v4291_v52, %v4291_v52  ;;  %v1744_v41 = vmul.f32 %v4201_v24, %v1673_v5 }
 0x220   :  { %v2765_v23 = vpop.eup %2764  ;;  %2420 = vst.msk [vmem:[%s5204_s6 + $0x8] sm:$0xff] %vm91_vm0, %v2356_v43  ;;  %v2324_v51 = vadd.f32 1.0, %v2763_v45  ;;  %v2197_v55 = vmul.f32 0.7978846, %v2133_v37  ;;  %v2136_v57 = vadd.f32 %v2072_v33, %v4269_v12  ;;  %v1484_v45 = vmul.f32 0.03125, %v4219_v30 }
 0x221   :  { %v2291_v32 = vadd.f32 1.0, %v2765_v23  ;;  %2774 = vtanh.f32 %v2168_v8  ;;  %v2039_v6 = vmul.f32 %v1975_v27, %v4280_v40  ;;  %v1978_v14 = vmul.f32 0.044715, %v1850_v31 }
 0x222   :  { %v2388_v60 = vmul.f32 %v2324_v51, %v4245_v7  ;;  %2776 = vtanh.f32 %v2197_v55  ;;  %v2200_v0 = vmul.f32 0.7978846, %v2136_v57  ;;  %v4312_v36 = vadd.f32 %v4207_v1, %v1744_v41  ;;  %v1390_v55 = vpop.xlane.xlu1 %1389 }
 0x223   :  { %v2767_v43 = vpop.eup %2766  ;;  %v2355_v37 = vmul.f32 %v2291_v32, %v4247_v48  ;;  %v2103_v33 = vadd.f32 %v2039_v6, %v4280_v40  ;;  %v2042_v5 = vmul.f32 %v1978_v14, %v4291_v52  ;;  %v4323_v27 = vmul.f32 0.5, %v4257_v46 }
 0x224   :  { %v2769_v8 = vpop.eup %2768  ;;  %2452 = vst.msk [vmem:[%s5204_s6 + $0x108] sm:$0xff] %vm91_vm0, %v2388_v60  ;;  %v2294_v7 = vadd.f32 1.0, %v2767_v43  ;;  %2778 = vtanh.f32 %v2200_v0  ;;  %v1879_v48 = vmul.f32 %v4312_v36, %v4312_v36  ;;  %v1548_v51 = vadd.f32 1e-05, %v1484_v45 }
 0x225   :  { %2419 = vst.msk [vmem:[%s5204_s6] sm:$0xff] %vm91_vm0, %v2355_v37  ;;  %v2323_v30 = vadd.f32 1.0, %v2769_v8  ;;  %v2167_v31 = vmul.f32 0.7978846, %v2103_v33  ;;  %v2106_v23 = vadd.f32 %v2042_v5, %v4291_v52  ;;  %v1451_v46 = vmul.f32 0.03125, %v4221_v9  ;;  %v1291_v9 = vpop.xlane.xlu0 %1290 }
 0x226   :  { %v2358_v57 = vmul.f32 %v2294_v7, %v4262_v53  ;;  %v2007_v41 = vmul.f32 0.044715, %v1879_v48  ;;  %v1454_v32 = vmul.f32 0.03125, %v4229_v58  ;;  %v1483_v60 = vmul.f32 0.03125, %v4231_v11 }
 0x227   :  { %v2387_v6 = vmul.f32 %v2323_v30, %v4264_v10  ;;  %2780 = vtanh.f32 %v2167_v31  ;;  %v2170_v14 = vmul.f32 0.7978846, %v2106_v23  ;;  %v1515_v53 = vadd.f32 1e-05, %v1451_v46  ;;  %v1300_v31 = vpop.xlane.xlu1 %1299 }
 0x228   :  { %v2771_v0 = vpop.eup %2770  ;;  %2422 = vst.msk [vmem:[%s5204_s6 + $0x18] sm:$0xff] %vm91_vm0, %v2358_v57  ;;  %v2071_v43 = vmul.f32 %v2007_v41, %v4312_v36  ;;  %2782 = vrsqrt.f32 %v1548_v51  ;;  %v1518_v37 = vadd.f32 1e-05, %v1454_v32  ;;  %v1547_v11 = vadd.f32 1e-05, %v1483_v60 }
 0x229   :  { %v2773_v33 = vpop.eup %2772  ;;  %2451 = vst.msk [vmem:[%s5204_s6 + $0x100] sm:$0xff] %vm91_vm0, %v2387_v6  ;;  %v2326_v58 = vadd.f32 1.0, %v2771_v0  ;;  %2784 = vtanh.f32 %v2170_v14  ;;  %v1486_v10 = vmul.f32 0.03125, %v4239_v17  ;;  %v1453_v8 = vmul.f32 0.03125, %v4243_v61  ;;  %v1387_v32 = vpop.xlane.xlu0 %1386 }
 0x22a   :  { %v2293_v5 = vadd.f32 1.0, %v2773_v33  ;;  %v2135_v45 = vadd.f32 %v2071_v43, %v4312_v36  ;;  %2786 = vrsqrt.f32 %v1515_v53  ;;  %v1456_v30 = vmul.f32 0.03125, %v4250_v35 }
 0x22b   :  { %v2390_v7 = vmul.f32 %v2326_v58, %v4275_v39  ;;  %2788 = vrsqrt.f32 %v1518_v37  ;;  %v1550_v48 = vadd.f32 1e-05, %v1486_v10  ;;  %v1517_v57 = vadd.f32 1e-05, %v1453_v8  ;;  %v1396_v58 = vpop.xlane.xlu1 %1395 }
 0x22c   :  { %v2357_v23 = vmul.f32 %v2293_v5, %v4286_v44  ;;  %v2199_v51 = vmul.f32 0.7978846, %v2135_v45  ;;  %2790 = vrsqrt.f32 %v1547_v11  ;;  %v1520_v17 = vadd.f32 1e-05, %v1456_v30 }
 0x22d   :  { %2454 = vst.msk [vmem:[%s5204_s6 + $0x118] sm:$0xff] %vm91_vm0, %v2390_v7  ;;  %2792 = vrsqrt.f32 %v1550_v48  ;;  %v1485_v61 = vmul.f32 0.03125, %v4260_v13  ;;  %v1488_v39 = vmul.f32 0.03125, %v4273_v4  ;;  %v1455_v35 = vmul.f32 0.03125, %v4284_v47 }
 0x22e   :  { %v2775_v41 = vpop.eup %2774  ;;  %2421 = vst.msk [vmem:[%s5204_s6 + $0x10] sm:$0xff] %vm91_vm0, %v2357_v23  ;;  %2794 = vtanh.f32 %v2199_v51  ;;  %v1458_v44 = vmul.f32 0.03125, %v4301_v59  ;;  %v1487_v46 = vmul.f32 0.03125, %v1381_v28  ;;  %v1944_v4 = vmul.f32 0.5, %v4269_v12 }
 0x22f   :  { %v2777_v6 = vpop.eup %2776  ;;  %v2296_v14 = vadd.f32 1.0, %v2775_v41  ;;  %2796 = vrsqrt.f32 %v1517_v57  ;;  %v1549_v60 = vadd.f32 1e-05, %v1485_v61  ;;  %v1552_v13 = vadd.f32 1e-05, %v1488_v39 }
 0x230   :  { %v2325_v0 = vadd.f32 1.0, %v2777_v6  ;;  %2798 = vrsqrt.f32 %v1520_v17  ;;  %v1519_v43 = vadd.f32 1e-05, %v1455_v35  ;;  %v1522_v33 = vadd.f32 1e-05, %v1458_v44  ;;  %v1306_v35 = vpop.xlane.xlu1 %1305 }
 0x231   :  { %v2779_v53 = vpop.eup %2778  ;;  %v2360_v37 = vmul.f32 %v2296_v14, %v4297_v54  ;;  %2800 = vrsqrt.f32 %v1549_v60  ;;  %v1490_v47 = vmul.f32 0.03125, %v1390_v55  ;;  %v1551_v11 = vadd.f32 1e-05, %v1487_v46 }
 0x232   :  { %v2389_v28 = vmul.f32 %v2325_v0, %v4323_v27  ;;  %v2328_v59 = vadd.f32 1.0, %v2779_v53  ;;  %v1457_v10 = vmul.f32 0.03125, %v1291_v9  ;;  %v1911_v12 = vmul.f32 0.5, %v4280_v40  ;;  %v1297_v9 = vpop.xlane.xlu0 %1296 }
 0x233   :  { %2424 = vst.msk [vmem:[%s5204_s6 + $0x28] sm:$0xff] %vm91_vm0, %v2360_v37  ;;  %2802 = vrsqrt.f32 %v1552_v13  ;;  %v1460_v5 = vmul.f32 0.03125, %v1300_v31  ;;  %v1554_v27 = vadd.f32 1e-05, %v1490_v47  ;;  %v1489_v55 = vmul.f32 0.03125, %v1387_v32 }
 0x234   :  { %v2781_v45 = vpop.eup %2780  ;;  %2453 = vst.msk [vmem:[%s5204_s6 + $0x110] sm:$0xff] %vm91_vm0, %v2389_v28  ;;  %v2392_v54 = vmul.f32 %v2328_v59, %v1944_v4  ;;  %2804 = vrsqrt.f32 %v1519_v43  ;;  %v1521_v48 = vadd.f32 1e-05, %v1457_v10  ;;  %v1492_v30 = vmul.f32 0.03125, %v1396_v58 }
 0x235   :  { %v2783_v8 = vpop.eup %2782  ;;  %v2295_v7 = vadd.f32 1.0, %v2781_v45  ;;  %2806 = vrsqrt.f32 %v1522_v33  ;;  %v1914_v40 = vmul.f32 0.5, %v4291_v52  ;;  %v1943_v31 = vmul.f32 0.5, %v4312_v36 }
 0x236   :  { %v2785_v23 = vpop.eup %2784  ;;  %2456 = vst.msk [vmem:[%s5204_s6 + $0x128] sm:$0xff] %vm91_vm0, %v2392_v54  ;;  %v1676_v51 = vmul.f32 %v2783_v8, %v3895_v15  ;;  %2808 = vrsqrt.f32 %v1551_v11  ;;  %v1524_v39 = vadd.f32 1e-05, %v1460_v5  ;;  %v1459_v41 = vmul.f32 0.03125, %v1297_v9 }
 0x237   :  { %v2787_v57 = vpop.eup %2786  ;;  %v2359_v17 = vmul.f32 %v2295_v7, %v1911_v12  ;;  %v2298_v61 = vadd.f32 1.0, %v2785_v23  ;;  %2810 = vrsqrt.f32 %v1554_v27  ;;  %v1553_v6 = vadd.f32 1e-05, %v1489_v55  ;;  %v1393_v7 = vpop.xlane.xlu0 %1392 }
 0x238   :  { %v2789_v44 = vpop.eup %2788  ;;  %v1747_v46 = vmul.f32 %v4201_v24, %v1676_v51  ;;  %v1643_v32 = vmul.f32 %v2787_v57, %v3887_v50  ;;  %2812 = vrsqrt.f32 %v1521_v48  ;;  %v1556_v52 = vadd.f32 1e-05, %v1492_v30 }
 0x239   :  { %v2791_v14 = vpop.eup %2790  ;;  %2423 = vst.msk [vmem:[%s5204_s6 + $0x20] sm:$0xff] %vm91_vm0, %v2359_v17  ;;  %v2362_v15 = vmul.f32 %v2298_v61, %v1914_v40  ;;  %v1646_v36 = vmul.f32 %v2789_v44, %v3908_v29  ;;  %v1462_v4 = vmul.f32 0.03125, %v1306_v35  ;;  %2814 = vrsqrt.f32 %v1524_v39 }
 0x23a   :  { %v2793_v60 = vpop.eup %2792  ;;  %v1818_v13 = vadd.f32 %v4207_v1, %v1747_v46  ;;  %v1714_v0 = vmul.f32 %v4201_v24, %v1643_v32  ;;  %v1675_v50 = vmul.f32 %v2791_v14, %v3898_v16  ;;  %v1523_v37 = vadd.f32 1e-05, %v1459_v41 }
 0x23b   :  { %v2795_v43 = vpop.eup %2794  ;;  %2426 = vst.msk [vmem:[%s5204_s6 + $0x38] sm:$0xff] %vm91_vm0, %v2362_v15  ;;  %v1717_v53 = vmul.f32 %v4201_v24, %v1646_v36  ;;  %v1678_v29 = vmul.f32 %v2793_v60, %v3919_v38  ;;  %2816 = vrsqrt.f32 %v1553_v6  ;;  %v4406_v27 = vadd.f32 1e-05, %v1462_v4 }
 0x23c   :  { %v2797_v33 = vpop.eup %2796  ;;  %v2327_v47 = vadd.f32 1.0, %v2795_v43  ;;  %v1882_v58 = vmul.f32 %v1818_v13, %v1818_v13  ;;  %v1785_v28 = vadd.f32 %v4207_v1, %v1714_v0  ;;  %v1746_v11 = vmul.f32 %v4201_v24, %v1675_v50 }
 0x23d   :  { %v2799_v16 = vpop.eup %2798  ;;  %v4401_v59 = vadd.f32 %v4207_v1, %v1717_v53  ;;  %v1749_v10 = vmul.f32 %v4201_v24, %v1678_v29  ;;  %v1645_v12 = vmul.f32 %v2797_v33, %v3911_v18  ;;  %2818 = vrsqrt.f32 %v1556_v52 }
 0x23e   :  { %v2801_v5 = vpop.eup %2800  ;;  %v2391_v38 = vmul.f32 %v2327_v47, %v1943_v31  ;;  %v2010_v45 = vmul.f32 0.044715, %v1882_v58  ;;  %v1849_v54 = vmul.f32 %v1785_v28, %v1785_v28  ;;  %v4411_v9 = vadd.f32 %v4207_v1, %v1746_v11 }
 0x23f   :  { %v1852_v55 = vmul.f32 %v4401_v59, %v4401_v59  ;;  %v4414_v8 = vadd.f32 %v4207_v1, %v1749_v10  ;;  %v1716_v23 = vmul.f32 %v4201_v24, %v1645_v12  ;;  %v1648_v40 = vmul.f32 %v2799_v16, %v3932_v56 }
 0x240   :  { %v2803_v48 = vpop.eup %2802  ;;  %2455 = vst.msk [vmem:[%s5204_s6 + $0x120] sm:$0xff] %vm91_vm0, %v2391_v38  ;;  %v2074_v18 = vmul.f32 %v2010_v45, %v1818_v13  ;;  %v1977_v30 = vmul.f32 0.044715, %v1849_v54  ;;  %v1881_v57 = vmul.f32 %v4411_v9, %v4411_v9  ;;  %2820 = vrsqrt.f32 %v1523_v37 }
 0x241   :  { %v2805_v31 = vpop.eup %2804  ;;  %v1980_v51 = vmul.f32 0.044715, %v1852_v55  ;;  %v1884_v17 = vmul.f32 %v4414_v8, %v4414_v8  ;;  %v4427_v35 = vadd.f32 %v4207_v1, %v1716_v23  ;;  %v4429_v44 = vmul.f32 0.03125, %v1393_v7 }
 0x242   :  { %v2807_v61 = vpop.eup %2806  ;;  %v2138_v39 = vadd.f32 %v2074_v18, %v1818_v13  ;;  %v2041_v41 = vmul.f32 %v1977_v30, %v1785_v28  ;;  %v2009_v32 = vmul.f32 0.044715, %v1881_v57  ;;  %v1719_v14 = vmul.f32 %v4201_v24, %v1648_v40 }
 0x243   :  { %v2809_v46 = vpop.eup %2808  ;;  %v2044_v56 = vmul.f32 %v1980_v51, %v4401_v59  ;;  %v2012_v6 = vmul.f32 0.044715, %v1884_v17  ;;  %v4433_v15 = vmul.f32 0.5, %v1818_v13  ;;  %v1851_v60 = vmul.f32 %v4427_v35, %v4427_v35 }
 0x244   :  { %v2202_v36 = vmul.f32 0.7978846, %v2138_v39  ;;  %v2105_v52 = vadd.f32 %v2041_v41, %v1785_v28  ;;  %v2811_v0 = vpop.eup %2810  ;;  %v2073_v4 = vmul.f32 %v2009_v32, %v4411_v9  ;;  %v1790_v53 = vadd.f32 %v4207_v1, %v1719_v14 }
 0x245   :  { %v2108_v50 = vadd.f32 %v2044_v56, %v4401_v59  ;;  %v2076_v43 = vmul.f32 %v2012_v6, %v4414_v8  ;;  %v2813_v29 = vpop.eup %2812  ;;  %v1979_v33 = vmul.f32 0.044715, %v1851_v60  ;;  %v1677_v13 = vmul.f32 %v2801_v5, %v3922_v42 }
 0x246   :  { %2822 = vtanh.f32 %v2202_v36  ;;  %v2169_v37 = vmul.f32 0.7978846, %v2105_v52  ;;  %v2137_v58 = vadd.f32 %v2073_v4, %v4411_v9  ;;  %v1854_v11 = vmul.f32 %v1790_v53, %v1790_v53  ;;  %v4444_v10 = vpop.eup %2814 }
 0x247   :  { %v2172_v47 = vmul.f32 0.7978846, %v2108_v50  ;;  %v2140_v16 = vadd.f32 %v2076_v43, %v4414_v8  ;;  %v4446_v12 = vmul.f32 0.5, %v1785_v28  ;;  %v2043_v38 = vmul.f32 %v1979_v33, %v4427_v35 }
 0x248   :  { %2824 = vtanh.f32 %v2169_v37  ;;  %v1748_v45 = vmul.f32 %v4201_v24, %v1677_v13  ;;  %v4450_v54 = vpop.eup %2816  ;;  %v2201_v55 = vmul.f32 0.7978846, %v2137_v58  ;;  %v1982_v5 = vmul.f32 0.044715, %v1854_v11 }
 0x249   :  { %2826 = vtanh.f32 %v2172_v47  ;;  %v2204_v42 = vmul.f32 0.7978846, %v2140_v16  ;;  %v2107_v7 = vadd.f32 %v2043_v38, %v4427_v35  ;;  %v1680_v30 = vmul.f32 %v2803_v48, %v3943_v2  ;;  %v4508_v38 = vpop.xlane.xlu0 %1302 }
 0x24a   :  { %v4454_v18 = vadd.f32 %v4207_v1, %v1748_v45  ;;  %v1647_v28 = vmul.f32 %v2805_v31, %v3935_v22  ;;  %2828 = vtanh.f32 %v2201_v55  ;;  %v2046_v23 = vmul.f32 %v1982_v5, %v1790_v53  ;;  %v4460_v57 = vpop.eup %2818 }
 0x24b   :  { %v1650_v40 = vmul.f32 %v2807_v61, %v3956_v20  ;;  %v1679_v51 = vmul.f32 %v2809_v46, %v3946_v3  ;;  %v1916_v17 = vmul.f32 0.5, %v4401_v59  ;;  %2830 = vtanh.f32 %v2204_v42 }
 0x24c   :  { %v2171_v39 = vmul.f32 0.7978846, %v2107_v7  ;;  %v1883_v41 = vmul.f32 %v4454_v18, %v4454_v18  ;;  %v2110_v56 = vadd.f32 %v2046_v23, %v1790_v53  ;;  %v1751_v2 = vmul.f32 %v4201_v24, %v1680_v30 }
 0x24d   :  { %v1718_v22 = vmul.f32 %v4201_v24, %v1647_v28  ;;  %v1721_v48 = vmul.f32 %v4201_v24, %v1650_v40  ;;  %v4468_v31 = vpop.eup %2820  ;;  %v1750_v20 = vmul.f32 %v4201_v24, %v1679_v51  ;;  %v1682_v59 = vmul.f32 %v2811_v0, %v3967_v26 }
 0x24e   :  { %2832 = vtanh.f32 %v2171_v39  ;;  %v2011_v3 = vmul.f32 0.044715, %v1883_v41  ;;  %v2174_v61 = vmul.f32 0.7978846, %v2110_v56  ;;  %v4473_v46 = vadd.f32 %v4207_v1, %v1751_v2 }
 0x24f   :  { %v4476_v32 = vadd.f32 %v4207_v1, %v1718_v22  ;;  %v4479_v6 = vadd.f32 %v4207_v1, %v1721_v48  ;;  %v1945_v14 = vmul.f32 0.5, %v4411_v9  ;;  %v4484_v52 = vadd.f32 %v4207_v1, %v1750_v20 }
 0x250   :  { %v2075_v36 = vmul.f32 %v2011_v3, %v4454_v18  ;;  %v1753_v60 = vmul.f32 %v4201_v24, %v1682_v59  ;;  %2834 = vtanh.f32 %v2174_v61  ;;  %v1886_v26 = vmul.f32 %v4473_v46, %v4473_v46 }
 0x251   :  { %v1853_v0 = vmul.f32 %v4476_v32, %v4476_v32  ;;  %v1649_v50 = vmul.f32 %v2813_v29, %v3959_v25  ;;  %v1948_v4 = vmul.f32 0.5, %v4414_v8  ;;  %v4494_v9 = vmul.f32 0.5, %v4427_v35  ;;  %v4506_v35 = vpop.xlane.xlu1 %1401 }
 0x252   :  { %v2139_v43 = vadd.f32 %v2075_v36, %v4454_v18  ;;  %v1856_v37 = vmul.f32 %v4479_v6, %v4479_v6  ;;  %v4499_v13 = vmul.f32 0.5, %v1790_v53  ;;  %v2014_v47 = vmul.f32 0.044715, %v1886_v26 }
 0x253   :  { %v2823_v33 = vpop.eup %2822  ;;  %v1981_v58 = vmul.f32 0.044715, %v1853_v0  ;;  %v1885_v16 = vmul.f32 %v4484_v52, %v4484_v52  ;;  %v4504_v8 = vadd.f32 %v4207_v1, %v1753_v60  ;;  %v1720_v5 = vmul.f32 %v4201_v24, %v1649_v50  ;;  %v4536_v50 = vpop.xlane.xlu0 %1398 }
 0x254   :  { %v2330_v11 = vadd.f32 1.0, %v2823_v33  ;;  %v2203_v25 = vmul.f32 0.7978846, %v2139_v43  ;;  %v1984_v29 = vmul.f32 0.044715, %v1856_v37  ;;  %v2078_v55 = vmul.f32 %v2014_v47, %v4473_v46 }
 0x255   :  { %v2825_v45 = vpop.eup %2824  ;;  %v2045_v53 = vmul.f32 %v1981_v58, %v4476_v32  ;;  %v2013_v42 = vmul.f32 0.044715, %v1885_v16  ;;  %v1888_v48 = vmul.f32 %v4504_v8, %v4504_v8  ;;  %v4534_v0 = vpop.xlane.xlu1 %1311  ;;  %v4543_v37 = vadd.f32 %v4207_v1, %v1720_v5 }
 0x256   :  { %v2827_v7 = vpop.eup %2826  ;;  %v2394_v30 = vmul.f32 %v2330_v11, %v4433_v15  ;;  %v2297_v28 = vadd.f32 1.0, %v2825_v45  ;;  %2836 = vtanh.f32 %v2203_v25  ;;  %v2048_v23 = vmul.f32 %v1984_v29, %v4479_v6 }
 0x257   :  { %v2300_v40 = vadd.f32 1.0, %v2827_v7  ;;  %v2142_v51 = vadd.f32 %v2078_v55, %v4473_v46  ;;  %v2109_v39 = vadd.f32 %v2045_v53, %v4476_v32  ;;  %v2077_v41 = vmul.f32 %v2013_v42, %v4484_v52  ;;  %v2829_v56 = vpop.eup %2828  ;;  %v4581_v5 = vpop.xlane.xlu0 %1308 }
 0x258   :  { %2458 = vst.msk [vmem:[%s5204_s6 + $0x138] sm:$0xff] %vm91_vm0, %v2394_v30  ;;  %v2361_v2 = vmul.f32 %v2297_v28, %v4446_v12  ;;  %v4524_v15 = vmul.f32 0.5, %v4454_v18  ;;  %v2112_v22 = vadd.f32 %v2048_v23, %v4479_v6  ;;  %v2831_v3 = vpop.eup %2830  ;;  %v2329_v59 = vadd.f32 1.0, %v2829_v56 }
 0x259   :  { %v2364_v20 = vmul.f32 %v2300_v40, %v1916_v17  ;;  %v2206_v61 = vmul.f32 0.7978846, %v2142_v51  ;;  %v2173_v36 = vmul.f32 0.7978846, %v2109_v39  ;;  %v2332_v60 = vadd.f32 1.0, %v2831_v3 }
 0x25a   :  { %2425 = vst.msk [vmem:[%s5204_s6 + $0x30] sm:$0xff] %vm91_vm0, %v2361_v2  ;;  %v2176_v12 = vmul.f32 0.7978846, %v2112_v22  ;;  %v2141_v18 = vadd.f32 %v2077_v41, %v4484_v52  ;;  %v2016_v26 = vmul.f32 0.044715, %v1888_v48  ;;  %v2393_v17 = vmul.f32 %v2329_v59, %v1945_v14 }
 0x25b   :  { %v2833_v43 = vpop.eup %2832  ;;  %2428 = vst.msk [vmem:[%s5204_s6 + $0x48] sm:$0xff] %vm91_vm0, %v2364_v20  ;;  %2838 = vtanh.f32 %v2206_v61  ;;  %v1652_v33 = vmul.f32 %v4444_v10, %v3980_v49  ;;  %v2396_v47 = vmul.f32 %v2332_v60, %v1948_v4  ;;  %v4552_v11 = vmul.f32 0.5, %v4473_v46  ;;  %v4613_v59 = vpop.xlane.xlu0 %1404 }
 0x25c   :  { %v2299_v58 = vadd.f32 1.0, %v2833_v43  ;;  %2840 = vtanh.f32 %v2173_v36  ;;  %v2205_v16 = vmul.f32 0.7978846, %v2141_v18  ;;  %2457 = vst.msk [vmem:[%s5204_s6 + $0x130] sm:$0xff] %vm91_vm0, %v2393_v17  ;;  %v2080_v14 = vmul.f32 %v2016_v26, %v4504_v8 }
 0x25d   :  { %2842 = vtanh.f32 %v2176_v12  ;;  %v1855_v25 = vmul.f32 %v4543_v37, %v4543_v37  ;;  %v2835_v29 = vpop.eup %2834  ;;  %2460 = vst.msk [vmem:[%s5204_s6 + $0x148] sm:$0xff] %vm91_vm0, %v2396_v47  ;;  %v1723_v10 = vmul.f32 %v4201_v24, %v1652_v33  ;;  %v1681_v46 = vmul.f32 %v4450_v54, %v3970_v34  ;;  %v4579_v54 = vpop.xlane.xlu1 %1407 }
 0x25e   :  { %v2363_v49 = vmul.f32 %v2299_v58, %v4494_v9  ;;  %2844 = vtanh.f32 %v2205_v16  ;;  %v2302_v4 = vadd.f32 1.0, %v2835_v29  ;;  %v2144_v45 = vadd.f32 %v2080_v14, %v4504_v8 }
 0x25f   :  { %v1983_v55 = vmul.f32 0.044715, %v1855_v25  ;;  %v1684_v53 = vmul.f32 %v4460_v57, %v3991_v62  ;;  %v4573_v9 = vadd.f32 %v4207_v1, %v1723_v10  ;;  %v1752_v42 = vmul.f32 %v4201_v24, %v1681_v46 }
 0x260   :  { %2427 = vst.msk [vmem:[%s5204_s6 + $0x40] sm:$0xff] %vm91_vm0, %v2363_v49  ;;  %v1651_v34 = vmul.f32 %v4468_v31, %v3983_v19  ;;  %2846 = vrsqrt.f32 %v4406_v27  ;;  %v2366_v62 = vmul.f32 %v2302_v4, %v4499_v13  ;;  %v2208_v57 = vmul.f32 0.7978846, %v2144_v45 }
 0x261   :  { %v2047_v7 = vmul.f32 %v1983_v55, %v4543_v37  ;;  %v1755_v30 = vmul.f32 %v4201_v24, %v1684_v53  ;;  %v1917_v28 = vmul.f32 0.5, %v4476_v32  ;;  %v1858_v23 = vmul.f32 %v4573_v9, %v4573_v9 }
 0x262   :  { %v4590_v19 = vadd.f32 %v4207_v1, %v1752_v42  ;;  %v1722_v27 = vmul.f32 %v4201_v24, %v1651_v34  ;;  %2430 = vst.msk [vmem:[%s5204_s6 + $0x58] sm:$0xff] %vm91_vm0, %v2366_v62  ;;  %2848 = vtanh.f32 %v2208_v57  ;;  %v1555_v32 = vadd.f32 1e-05, %v4429_v44 }
 0x263   :  { %v2837_v31 = vpop.eup %2836  ;;  %v2111_v13 = vadd.f32 %v2047_v7, %v4543_v37  ;;  %v4599_v40 = vadd.f32 %v4207_v1, %v1755_v30  ;;  %v1920_v39 = vmul.f32 0.5, %v4479_v6  ;;  %v1986_v41 = vmul.f32 0.044715, %v1858_v23  ;;  %v1318_v6 = vpop.xlane.xlu1 %1317 }
 0x264   :  { %v2331_v51 = vadd.f32 1.0, %v2837_v31  ;;  %v1887_v24 = vmul.f32 %v4590_v19, %v4590_v19  ;;  %v1949_v56 = vmul.f32 0.5, %v4484_v52  ;;  %v4609_v48 = vadd.f32 %v4207_v1, %v1722_v27 }
 0x265   :  { %v2175_v2 = vmul.f32 0.7978846, %v2111_v13  ;;  %v1890_v22 = vmul.f32 %v4599_v40, %v4599_v40  ;;  %v2050_v44 = vmul.f32 %v1986_v41, %v4573_v9  ;;  %2850 = vrsqrt.f32 %v1555_v32  ;;  %v4664_v41 = vld [vmem:[%s5203_s5] ss:$0 sm:$0xff] }
 0x266   :  { %v2395_v3 = vmul.f32 %v2331_v51, %v4524_v15  ;;  %v2015_v20 = vmul.f32 0.044715, %v1887_v24  ;;  %v4616_v61 = vmul.f32 0.5, %v4504_v8  ;;  %v1857_v36 = vmul.f32 %v4609_v48, %v4609_v48 }
 0x267   :  { %2852 = vtanh.f32 %v2175_v2  ;;  %v2018_v52 = vmul.f32 0.044715, %v1890_v22  ;;  %v2114_v1 = vadd.f32 %v2050_v44, %v4573_v9  ;;  %v1494_v12 = vmul.f32 0.03125, %v4506_v35  ;;  %v1414_v55 = vpop.xlane.xlu1 %1413 }
 0x268   :  { %v2839_v60 = vpop.eup %2838  ;;  %2459 = vst.msk [vmem:[%s5204_s6 + $0x140] sm:$0xff] %vm91_vm0, %v2395_v3  ;;  %v2079_v15 = vmul.f32 %v2015_v20, %v4590_v19  ;;  %v1461_v8 = vmul.f32 0.03125, %v4508_v38  ;;  %v1985_v17 = vmul.f32 0.044715, %v1857_v36  ;;  %v1464_v33 = vmul.f32 0.03125, %v4534_v0  ;;  %v1315_v0 = vpop.xlane.xlu0 %1314 }
 0x269   :  { %v2841_v18 = vpop.eup %2840  ;;  %v2334_v26 = vadd.f32 1.0, %v2839_v60  ;;  %v2082_v43 = vmul.f32 %v2018_v52, %v4599_v40  ;;  %v2178_v16 = vmul.f32 0.7978846, %v2114_v1  ;;  %v1558_v25 = vadd.f32 1e-05, %v1494_v12 }
 0x26a   :  { %v2843_v47 = vpop.eup %2842  ;;  %v2301_v58 = vadd.f32 1.0, %v2841_v18  ;;  %v2143_v14 = vadd.f32 %v2079_v15, %v4590_v19  ;;  %v2049_v38 = vmul.f32 %v1985_v17, %v4609_v48  ;;  %v1525_v7 = vadd.f32 1e-05, %v1461_v8 }
 0x26b   :  { %v2845_v29 = vpop.eup %2844  ;;  %v2398_v49 = vmul.f32 %v2334_v26, %v4552_v11  ;;  %v2304_v10 = vadd.f32 1.0, %v2843_v47  ;;  %v2146_v35 = vadd.f32 %v2082_v43, %v4599_v40  ;;  %2854 = vtanh.f32 %v2178_v16  ;;  %v1324_v22 = vpop.xlane.xlu1 %1323 }
 0x26c   :  { %v2365_v46 = vmul.f32 %v2301_v58, %v1917_v28  ;;  %v2333_v4 = vadd.f32 1.0, %v2845_v29  ;;  %v2207_v45 = vmul.f32 0.7978846, %v2143_v14  ;;  %v2113_v11 = vadd.f32 %v2049_v38, %v4609_v48  ;;  %v1411_v3 = vpop.xlane.xlu0 %1410  ;;  %v5312_v38 = vld [vmem:[#allocation18_spill] sm:$0xff] }
 0x26d   :  { %v2847_v53 = vpop.eup %2846  ;;  %2462 = vst.msk [vmem:[%s5204_s6 + $0x158] sm:$0xff] %vm91_vm0, %v2398_v49  ;;  %v2368_v42 = vmul.f32 %v2304_v10, %v1920_v39  ;;  %v2210_v34 = vmul.f32 0.7978846, %v2146_v35  ;;  %2856 = vrsqrt.f32 %v1558_v25  ;;  %v1528_v28 = vadd.f32 1e-05, %v1464_v33 }
 0x26e   :  { %2429 = vst.msk [vmem:[%s5204_s6 + $0x50] sm:$0xff] %vm91_vm0, %v2365_v46  ;;  %v2397_v62 = vmul.f32 %v2333_v4, %v1949_v56  ;;  %2858 = vtanh.f32 %v2207_v45  ;;  %v1654_v57 = vmul.f32 %v2847_v53, %v4004_v21  ;;  %v2177_v30 = vmul.f32 0.7978846, %v2113_v11  ;;  %v4656_v21 = vld [vmem:[%s5202_s4] ss:$0 sm:$0xff] }
 0x26f   :  { %2432 = vst.msk [vmem:[%s5204_s6 + $0x68] sm:$0xff] %vm91_vm0, %v2368_v42  ;;  %2860 = vtanh.f32 %v2210_v34  ;;  %v1493_v23 = vmul.f32 0.03125, %v4536_v50  ;;  %v2849_v27 = vpop.eup %2848  ;;  %v1496_v13 = vmul.f32 0.03125, %v4579_v54  ;;  %v1463_v32 = vmul.f32 0.03125, %v4581_v5  ;;  %v1420_v58 = vpop.xlane.xlu1 %1419 }
 0x270   :  { %2461 = vst.msk [vmem:[%s5204_s6 + $0x150] sm:$0xff] %vm91_vm0, %v2397_v62  ;;  %v1725_v31 = vmul.f32 %v4656_v21, %v1654_v57  ;;  %2862 = vrsqrt.f32 %v1525_v7  ;;  %v2336_v51 = vadd.f32 1.0, %v2849_v27  ;;  %v1466_v39 = vmul.f32 0.03125, %v1318_v6  ;;  %v1321_v16 = vpop.xlane.xlu0 %1320  ;;  %v5313_v27 = vld [vmem:[#allocation17_spill] sm:$0xff] }
 0x271   :  { %2864 = vtanh.f32 %v2177_v30  ;;  %v1557_v50 = vadd.f32 1e-05, %v1493_v23  ;;  %v1560_v56 = vadd.f32 1e-05, %v1496_v13  ;;  %v1527_v2 = vadd.f32 1e-05, %v1463_v32 }
 0x272   :  { %v4667_v24 = vadd.f32 %v4664_v41, %v1725_v31  ;;  %2866 = vrsqrt.f32 %v1528_v28  ;;  %v2851_v54 = vpop.eup %2850  ;;  %v2400_v5 = vmul.f32 %v2336_v51, %v4616_v61  ;;  %v1530_v44 = vadd.f32 1e-05, %v1466_v39 }
 0x273   :  { %2868 = vrsqrt.f32 %v1557_v50  ;;  %v1495_v20 = vmul.f32 0.03125, %v4613_v59  ;;  %v1919_v52 = vmul.f32 0.5, %v4543_v37  ;;  %v1683_v60 = vmul.f32 %v2851_v54, %v3994_v63 }
 0x274   :  { %v2853_v6 = vpop.eup %2852  ;;  %v1860_v36 = vmul.f32 %v4667_v24, %v4667_v24  ;;  %2870 = vrsqrt.f32 %v1560_v56  ;;  %2464 = vst.msk [vmem:[%s5204_s6 + $0x168] sm:$0xff] %vm91_vm0, %v2400_v5  ;;  %v1498_v15 = vmul.f32 0.03125, %v1414_v55  ;;  %v1465_v37 = vmul.f32 0.03125, %v1315_v0 }
 0x275   :  { %v2303_v1 = vadd.f32 1.0, %v2853_v6  ;;  %2872 = vrsqrt.f32 %v1527_v2  ;;  %v1559_v61 = vadd.f32 1e-05, %v1495_v20  ;;  %v1754_v59 = vmul.f32 %v4656_v21, %v1683_v60  ;;  %v5315_v6 = vld [vmem:[#allocation19_spill] sm:$0xff] }
 0x276   :  { %v1988_v12 = vmul.f32 0.044715, %v1860_v36  ;;  %2874 = vrsqrt.f32 %v1530_v44  ;;  %v1922_v18 = vmul.f32 0.5, %v4573_v9  ;;  %v1562_v26 = vadd.f32 1e-05, %v1498_v15 }
 0x277   :  { %v2367_v8 = vmul.f32 %v2303_v1, %v1919_v52  ;;  %v1468_v63 = vmul.f32 0.03125, %v1324_v22  ;;  %v1951_v43 = vmul.f32 0.5, %v4590_v19  ;;  %v1954_v17 = vmul.f32 0.5, %v4599_v40 }
 0x278   :  { %v2052_v33 = vmul.f32 %v1988_v12, %v4667_v24  ;;  %v4685_v47 = vadd.f32 %v4664_v41, %v1754_v59  ;;  %v2855_v14 = vpop.eup %2854  ;;  %v1921_v9 = vmul.f32 0.5, %v4609_v48  ;;  %2876 = vrsqrt.f32 %v1559_v61  ;;  %v5316_v12 = vld [vmem:[#allocation22_spill] sm:$0xff] }
 0x279   :  { %2431 = vst.msk [vmem:[%s5204_s6 + $0x60] sm:$0xff] %vm91_vm0, %v2367_v8  ;;  %v1529_v25 = vadd.f32 1e-05, %v1465_v37  ;;  %v1497_v19 = vmul.f32 0.03125, %v1411_v3  ;;  %v2306_v40 = vadd.f32 1.0, %v2855_v14  ;;  %2878 = vrsqrt.f32 %v1562_v26  ;;  %v5314_v3 = vld [vmem:[#allocation20_spill] sm:$0xff] }
 0x27a   :  { %v2857_v29 = vpop.eup %2856  ;;  %v2116_v49 = vadd.f32 %v2052_v33, %v4667_v24  ;;  %v1889_v10 = vmul.f32 %v4685_v47, %v4685_v47  ;;  %v1532_v4 = vadd.f32 1e-05, %v1468_v63  ;;  %v1500_v45 = vmul.f32 0.03125, %v1420_v58  ;;  %v5317_v26 = vld [vmem:[#allocation21_spill] sm:$0xff] }
 0x27b   :  { %v2859_v35 = vpop.eup %2858  ;;  %v1686_v46 = vmul.f32 %v2857_v29, %v5312_v38  ;;  %v1467_v55 = vmul.f32 0.03125, %v1321_v16  ;;  %v2370_v53 = vmul.f32 %v2306_v40, %v1922_v18  ;;  %2880 = vrsqrt.f32 %v1529_v25  ;;  %v5318_v40 = vld [vmem:[#allocation24_spill] sm:$0xff] }
 0x27c   :  { %v2861_v0 = vpop.eup %2860  ;;  %v2335_v48 = vadd.f32 1.0, %v2859_v35  ;;  %v2180_v42 = vmul.f32 0.7978846, %v2116_v49  ;;  %v2017_v34 = vmul.f32 0.044715, %v1889_v10 }
 0x27d   :  { %v2863_v11 = vpop.eup %2862  ;;  %v2338_v62 = vadd.f32 1.0, %v2861_v0  ;;  %v1757_v57 = vmul.f32 %v4656_v21, %v1686_v46  ;;  %v1561_v7 = vadd.f32 1e-05, %v1497_v19  ;;  %2434 = vst.msk [vmem:[%s5204_s6 + $0x78] sm:$0xff] %vm91_vm0, %v2370_v53  ;;  %v1564_v39 = vadd.f32 1e-05, %v1500_v45  ;;  %v4758_v53 = vpop.xlane.xlu1 %1329 }
 0x27e   :  { %v2865_v30 = vpop.eup %2864  ;;  %v2399_v28 = vmul.f32 %v2335_v48, %v1951_v43  ;;  %2882 = vtanh.f32 %v2180_v42  ;;  %v2081_v23 = vmul.f32 %v2017_v34, %v4685_v47  ;;  %v1653_v31 = vmul.f32 %v2863_v11, %v5313_v27 }
 0x27f   :  { %v2867_v13 = vpop.eup %2866  ;;  %v2402_v32 = vmul.f32 %v2338_v62, %v1954_v17  ;;  %v2305_v51 = vadd.f32 1.0, %v2865_v30  ;;  %v4704_v50 = vadd.f32 %v4664_v41, %v1757_v57  ;;  %2884 = vrsqrt.f32 %v1532_v4 }
 0x280   :  { %v2869_v56 = vpop.eup %2868  ;;  %2463 = vst.msk [vmem:[%s5204_s6 + $0x160] sm:$0xff] %vm91_vm0, %v2399_v28  ;;  %v2145_v2 = vadd.f32 %v2081_v23, %v4685_v47  ;;  %v1724_v22 = vmul.f32 %v4656_v21, %v1653_v31  ;;  %v1656_v54 = vmul.f32 %v2867_v13, %v5314_v3  ;;  %v1531_v36 = vadd.f32 1e-05, %v1467_v55 }
 0x281   :  { %v2871_v5 = vpop.eup %2870  ;;  %2466 = vst.msk [vmem:[%s5204_s6 + $0x178] sm:$0xff] %vm91_vm0, %v2402_v32  ;;  %v2369_v44 = vmul.f32 %v2305_v51, %v1921_v9  ;;  %v1892_v20 = vmul.f32 %v4704_v50, %v4704_v50  ;;  %v1685_v52 = vmul.f32 %v2869_v56, %v5315_v6  ;;  %2886 = vrsqrt.f32 %v1561_v7  ;;  %v4742_v9 = vpop.xlane.xlu0 %1416 }
 0x282   :  { %v2873_v60 = vpop.eup %2872  ;;  %v2209_v1 = vmul.f32 0.7978846, %v2145_v2  ;;  %v4721_v61 = vadd.f32 %v4664_v41, %v1724_v22  ;;  %v1727_v15 = vmul.f32 %v4656_v21, %v1656_v54  ;;  %v1688_v59 = vmul.f32 %v2871_v5, %v5316_v12  ;;  %v4780_v6 = vpop.xlane.xlu1 %1425 }
 0x283   :  { %v2875_v37 = vpop.eup %2874  ;;  %2433 = vst.msk [vmem:[%s5204_s6 + $0x70] sm:$0xff] %vm91_vm0, %v2369_v44  ;;  %v2020_v8 = vmul.f32 0.044715, %v1892_v20  ;;  %v1756_v18 = vmul.f32 %v4656_v21, %v1685_v52  ;;  %v1655_v63 = vmul.f32 %v2873_v60, %v5317_v26  ;;  %v1924_v62 = vmul.f32 0.5, %v4667_v24 }
 0x284   :  { %2888 = vtanh.f32 %v2209_v1  ;;  %v1859_v43 = vmul.f32 %v4721_v61, %v4721_v61  ;;  %v4734_v17 = vadd.f32 %v4664_v41, %v1727_v15  ;;  %v1759_v16 = vmul.f32 %v4656_v21, %v1688_v59  ;;  %v5319_v1 = vld [vmem:[#allocation23_spill] sm:$0xff]  ;;  %v5320_v59 = vld [vmem:[#allocation26_spill] sm:$0xff] }
 0x285   :  { %v2084_v33 = vmul.f32 %v2020_v8, %v4704_v50  ;;  %v4738_v58 = vadd.f32 %v4664_v41, %v1756_v18  ;;  %v1726_v14 = vmul.f32 %v4656_v21, %v1655_v63  ;;  %v2877_v25 = vpop.eup %2876  ;;  %v1658_v49 = vmul.f32 %v2875_v37, %v5318_v40  ;;  %v4771_v13 = vpop.xlane.xlu0 %1326  ;;  %v5321_v8 = vld [vmem:[#allocation25_spill] sm:$0xff] }
 0x286   :  { %v1987_v19 = vmul.f32 0.044715, %v1859_v43  ;;  %v1862_v29 = vmul.f32 %v4734_v17, %v4734_v17  ;;  %2890 = vrsqrt.f32 %v1564_v39  ;;  %v2879_v10 = vpop.eup %2878  ;;  %v4751_v46 = vadd.f32 %v4664_v41, %v1759_v16 }
 0x287   :  { %v2148_v35 = vadd.f32 %v2084_v33, %v4704_v50  ;;  %v1891_v38 = vmul.f32 %v4738_v58, %v4738_v58  ;;  %2892 = vrsqrt.f32 %v1531_v36  ;;  %v4755_v55 = vadd.f32 %v4664_v41, %v1726_v14 }
 0x288   :  { %v2051_v4 = vmul.f32 %v1987_v19, %v4721_v61  ;;  %v1990_v45 = vmul.f32 0.044715, %v1862_v29  ;;  %v1729_v0 = vmul.f32 %v4656_v21, %v1658_v49  ;;  %v1894_v34 = vmul.f32 %v4751_v46, %v4751_v46  ;;  %v2881_v11 = vpop.eup %2880 }
 0x289   :  { %v2212_v48 = vmul.f32 0.7978846, %v2148_v35  ;;  %v2019_v42 = vmul.f32 0.044715, %v1891_v38  ;;  %v1861_v30 = vmul.f32 %v4755_v55, %v4755_v55  ;;  %v1953_v2 = vmul.f32 0.5, %v4685_v47  ;;  %v4793_v16 = vpop.xlane.xlu0 %1422  ;;  %v5322_v35 = vld [vmem:[#allocation28_spill] sm:$0xff] }
 0x28a   :  { %v2115_v57 = vadd.f32 %v2051_v4, %v4721_v61  ;;  %v2054_v7 = vmul.f32 %v1990_v45, %v4734_v17  ;;  %v2022_v27 = vmul.f32 0.044715, %v1894_v34  ;;  %v4769_v31 = vadd.f32 %v4664_v41, %v1729_v0 }
 0x28b   :  { %v2883_v28 = vpop.eup %2882  ;;  %2894 = vtanh.f32 %v2212_v48  ;;  %v2083_v23 = vmul.f32 %v2019_v42, %v4738_v58  ;;  %v1989_v39 = vmul.f32 0.044715, %v1861_v30  ;;  %v1687_v47 = vmul.f32 %v2877_v25, %v5319_v1  ;;  %v4808_v42 = vpop.xlane.xlu1 %1335 }
 0x28c   :  { %v2308_v32 = vadd.f32 1.0, %v2883_v28  ;;  %v2179_v51 = vmul.f32 0.7978846, %v2115_v57  ;;  %v2118_v24 = vadd.f32 %v2054_v7, %v4734_v17  ;;  %v2885_v56 = vpop.eup %2884  ;;  %v2086_v3 = vmul.f32 %v2022_v27, %v4751_v46 }
 0x28d   :  { %v2147_v22 = vadd.f32 %v2083_v23, %v4738_v58  ;;  %v1864_v54 = vmul.f32 %v4769_v31, %v4769_v31  ;;  %v2053_v20 = vmul.f32 %v1989_v39, %v4755_v55  ;;  %v1690_v37 = vmul.f32 %v2879_v10, %v5320_v59 }
 0x28e   :  { %v2372_v5 = vmul.f32 %v2308_v32, %v1924_v62  ;;  %2896 = vtanh.f32 %v2179_v51  ;;  %v2182_v44 = vmul.f32 0.7978846, %v2118_v24  ;;  %v2150_v36 = vadd.f32 %v2086_v3, %v4751_v46  ;;  %v2887_v15 = vpop.eup %2886  ;;  %v5323_v32 = vld [vmem:[#allocation27_spill] sm:$0xff]  ;;  %v4828_v24 = vpop.xlane.xlu0 %1332 }
 0x28f   :  { %v2211_v52 = vmul.f32 0.7978846, %v2147_v22  ;;  %v1992_v60 = vmul.f32 0.044715, %v1864_v54  ;;  %v2117_v12 = vadd.f32 %v2053_v20, %v4755_v55  ;;  %v1657_v18 = vmul.f32 %v2881_v11, %v5321_v8  ;;  %v5325_v22 = vld [vmem:[#allocation2_spill] sm:$0xff] }
 0x290   :  { %2436 = vst.msk [vmem:[%s5204_s6 + $0x88] sm:$0xff] %vm91_vm0, %v2372_v5  ;;  %2898 = vtanh.f32 %v2182_v44  ;;  %v2214_v63 = vmul.f32 0.7978846, %v2150_v36  ;;  %v1758_v33 = vmul.f32 %v4656_v21, %v1687_v47  ;;  %v1761_v19 = vmul.f32 %v4656_v21, %v1690_v37  ;;  %v4840_v47 = vpop.xlane.xlu1 %1431 }
 0x291   :  { %v2889_v26 = vpop.eup %2888  ;;  %2900 = vtanh.f32 %v2211_v52  ;;  %v2056_v43 = vmul.f32 %v1992_v60, %v4769_v31  ;;  %v2181_v25 = vmul.f32 0.7978846, %v2117_v12  ;;  %v1728_v29 = vmul.f32 %v4656_v21, %v1657_v18 }
 0x292   :  { %v2337_v14 = vadd.f32 1.0, %v2889_v26  ;;  %2902 = vtanh.f32 %v2214_v63  ;;  %v4799_v10 = vadd.f32 %v4664_v41, %v1758_v33  ;;  %v1660_v38 = vmul.f32 %v2885_v56, %v5322_v35 }
 0x293   :  { %v2891_v40 = vpop.eup %2890  ;;  %v2120_v49 = vadd.f32 %v2056_v43, %v4769_v31  ;;  %2904 = vtanh.f32 %v2181_v25  ;;  %v4803_v0 = vadd.f32 %v4664_v41, %v1761_v19  ;;  %v4806_v48 = vadd.f32 %v4664_v41, %v1728_v29  ;;  %v4860_v29 = vpop.xlane.xlu0 %1428 }
 0x294   :  { %v2893_v4 = vpop.eup %2892  ;;  %v2401_v45 = vmul.f32 %v2337_v14, %v1953_v2  ;;  %v1956_v34 = vmul.f32 0.5, %v4704_v50  ;;  %v1893_v62 = vmul.f32 %v4799_v10, %v4799_v10  ;;  %v1731_v57 = vmul.f32 %v4656_v21, %v1660_v38  ;;  %v5324_v2 = vld [vmem:[#allocation3_spill] sm:$0xff] }
 0x295   :  { %v2184_v11 = vmul.f32 0.7978846, %v2120_v49  ;;  %v1923_v7 = vmul.f32 0.5, %v4721_v61  ;;  %v1926_v30 = vmul.f32 0.5, %v4734_v17  ;;  %v1896_v28 = vmul.f32 %v4803_v0, %v4803_v0 }
 0x296   :  { %2465 = vst.msk [vmem:[%s5204_s6 + $0x170] sm:$0xff] %vm91_vm0, %v2401_v45  ;;  %v1863_v50 = vmul.f32 %v4806_v48, %v4806_v48  ;;  %v2021_v23 = vmul.f32 0.044715, %v1893_v62  ;;  %v4825_v27 = vadd.f32 %v4664_v41, %v1731_v57  ;;  %v1689_v51 = vmul.f32 %v2887_v15, %v5323_v32 }
 0x297   :  { %2906 = vtanh.f32 %v2184_v11  ;;  %v2024_v56 = vmul.f32 0.044715, %v1896_v28  ;;  %v1692_v17 = vmul.f32 %v2891_v40, %v5324_v2  ;;  %v1659_v3 = vmul.f32 %v2893_v4, %v5325_v22 }
 0x298   :  { %v2895_v39 = vpop.eup %2894  ;;  %v1991_v61 = vmul.f32 0.044715, %v1863_v50  ;;  %v1955_v5 = vmul.f32 0.5, %v4738_v58  ;;  %v2085_v44 = vmul.f32 %v2021_v23, %v4799_v10  ;;  %v1866_v20 = vmul.f32 %v4825_v27, %v4825_v27  ;;  %v4872_v50 = vpop.xlane.xlu1 %1341 }
 0x299   :  { %v2340_v54 = vadd.f32 1.0, %v2895_v39  ;;  %v2088_v52 = vmul.f32 %v2024_v56, %v4803_v0  ;;  %v1760_v60 = vmul.f32 %v4656_v21, %v1689_v51  ;;  %v1763_v1 = vmul.f32 %v4656_v21, %v1692_v17 }
 0x29a   :  { %v2055_v36 = vmul.f32 %v1991_v61, %v4806_v48  ;;  %v2149_v59 = vadd.f32 %v2085_v44, %v4799_v10  ;;  %v1994_v58 = vmul.f32 0.044715, %v1866_v20  ;;  %v1730_v37 = vmul.f32 %v4656_v21, %v1659_v3  ;;  %v4886_v3 = vpop.xlane.xlu0 %1338 }
 0x29b   :  { %v2897_v15 = vpop.eup %2896  ;;  %v2404_v12 = vmul.f32 %v2340_v54, %v1956_v34  ;;  %v2152_v18 = vadd.f32 %v2088_v52, %v4803_v0  ;;  %v4847_v63 = vadd.f32 %v4664_v41, %v1760_v60  ;;  %v4855_v25 = vadd.f32 %v4664_v41, %v1763_v1 }
 0x29c   :  { %v2307_v8 = vadd.f32 1.0, %v2897_v15  ;;  %v2119_v26 = vadd.f32 %v2055_v36, %v4806_v48  ;;  %v2213_v33 = vmul.f32 0.7978846, %v2149_v59  ;;  %v2058_v14 = vmul.f32 %v1994_v58, %v4825_v27  ;;  %v1438_v59 = vpop.xlane.xlu1 %1437 }
 0x29d   :  { %v2899_v43 = vpop.eup %2898  ;;  %2468 = vst.msk [vmem:[%s5204_s6 + $0x188] sm:$0xff] %vm91_vm0, %v2404_v12  ;;  %v4858_v19 = vadd.f32 %v4664_v41, %v1730_v37  ;;  %v2216_v38 = vmul.f32 0.7978846, %v2152_v18  ;;  %v1895_v11 = vmul.f32 %v4847_v63, %v4847_v63  ;;  %v1958_v28 = vmul.f32 0.5, %v4751_v46 }
 0x29e   :  { %v2901_v40 = vpop.eup %2900  ;;  %v2371_v49 = vmul.f32 %v2307_v8, %v1923_v7  ;;  %v2310_v35 = vadd.f32 1.0, %v2899_v43  ;;  %v2183_v4 = vmul.f32 0.7978846, %v2119_v26  ;;  %2908 = vtanh.f32 %v2213_v33  ;;  %v1435_v33 = vpop.xlane.xlu0 %1434 }
 0x29f   :  { %v2339_v45 = vadd.f32 1.0, %v2901_v40  ;;  %v2122_v34 = vadd.f32 %v2058_v14, %v4825_v27  ;;  %v2903_v62 = vpop.eup %2902  ;;  %2910 = vtanh.f32 %v2216_v38  ;;  %v1898_v7 = vmul.f32 %v4855_v25, %v4855_v25 }
 0x2a0   :  { %2435 = vst.msk [vmem:[%s5204_s6 + $0x80] sm:$0xff] %vm91_vm0, %v2371_v49  ;;  %v2374_v57 = vmul.f32 %v2310_v35, %v1926_v30  ;;  %v2905_v23 = vpop.eup %2904  ;;  %v2342_v51 = vadd.f32 1.0, %v2903_v62  ;;  %2912 = vtanh.f32 %v2183_v4  ;;  %v1925_v30 = vmul.f32 0.5, %v4755_v55 }
 0x2a1   :  { %v2403_v32 = vmul.f32 %v2339_v45, %v1955_v5  ;;  %v2186_v39 = vmul.f32 0.7978846, %v2122_v34  ;;  %v2309_v56 = vadd.f32 1.0, %v2905_v23  ;;  %v2023_v46 = vmul.f32 0.044715, %v1895_v11  ;;  %v1348_v34 = vpop.xlane.xlu1 %1347 }
 0x2a2   :  { %2438 = vst.msk [vmem:[%s5204_s6 + $0x98] sm:$0xff] %vm91_vm0, %v2374_v57  ;;  %v2026_v61 = vmul.f32 0.044715, %v1898_v7  ;;  %v2406_v2 = vmul.f32 %v2342_v51, %v1958_v28  ;;  %v1928_v17 = vmul.f32 0.5, %v4769_v31  ;;  %v1865_v22 = vmul.f32 %v4858_v19, %v4858_v19  ;;  %v1345_v51 = vpop.xlane.xlu0 %1344 }
 0x2a3   :  { %2467 = vst.msk [vmem:[%s5204_s6 + $0x180] sm:$0xff] %vm91_vm0, %v2403_v32  ;;  %2914 = vtanh.f32 %v2186_v39  ;;  %v2373_v5 = vmul.f32 %v2309_v56, %v1925_v30  ;;  %v2087_v55 = vmul.f32 %v2023_v46, %v4847_v63  ;;  %v1470_v20 = vmul.f32 0.03125, %v4758_v53 }
 0x2a4   :  { %v2907_v54 = vpop.eup %2906  ;;  %v2090_v44 = vmul.f32 %v2026_v61, %v4855_v25  ;;  %2470 = vst.msk [vmem:[%s5204_s6 + $0x198] sm:$0xff] %vm91_vm0, %v2406_v2  ;;  %v1993_v52 = vmul.f32 0.044715, %v1865_v22  ;;  %v1499_v36 = vmul.f32 0.03125, %v4742_v9  ;;  %v1502_v60 = vmul.f32 0.03125, %v4780_v6 }
 0x2a5   :  { %v2312_v31 = vadd.f32 1.0, %v2907_v54  ;;  %2437 = vst.msk [vmem:[%s5204_s6 + $0x90] sm:$0xff] %vm91_vm0, %v2373_v5  ;;  %v2151_v1 = vadd.f32 %v2087_v55, %v4847_v63  ;;  %v1534_v15 = vadd.f32 1e-05, %v1470_v20  ;;  %v1469_v12 = vmul.f32 0.03125, %v4771_v13  ;;  %v1444_v61 = vpop.xlane.xlu1 %1443 }
 0x2a6   :  { %v2154_v53 = vadd.f32 %v2090_v44, %v4855_v25  ;;  %v2057_v37 = vmul.f32 %v1993_v52, %v4858_v19  ;;  %v1563_v8 = vadd.f32 1e-05, %v1499_v36  ;;  %v1566_v6 = vadd.f32 1e-05, %v1502_v60  ;;  %v1441_v52 = vpop.xlane.xlu0 %1440  ;;  %v5326_v60 = vld [vmem:[#allocation5_spill] sm:$0xff] }
 0x2a7   :  { %v2376_v58 = vmul.f32 %v2312_v31, %v1928_v17  ;;  %v2215_v9 = vmul.f32 0.7978846, %v2151_v1  ;;  %2916 = vrsqrt.f32 %v1534_v15  ;;  %v1472_v43 = vmul.f32 0.03125, %v4808_v42  ;;  %v5327_v15 = vld [vmem:[#allocation4_spill] sm:$0xff] }
 0x2a8   :  { %v2218_v18 = vmul.f32 0.7978846, %v2154_v53  ;;  %v2121_v26 = vadd.f32 %v2057_v37, %v4858_v19  ;;  %2918 = vrsqrt.f32 %v1563_v8  ;;  %v1501_v13 = vmul.f32 0.03125, %v4793_v16 }
 0x2a9   :  { %2440 = vst.msk [vmem:[%s5204_s6 + $0xa8] sm:$0xff] %vm91_vm0, %v2376_v58  ;;  %2920 = vtanh.f32 %v2215_v9  ;;  %v1533_v14 = vadd.f32 1e-05, %v1469_v12  ;;  %v1504_v40 = vmul.f32 0.03125, %v4840_v47  ;;  %v1536_v35 = vadd.f32 1e-05, %v1472_v43 }
 0x2aa   :  { %2922 = vtanh.f32 %v2218_v18  ;;  %v2185_v49 = vmul.f32 0.7978846, %v2121_v26  ;;  %v1957_v4 = vmul.f32 0.5, %v4799_v10  ;;  %v1565_v45 = vadd.f32 1e-05, %v1501_v13 }
 0x2ab   :  { %v2909_v38 = vpop.eup %2908  ;;  %2924 = vrsqrt.f32 %v1566_v6  ;;  %v1960_v42 = vmul.f32 0.5, %v4803_v0  ;;  %v1568_v16 = vadd.f32 1e-05, %v1504_v40  ;;  %v1927_v7 = vmul.f32 0.5, %v4806_v48  ;;  %v5328_v40 = vld [vmem:[#allocation7_spill] sm:$0xff] }
 0x2ac   :  { %v2911_v11 = vpop.eup %2910  ;;  %v2341_v62 = vadd.f32 1.0, %v2909_v38  ;;  %2926 = vtanh.f32 %v2185_v49  ;;  %v1471_v47 = vmul.f32 0.03125, %v4828_v24  ;;  %v1474_v10 = vmul.f32 0.03125, %v4872_v50 }
 0x2ad   :  { %v2913_v57 = vpop.eup %2912  ;;  %v2344_v28 = vadd.f32 1.0, %v2911_v11  ;;  %2928 = vrsqrt.f32 %v1533_v14  ;;  %v1503_v0 = vmul.f32 0.03125, %v4860_v29  ;;  %v1930_v56 = vmul.f32 0.5, %v4825_v27 }
 0x2ae   :  { %v2405_v23 = vmul.f32 %v2341_v62, %v1957_v4  ;;  %v2311_v32 = vadd.f32 1.0, %v2913_v57  ;;  %2930 = vrsqrt.f32 %v1536_v35  ;;  %v1535_v50 = vadd.f32 1e-05, %v1471_v47 }
 0x2af   :  { %v2408_v30 = vmul.f32 %v2344_v28, %v1960_v42  ;;  %2932 = vrsqrt.f32 %v1565_v45  ;;  %v1506_v46 = vmul.f32 0.03125, %v1438_v59  ;;  %v1538_v2 = vadd.f32 1e-05, %v1474_v10 }
 0x2b0   :  { %v2915_v39 = vpop.eup %2914  ;;  %2469 = vst.msk [vmem:[%s5204_s6 + $0x190] sm:$0xff] %vm91_vm0, %v2405_v23  ;;  %v2375_v48 = vmul.f32 %v2311_v32, %v1927_v7  ;;  %2934 = vrsqrt.f32 %v1568_v16  ;;  %v1473_v17 = vmul.f32 0.03125, %v4886_v3  ;;  %v1476_v27 = vmul.f32 0.03125, %v1348_v34  ;;  %v5329_v16 = vld [vmem:[#allocation6_spill] sm:$0xff]  ;;  %v5330_v32 = vld [vmem:[#allocation9_spill] sm:$0xff] }
 0x2b1   :  { %v2314_v24 = vadd.f32 1.0, %v2915_v39  ;;  %2472 = vst.msk [vmem:[%s5204_s6 + $0x1a8] sm:$0xff] %vm91_vm0, %v2408_v30  ;;  %v1959_v22 = vmul.f32 0.5, %v4847_v63  ;;  %v1567_v54 = vadd.f32 1e-05, %v1503_v0  ;;  %v1962_v55 = vmul.f32 0.5, %v4855_v25 }
 0x2b2   :  { %2439 = vst.msk [vmem:[%s5204_s6 + $0xa0] sm:$0xff] %vm91_vm0, %v2375_v48  ;;  %v1929_v44 = vmul.f32 0.5, %v4858_v19  ;;  %v1505_v20 = vmul.f32 0.03125, %v1435_v33  ;;  %v1508_v31 = vmul.f32 0.03125, %v1444_v61  ;;  %2936 = vrsqrt.f32 %v1535_v50  ;;  %v5331_v48 = vld [vmem:[#allocation8_spill] sm:$0xff] }
 0x2b3   :  { %v2378_v29 = vmul.f32 %v2314_v24, %v1930_v56  ;;  %v1570_v1 = vadd.f32 1e-05, %v1506_v46  ;;  %v1475_v63 = vmul.f32 0.03125, %v1345_v51  ;;  %2938 = vrsqrt.f32 %v1538_v2  ;;  %v5332_v46 = vld [vmem:[#allocation11_spill] sm:$0xff] }
 0x2b4   :  { %v2917_v5 = vpop.eup %2916  ;;  %v1537_v59 = vadd.f32 1e-05, %v1473_v17  ;;  %v1540_v58 = vadd.f32 1e-05, %v1476_v27  ;;  %2940 = vrsqrt.f32 %v1567_v54  ;;  %v1507_v19 = vmul.f32 0.03125, %v1441_v52 }
 0x2b5   :  { %2442 = vst.msk [vmem:[%s5204_s6 + $0xb8] sm:$0xff] %vm91_vm0, %v2378_v29  ;;  %v2919_v36 = vpop.eup %2918  ;;  %v1662_v3 = vmul.f32 %v2917_v5, %v5326_v60  ;;  %v1569_v26 = vadd.f32 1e-05, %v1505_v20  ;;  %v1572_v43 = vadd.f32 1e-05, %v1508_v31  ;;  %2942 = vrsqrt.f32 %v1570_v1 }
 0x2b6   :  { %v2921_v53 = vpop.eup %2920  ;;  %v1691_v12 = vmul.f32 %v2919_v36, %v5327_v15  ;;  %v1539_v35 = vadd.f32 1e-05, %v1475_v63  ;;  %v1571_v28 = vadd.f32 1e-05, %v1507_v19  ;;  %2944 = vrsqrt.f32 %v1537_v59 }
 0x2b7   :  { %v2923_v37 = vpop.eup %2922  ;;  %v2343_v8 = vadd.f32 1.0, %v2921_v53  ;;  %v1733_v25 = vmul.f32 %v4656_v21, %v1662_v3  ;;  %2946 = vrsqrt.f32 %v1540_v58 }
 0x2b8   :  { %v2925_v9 = vpop.eup %2924  ;;  %v2346_v18 = vadd.f32 1.0, %v2923_v37  ;;  %v1762_v6 = vmul.f32 %v4656_v21, %v1691_v12  ;;  %2948 = vrsqrt.f32 %v1569_v26 }
 0x2b9   :  { %v2927_v13 = vpop.eup %2926  ;;  %v2407_v33 = vmul.f32 %v2343_v8, %v1959_v22  ;;  %v4945_v14 = vadd.f32 %v4664_v41, %v1733_v25  ;;  %v1694_v49 = vmul.f32 %v2925_v9, %v5328_v40  ;;  %2950 = vrsqrt.f32 %v1572_v43 }
 0x2ba   :  { %v2929_v38 = vpop.eup %2928  ;;  %v2410_v4 = vmul.f32 %v2346_v18, %v1962_v55  ;;  %v2313_v45 = vadd.f32 1.0, %v2927_v13  ;;  %v4949_v34 = vadd.f32 %v4664_v41, %v1762_v6  ;;  %2952 = vrsqrt.f32 %v1539_v35 }
 0x2bb   :  { %v2931_v11 = vpop.eup %2930  ;;  %2471 = vst.msk [vmem:[%s5204_s6 + $0x1a0] sm:$0xff] %vm91_vm0, %v2407_v33  ;;  %v1868_v62 = vmul.f32 %v4945_v14, %v4945_v14  ;;  %v1765_v42 = vmul.f32 %v4656_v21, %v1694_v49  ;;  %v1661_v57 = vmul.f32 %v2929_v38, %v5329_v16  ;;  %2954 = vrsqrt.f32 %v1571_v28  ;;  %v5333_v33 = vld [vmem:[#allocation10_spill] sm:$0xff]  ;;  %v5334_v38 = vld [vmem:[#allocation29_spill] sm:$0xff] }
 0x2bc   :  { %v2933_v7 = vpop.eup %2932  ;;  %2474 = vst.msk [vmem:[%s5204_s6 + $0x1b8] sm:$0xff] %vm91_vm0, %v2410_v4  ;;  %v2377_v47 = vmul.f32 %v2313_v45, %v1929_v44  ;;  %v1897_v23 = vmul.f32 %v4949_v34, %v4949_v34  ;;  %v1664_v10 = vmul.f32 %v2931_v11, %v5330_v32  ;;  %v5335_v45 = vld [vmem:[#allocation12_spill] sm:$0xff] }
 0x2bd   :  { %v2935_v51 = vpop.eup %2934  ;;  %v1996_v39 = vmul.f32 0.044715, %v1868_v62  ;;  %v4967_v30 = vadd.f32 %v4664_v41, %v1765_v42  ;;  %v1732_v0 = vmul.f32 %v4656_v21, %v1661_v57  ;;  %v1693_v56 = vmul.f32 %v2933_v7, %v5331_v48 }
 0x2be   :  { %2441 = vst.msk [vmem:[%s5204_s6 + $0xb0] sm:$0xff] %vm91_vm0, %v2377_v47  ;;  %v2025_v24 = vmul.f32 0.044715, %v1897_v23  ;;  %v1735_v50 = vmul.f32 %v4656_v21, %v1664_v10  ;;  %v1696_v61 = vmul.f32 %v2935_v51, %v5332_v46  ;;  %v1932_v46 = vmul.f32 0.5, %v4945_v14 }
 0x2bf   :  { %v2060_v29 = vmul.f32 %v1996_v39, %v4945_v14  ;;  %v1900_v2 = vmul.f32 %v4967_v30, %v4967_v30  ;;  %v4981_v17 = vadd.f32 %v4664_v41, %v1732_v0  ;;  %v1764_v54 = vmul.f32 %v4656_v21, %v1693_v56  ;;  %v2937_v31 = vpop.eup %2936  ;;  %v5336_v39 = vld [vmem:[#allocation30_spill] sm:$0xff] }
 0x2c0   :  { %v2089_v27 = vmul.f32 %v2025_v24, %v4949_v34  ;;  %v4985_v22 = vadd.f32 %v4664_v41, %v1735_v50  ;;  %v1767_v5 = vmul.f32 %v4656_v21, %v1696_v61  ;;  %v2939_v3 = vpop.eup %2938  ;;  %v1663_v40 = vmul.f32 %v2937_v31, %v5333_v33 }
 0x2c1   :  { %v2124_v55 = vadd.f32 %v2060_v29, %v4945_v14  ;;  %v2028_v44 = vmul.f32 0.044715, %v1900_v2  ;;  %v1867_v20 = vmul.f32 %v4981_v17, %v4981_v17  ;;  %v4996_v60 = vadd.f32 %v4664_v41, %v1764_v54  ;;  %v2941_v12 = vpop.eup %2940 }
 0x2c2   :  { %v2153_v52 = vadd.f32 %v2089_v27, %v4949_v34  ;;  %v1870_v36 = vmul.f32 %v4985_v22, %v4985_v22  ;;  %v5000_v15 = vadd.f32 %v4664_v41, %v1767_v5  ;;  %v2943_v6 = vpop.eup %2942  ;;  %v1666_v4 = vmul.f32 %v2939_v3, %v5334_v38  ;;  %v5337_v3 = vld [vmem:[#allocation13_spill] sm:$0xff] }
 0x2c3   :  { %v2188_v1 = vmul.f32 0.7978846, %v2124_v55  ;;  %v2092_v63 = vmul.f32 %v2028_v44, %v4967_v30  ;;  %v1995_v53 = vmul.f32 0.044715, %v1867_v20  ;;  %v1899_v37 = vmul.f32 %v4996_v60, %v4996_v60  ;;  %v2945_v62 = vpop.eup %2944 }
 0x2c4   :  { %v2217_v59 = vmul.f32 0.7978846, %v2153_v52  ;;  %v1998_v58 = vmul.f32 0.044715, %v1870_v36  ;;  %v1902_v19 = vmul.f32 %v5000_v15, %v5000_v15  ;;  %v1695_v11 = vmul.f32 %v2941_v12, %v5335_v45  ;;  %v2947_v32 = vpop.eup %2946 }
 0x2c5   :  { %2956 = vtanh.f32 %v2188_v1  ;;  %v2156_v8 = vadd.f32 %v2092_v63, %v4967_v30  ;;  %v2059_v25 = vmul.f32 %v1995_v53, %v4981_v17  ;;  %v2027_v18 = vmul.f32 0.044715, %v1899_v37  ;;  %v2949_v48 = vpop.eup %2948  ;;  %v5338_v1 = vld [vmem:[#allocation32_spill] sm:$0xff] }
 0x2c6   :  { %2958 = vtanh.f32 %v2217_v59  ;;  %v2062_v9 = vmul.f32 %v1998_v58, %v4985_v22  ;;  %v2030_v13 = vmul.f32 0.044715, %v1902_v19  ;;  %v1734_v57 = vmul.f32 %v4656_v21, %v1663_v40  ;;  %v5035_v27 = vpop.eup %2950  ;;  %v5339_v58 = vld [vmem:[#allocation31_spill] sm:$0xff] }
 0x2c7   :  { %v2220_v26 = vmul.f32 0.7978846, %v2156_v8  ;;  %v2123_v43 = vadd.f32 %v2059_v25, %v4981_v17  ;;  %v2091_v35 = vmul.f32 %v2027_v18, %v4996_v60  ;;  %v1737_v47 = vmul.f32 %v4656_v21, %v1666_v4  ;;  %v5042_v44 = vpop.eup %2952 }
 0x2c8   :  { %v2126_v49 = vadd.f32 %v2062_v9, %v4985_v22  ;;  %v2094_v16 = vmul.f32 %v2030_v13, %v5000_v15  ;;  %v1766_v23 = vmul.f32 %v4656_v21, %v1695_v11  ;;  %v5022_v51 = vadd.f32 %v4664_v41, %v1734_v57  ;;  %v5050_v53 = vpop.eup %2954 }
 0x2c9   :  { %2960 = vtanh.f32 %v2220_v26  ;;  %v2187_v42 = vmul.f32 0.7978846, %v2123_v43  ;;  %v2155_v7 = vadd.f32 %v2091_v35, %v4996_v60  ;;  %v1698_v0 = vmul.f32 %v2943_v6, %v5336_v39 }
 0x2ca   :  { %v2190_v28 = vmul.f32 0.7978846, %v2126_v49  ;;  %v2158_v10 = vadd.f32 %v2094_v16, %v5000_v15  ;;  %v5026_v24 = vadd.f32 %v4664_v41, %v1737_v47  ;;  %v5029_v50 = vadd.f32 %v4664_v41, %v1766_v23 }
 0x2cb   :  { %2962 = vtanh.f32 %v2187_v42  ;;  %v2219_v56 = vmul.f32 0.7978846, %v2155_v7  ;;  %v1869_v29 = vmul.f32 %v5022_v51, %v5022_v51  ;;  %v1769_v2 = vmul.f32 %v4656_v21, %v1698_v0 }
 0x2cc   :  { %2964 = vtanh.f32 %v2190_v28  ;;  %v2222_v61 = vmul.f32 0.7978846, %v2158_v10  ;;  %v1961_v54 = vmul.f32 0.5, %v4949_v34  ;;  %v1872_v5 = vmul.f32 %v5026_v24, %v5026_v24 }
 0x2cd   :  { %2966 = vtanh.f32 %v2219_v56  ;;  %v1901_v55 = vmul.f32 %v5029_v50, %v5029_v50  ;;  %v1964_v14 = vmul.f32 0.5, %v4967_v30  ;;  %v1997_v20 = vmul.f32 0.044715, %v1869_v29  ;;  %v2992_v29 = vld [vmem:[%s5203_s5] ss:$0 sm:$0xff] }
 0x2ce   :  { %2968 = vtanh.f32 %v2222_v61  ;;  %v5046_v31 = vadd.f32 %v4664_v41, %v1769_v2  ;;  %v2000_v52 = vmul.f32 0.044715, %v1872_v5  ;;  %v1665_v34 = vmul.f32 %v2945_v62, %v5337_v3  ;;  %v5340_v5 = vld [vmem:[#allocation14_spill] sm:$0xff] }
 0x2cf   :  { %v2029_v36 = vmul.f32 0.044715, %v1901_v55  ;;  %v1668_v63 = vmul.f32 %v2947_v32, %v5338_v1  ;;  %v1931_v12 = vmul.f32 0.5, %v4981_v17  ;;  %v2061_v59 = vmul.f32 %v1997_v20, %v5022_v51 }
 0x2d0   :  { %v1904_v30 = vmul.f32 %v5046_v31, %v5046_v31  ;;  %v1697_v37 = vmul.f32 %v2949_v48, %v5339_v58  ;;  %v2064_v25 = vmul.f32 %v2000_v52, %v5026_v24  ;;  %v1736_v9 = vmul.f32 %v4656_v21, %v1665_v34 }
 0x2d1   :  { %v2093_v19 = vmul.f32 %v2029_v36, %v5029_v50  ;;  %v1739_v18 = vmul.f32 %v4656_v21, %v1668_v63  ;;  %v2125_v17 = vadd.f32 %v2061_v59, %v5022_v51  ;;  %v1934_v7 = vmul.f32 0.5, %v4985_v22 }
 0x2d2   :  { %v2957_v8 = vpop.eup %2956  ;;  %v2032_v43 = vmul.f32 0.044715, %v1904_v30  ;;  %v1768_v13 = vmul.f32 %v4656_v21, %v1697_v37  ;;  %v2128_v40 = vadd.f32 %v2064_v25, %v5026_v24  ;;  %v5066_v35 = vadd.f32 %v4664_v41, %v1736_v9  ;;  %v5342_v9 = vld [vmem:[#allocation34_spill] sm:$0xff] }
 0x2d3   :  { %v2959_v6 = vpop.eup %2958  ;;  %v2316_v26 = vadd.f32 1.0, %v2957_v8  ;;  %v2157_v49 = vadd.f32 %v2093_v19, %v5029_v50  ;;  %v2189_v4 = vmul.f32 0.7978846, %v2125_v17  ;;  %v5070_v11 = vadd.f32 %v4664_v41, %v1739_v18 }
 0x2d4   :  { %v2345_v33 = vadd.f32 1.0, %v2959_v6  ;;  %v2096_v45 = vmul.f32 %v2032_v43, %v5046_v31  ;;  %v2192_v16 = vmul.f32 0.7978846, %v2128_v40  ;;  %v1871_v21 = vmul.f32 %v5066_v35, %v5066_v35 }
 0x2d5   :  { %v2380_v38 = vmul.f32 %v2316_v26, %v1932_v46  ;;  %v2221_v57 = vmul.f32 0.7978846, %v2157_v49  ;;  %2970 = vtanh.f32 %v2189_v4  ;;  %v1963_v23 = vmul.f32 0.5, %v4996_v60 }
 0x2d6   :  { %v2961_v62 = vpop.eup %2960  ;;  %v2409_v42 = vmul.f32 %v2345_v33, %v1961_v54  ;;  %v2160_v47 = vadd.f32 %v2096_v45, %v5046_v31  ;;  %2972 = vtanh.f32 %v2192_v16  ;;  %v1999_v32 = vmul.f32 0.044715, %v1871_v21 }
 0x2d7   :  { %2444 = vst.msk [vmem:[%s5204_s6 + $0xc8] sm:$0xff] %vm91_vm0, %v2380_v38  ;;  %v2348_v28 = vadd.f32 1.0, %v2961_v62  ;;  %v1874_v10 = vmul.f32 %v5070_v11, %v5070_v11  ;;  %2974 = vtanh.f32 %v2221_v57  ;;  %v5091_v2 = vadd.f32 %v2992_v29, %v1768_v13 }
 0x2d8   :  { %v2963_v41 = vpop.eup %2962  ;;  %2473 = vst.msk [vmem:[%s5204_s6 + $0x1b0] sm:$0xff] %vm91_vm0, %v2409_v42  ;;  %v2224_v22 = vmul.f32 0.7978846, %v2160_v47  ;;  %v2063_v46 = vmul.f32 %v1999_v32, %v5066_v35  ;;  %v1700_v55 = vmul.f32 %v5035_v27, %v5340_v5  ;;  %v1966_v63 = vmul.f32 0.5, %v5000_v15 }
 0x2d9   :  { %v2965_v39 = vpop.eup %2964  ;;  %v2412_v0 = vmul.f32 %v2348_v28, %v1964_v14  ;;  %v2315_v48 = vadd.f32 1.0, %v2963_v41  ;;  %v2002_v61 = vmul.f32 0.044715, %v1874_v10  ;;  %v5341_v14 = vld [vmem:[#allocation33_spill] sm:$0xff]  ;;  %v1903_v27 = vmul.f32 %v5091_v2, %v5091_v2 }
 0x2da   :  { %v2318_v56 = vadd.f32 1.0, %v2965_v39  ;;  %v2967_v60 = vpop.eup %2966  ;;  %2976 = vtanh.f32 %v2224_v22  ;;  %v1667_v20 = vmul.f32 %v5042_v44, %v5341_v14  ;;  %v2127_v34 = vadd.f32 %v2063_v46, %v5066_v35  ;;  %v2993_v44 = vld [vmem:[%s5202_s4] ss:$0 sm:$0xff] }
 0x2db   :  { %2476 = vst.msk [vmem:[%s5204_s6 + $0x1c8] sm:$0xff] %vm91_vm0, %v2412_v0  ;;  %v2379_v54 = vmul.f32 %v2315_v48, %v1931_v12  ;;  %v2969_v52 = vpop.eup %2968  ;;  %v2347_v3 = vadd.f32 1.0, %v2967_v60  ;;  %v2066_v1 = vmul.f32 %v2002_v61, %v5070_v11  ;;  %v1771_v59 = vmul.f32 %v2993_v44, %v1700_v55 }
 0x2dc   :  { %v2382_v36 = vmul.f32 %v2318_v56, %v1934_v7  ;;  %v2350_v12 = vadd.f32 1.0, %v2969_v52  ;;  %v2191_v58 = vmul.f32 0.7978846, %v2127_v34  ;;  %v1738_v8 = vmul.f32 %v2993_v44, %v1667_v20 }
 0x2dd   :  { %2443 = vst.msk [vmem:[%s5204_s6 + $0xc0] sm:$0xff] %vm91_vm0, %v2379_v54  ;;  %v2411_v30 = vmul.f32 %v2347_v3, %v1963_v23  ;;  %v2130_v37 = vadd.f32 %v2066_v1, %v5070_v11  ;;  %v2031_v25 = vmul.f32 0.044715, %v1903_v27  ;;  %v5118_v19 = vadd.f32 %v2992_v29, %v1771_v59 }
 0x2de   :  { %2446 = vst.msk [vmem:[%s5204_s6 + $0xd8] sm:$0xff] %vm91_vm0, %v2382_v36  ;;  %v2414_v15 = vmul.f32 %v2350_v12, %v1966_v63  ;;  %v1699_v18 = vmul.f32 %v5050_v53, %v5342_v9  ;;  %2978 = vtanh.f32 %v2191_v58  ;;  %v5126_v26 = vadd.f32 %v2992_v29, %v1738_v8 }
 0x2df   :  { %2475 = vst.msk [vmem:[%s5204_s6 + $0x1c0] sm:$0xff] %vm91_vm0, %v2411_v30  ;;  %v2194_v6 = vmul.f32 0.7978846, %v2130_v37  ;;  %v2095_v17 = vmul.f32 %v2031_v25, %v5091_v2  ;;  %v1906_v43 = vmul.f32 %v5118_v19, %v5118_v19  ;;  %v1933_v4 = vmul.f32 0.5, %v5022_v51 }
 0x2e0   :  { %2478 = vst.msk [vmem:[%s5204_s6 + $0x1d8] sm:$0xff] %vm91_vm0, %v2414_v15  ;;  %v1770_v53 = vmul.f32 %v2993_v44, %v1699_v18  ;;  %v1873_v13 = vmul.f32 %v5126_v26, %v5126_v26  ;;  %v1936_v7 = vmul.f32 0.5, %v5026_v24  ;;  %v1965_v41 = vmul.f32 0.5, %v5029_v50 }
 0x2e1   :  { %2980 = vtanh.f32 %v2194_v6  ;;  %v2159_v33 = vadd.f32 %v2095_v17, %v5091_v2  ;;  %v2034_v40 = vmul.f32 0.044715, %v1906_v43  ;;  %v1968_v50 = vmul.f32 0.5, %v5046_v31 }
 0x2e2   :  { %v5138_v49 = vadd.f32 %v2992_v29, %v1770_v53  ;;  %v2971_v38 = vpop.eup %2970  ;;  %v2001_v45 = vmul.f32 0.044715, %v1873_v13  ;;  %v1935_v5 = vmul.f32 0.5, %v5066_v35  ;;  %v1938_v36 = vmul.f32 0.5, %v5070_v11 }
 0x2e3   :  { %v2973_v62 = vpop.eup %2972  ;;  %v2317_v42 = vadd.f32 1.0, %v2971_v38  ;;  %v2223_v16 = vmul.f32 0.7978846, %v2159_v33  ;;  %v2098_v57 = vmul.f32 %v2034_v40, %v5118_v19  ;;  %v1967_v35 = vmul.f32 0.5, %v5091_v2 }
 0x2e4   :  { %v1905_v21 = vmul.f32 %v5138_v49, %v5138_v49  ;;  %v2975_v28 = vpop.eup %2974  ;;  %v2320_v47 = vadd.f32 1.0, %v2973_v62  ;;  %v2065_v23 = vmul.f32 %v2001_v45, %v5126_v26  ;;  %v1970_v44 = vmul.f32 0.5, %v5118_v19 }
 0x2e5   :  { %v2381_v32 = vmul.f32 %v2317_v42, %v1933_v4  ;;  %v2349_v10 = vadd.f32 1.0, %v2975_v28  ;;  %2982 = vtanh.f32 %v2223_v16  ;;  %v2162_v51 = vadd.f32 %v2098_v57, %v5118_v19 }
 0x2e6   :  { %v2384_v0 = vmul.f32 %v2320_v47, %v1936_v7  ;;  %v2129_v48 = vadd.f32 %v2065_v23, %v5126_v26  ;;  %v2033_v22 = vmul.f32 0.044715, %v1905_v21  ;;  %v1937_v30 = vmul.f32 0.5, %v5126_v26 }
 0x2e7   :  { %v2977_v39 = vpop.eup %2976  ;;  %2445 = vst.msk [vmem:[%s5204_s6 + $0xd0] sm:$0xff] %vm91_vm0, %v2381_v32  ;;  %v2413_v24 = vmul.f32 %v2349_v10, %v1965_v41  ;;  %v2226_v46 = vmul.f32 0.7978846, %v2162_v51  ;;  %v1969_v2 = vmul.f32 0.5, %v5138_v49 }
 0x2e8   :  { %v2352_v56 = vadd.f32 1.0, %v2977_v39  ;;  %2448 = vst.msk [vmem:[%s5204_s6 + $0xe8] sm:$0xff] %vm91_vm0, %v2384_v0  ;;  %v2193_v61 = vmul.f32 0.7978846, %v2129_v48  ;;  %v2097_v29 = vmul.f32 %v2033_v22, %v5138_v49 }
 0x2e9   :  { %2477 = vst.msk [vmem:[%s5204_s6 + $0x1d0] sm:$0xff] %vm91_vm0, %v2413_v24  ;;  %2984 = vtanh.f32 %v2226_v46 }
 0x2ea   :  { %v2416_v60 = vmul.f32 %v2352_v56, %v1968_v50  ;;  %2986 = vtanh.f32 %v2193_v61  ;;  %v2161_v31 = vadd.f32 %v2097_v29, %v5138_v49 }
 0x2eb   :  { %v2979_v54 = vpop.eup %2978 }
 0x2ec   :  { %2480 = vst.msk [vmem:[%s5204_s6 + $0x1e8] sm:$0xff] %vm91_vm0, %v2416_v60  ;;  %v2319_v55 = vadd.f32 1.0, %v2979_v54  ;;  %v2225_v14 = vmul.f32 0.7978846, %v2161_v31 }
 0x2ee   :  { %v2981_v20 = vpop.eup %2980  ;;  %v2383_v52 = vmul.f32 %v2319_v55, %v1935_v5  ;;  %2988 = vtanh.f32 %v2225_v14 }
 0x2ef   :  { %v2322_v3 = vadd.f32 1.0, %v2981_v20 }
 0x2f0   :  { %2447 = vst.msk [vmem:[%s5204_s6 + $0xe0] sm:$0xff] %vm91_vm0, %v2383_v52 }
 0x2f1   :  { %v2386_v34 = vmul.f32 %v2322_v3, %v1938_v36 }
 0x2f2   :  { %v2983_v1 = vpop.eup %2982 }
 0x2f3   :  { %2450 = vst.msk [vmem:[%s5204_s6 + $0xf8] sm:$0xff] %vm91_vm0, %v2386_v34  ;;  %v2351_v63 = vadd.f32 1.0, %v2983_v1 }
 0x2f5   :  { %v2415_v12 = vmul.f32 %v2351_v63, %v1967_v35 }
 0x2f6   :  { %v2985_v27 = vpop.eup %2984 }
 0x2f7   :  { %v2987_v11 = vpop.eup %2986  ;;  %2479 = vst.msk [vmem:[%s5204_s6 + $0x1e0] sm:$0xff] %vm91_vm0, %v2415_v12  ;;  %v2354_v59 = vadd.f32 1.0, %v2985_v27 }
 0x2f8   :  { %v2321_v58 = vadd.f32 1.0, %v2987_v11 }
 0x2f9   :  { %v2418_v37 = vmul.f32 %v2354_v59, %v1970_v44 }
 0x2fa   :  { %v2385_v8 = vmul.f32 %v2321_v58, %v1937_v30 }
 0x2fb   :  { %v2989_v15 = vpop.eup %2988  ;;  %2482 = vst.msk [vmem:[%s5204_s6 + $0x1f8] sm:$0xff] %vm91_vm0, %v2418_v37 }
 0x2fc   :  { %2449 = vst.msk [vmem:[%s5204_s6 + $0xf0] sm:$0xff] %vm91_vm0, %v2385_v8  ;;  %v2353_v25 = vadd.f32 1.0, %v2989_v15 }
 0x2fe   :  { %v2417_v19 = vmul.f32 %v2353_v25, %v1969_v2 }
 0x300   :  { %2481 = vst.msk [vmem:[%s5204_s6 + $0x1f0] sm:$0xff] %vm91_vm0, %v2417_v19 }

// kernel: fno_forward.11
= control target key start
LH: loop header
LB: loop body
LE: loop exit
PB: predicated region body
PF: predicated region fallthrough
CT: control target
= control target key end

     0   :  { %vm89_vm0 = vcmask 261120   ;;  %vm667_vm1 = vcmask 15360   ;;  %s1594_s1 = inlined_call_operand.vmem [shape: f32[32,2], index: 1, kind: input, shape index: {}]   ;;  %s1595_s0 = inlined_call_operand.vmem [shape: f32[512,32], index: 0, kind: input, shape index: {}]   ;;  %s1596_s2 = inlined_call_operand.vmem [shape: f32[1,2], index: 2, kind: input, shape index: {}]   ;;  %s1597_s3 = inlined_call_operand.vmem [shape: f32[512,2], index: 3, kind: output, shape index: {}]  }
   0x1   :  { %v81_v0 = vld [vmem:[%s1594_s1 + $0x18] sm:$0xff]  ;;  %v80_v1 = vld [vmem:[%s1594_s1 + $0x10] sm:$0xff]  ;;  %v79_v2 = vld [vmem:[%s1594_s1 + $0x8] sm:$0xff] }
   0x2   :  { %869 = vmatprep.subr.mxu0 %v81_v0  ;;  %973 = vmatprep.subr.mxu1 %v81_v0  ;;  %v78_v3 = vld [vmem:[%s1594_s1] sm:$0xff]  ;;  %v15_v6 = vld [vmem:[%s1595_s0 + $0x8] sm:$0xff]  ;;  %v16_v8 = vld [vmem:[%s1595_s0 + $0x10] sm:$0xff] }
   0x3   :  { %870 = vmatpush3.msra.mxu0 %v81_v0  ;;  %977 = vmatpush3.msra.mxu1 %v81_v0  ;;  %v14_v4 = vld [vmem:[%s1595_s0] sm:$0xff]  ;;  %v47_v7 = vld [vmem:[%s1595_s0 + $0x108] sm:$0xff]  ;;  %v48_v9 = vld [vmem:[%s1595_s0 + $0x110] sm:$0xff] }
   0x4   :  { %871 = vmatprep.subr.mxu0 %v80_v1  ;;  %974 = vmatprep.subr.mxu1 %v80_v1  ;;  %v46_v5 = vld [vmem:[%s1595_s0 + $0x100] sm:$0xff]  ;;  %v17_v10 = vld [vmem:[%s1595_s0 + $0x18] sm:$0xff]  ;;  %v19_v14 = vld [vmem:[%s1595_s0 + $0x28] sm:$0xff] }
   0x5   :  { %872 = vmatpush3.msra.mxu0 %v80_v1  ;;  %978 = vmatpush3.msra.mxu1 %v80_v1  ;;  %v49_v11 = vld [vmem:[%s1595_s0 + $0x118] sm:$0xff]  ;;  %v18_v12 = vld [vmem:[%s1595_s0 + $0x20] sm:$0xff]  ;;  %v51_v15 = vld [vmem:[%s1595_s0 + $0x128] sm:$0xff] }
   0x6   :  { %873 = vmatprep.subr.mxu0 %v79_v2  ;;  %975 = vmatprep.subr.mxu1 %v79_v2  ;;  %v50_v13 = vld [vmem:[%s1595_s0 + $0x120] sm:$0xff]  ;;  %v20_v16 = vld [vmem:[%s1595_s0 + $0x30] sm:$0xff]  ;;  %v21_v18 = vld [vmem:[%s1595_s0 + $0x38] sm:$0xff] }
   0x7   :  { %874 = vmatpush3.msra.mxu0 %v79_v2  ;;  %979 = vmatpush3.msra.mxu1 %v79_v2  ;;  %v52_v17 = vld [vmem:[%s1595_s0 + $0x130] sm:$0xff]  ;;  %v53_v19 = vld [vmem:[%s1595_s0 + $0x138] sm:$0xff]  ;;  %v22_v20 = vld [vmem:[%s1595_s0 + $0x40] sm:$0xff] }
   0x8   :  { %875 = vmatprep.subr.mxu0 %v78_v3  ;;  %976 = vmatprep.subr.mxu1 %v78_v3  ;;  %v54_v21 = vld [vmem:[%s1595_s0 + $0x140] sm:$0xff]  ;;  %v23_v22 = vld [vmem:[%s1595_s0 + $0x48] sm:$0xff]  ;;  %v24_v24 = vld [vmem:[%s1595_s0 + $0x50] sm:$0xff] }
   0x9   :  { %876 = vmatpush3.msra.mxu0 %v78_v3  ;;  %980 = vmatpush3.msra.mxu1 %v78_v3  ;;  %v55_v23 = vld [vmem:[%s1595_s0 + $0x148] sm:$0xff]  ;;  %v56_v25 = vld [vmem:[%s1595_s0 + $0x150] sm:$0xff]  ;;  %v25_v26 = vld [vmem:[%s1595_s0 + $0x58] sm:$0xff] }
   0xa   :  { %877 = vmatprep.mubr.msk.f32.mxu0 %vm89_vm0, %v14_v4  ;;  %925 = vmatprep.mubr.msk.f32.mxu1 %vm89_vm0, %v46_v5  ;;  %v57_v27 = vld [vmem:[%s1595_s0 + $0x158] sm:$0xff]  ;;  %v26_v28 = vld [vmem:[%s1595_s0 + $0x60] sm:$0xff]  ;;  %v27_v30 = vld [vmem:[%s1595_s0 + $0x68] sm:$0xff] }
   0xb   :  { %878 = vmatmul.mubr.msk.f32.vlgmr.msra.gmra.mxu0 %vm89_vm0, %v15_v6  ;;  %926 = vmatmul.mubr.msk.f32.vlgmr.msra.gmra.mxu1 %vm89_vm0, %v47_v7  ;;  %v58_v29 = vld [vmem:[%s1595_s0 + $0x160] sm:$0xff]  ;;  %v59_v31 = vld [vmem:[%s1595_s0 + $0x168] sm:$0xff]  ;;  %v28_v32 = vld [vmem:[%s1595_s0 + $0x70] sm:$0xff] }
   0xc   :  { %880 = vmatprep.mubr.msk.f32.mxu0 %vm89_vm0, %v16_v8  ;;  %928 = vmatprep.mubr.msk.f32.mxu1 %vm89_vm0, %v48_v9  ;;  %v60_v33 = vld [vmem:[%s1595_s0 + $0x170] sm:$0xff]  ;;  %v29_v34 = vld [vmem:[%s1595_s0 + $0x78] sm:$0xff]  ;;  %v30_v36 = vld [vmem:[%s1595_s0 + $0x80] sm:$0xff] }
   0xd   :  { %v61_v35 = vld [vmem:[%s1595_s0 + $0x178] sm:$0xff]  ;;  %v62_v37 = vld [vmem:[%s1595_s0 + $0x180] sm:$0xff]  ;;  %v31_v38 = vld [vmem:[%s1595_s0 + $0x88] sm:$0xff] }
   0xe   :  { %v63_v39 = vld [vmem:[%s1595_s0 + $0x188] sm:$0xff]  ;;  %v32_v40 = vld [vmem:[%s1595_s0 + $0x90] sm:$0xff]  ;;  %v33_v42 = vld [vmem:[%s1595_s0 + $0x98] sm:$0xff] }
   0xf   :  { %881 = vmatmul.mubr.msk.f32.gmra.mxu0 %vm89_vm0, %v17_v10  ;;  %929 = vmatmul.mubr.msk.f32.gmra.mxu1 %vm89_vm0, %v49_v11  ;;  %v64_v41 = vld [vmem:[%s1595_s0 + $0x190] sm:$0xff]  ;;  %v65_v43 = vld [vmem:[%s1595_s0 + $0x198] sm:$0xff]  ;;  %v34_v44 = vld [vmem:[%s1595_s0 + $0xa0] sm:$0xff] }
  0x10   :  { %883 = vmatprep.mubr.msk.f32.mxu0 %vm89_vm0, %v18_v12  ;;  %931 = vmatprep.mubr.msk.f32.mxu1 %vm89_vm0, %v50_v13  ;;  %v66_v45 = vld [vmem:[%s1595_s0 + $0x1a0] sm:$0xff]  ;;  %v35_v46 = vld [vmem:[%s1595_s0 + $0xa8] sm:$0xff]  ;;  %v36_v48 = vld [vmem:[%s1595_s0 + $0xb0] sm:$0xff] }
  0x11   :  { %v67_v47 = vld [vmem:[%s1595_s0 + $0x1a8] sm:$0xff]  ;;  %v68_v49 = vld [vmem:[%s1595_s0 + $0x1b0] sm:$0xff]  ;;  %v37_v50 = vld [vmem:[%s1595_s0 + $0xb8] sm:$0xff] }
  0x12   :  { %v69_v51 = vld [vmem:[%s1595_s0 + $0x1b8] sm:$0xff]  ;;  %v38_v52 = vld [vmem:[%s1595_s0 + $0xc0] sm:$0xff]  ;;  %v39_v54 = vld [vmem:[%s1595_s0 + $0xc8] sm:$0xff] }
  0x13   :  { %884 = vmatmul.mubr.msk.f32.gmra.mxu0 %vm89_vm0, %v19_v14  ;;  %932 = vmatmul.mubr.msk.f32.gmra.mxu1 %vm89_vm0, %v51_v15  ;;  %v70_v53 = vld [vmem:[%s1595_s0 + $0x1c0] sm:$0xff]  ;;  %v71_v55 = vld [vmem:[%s1595_s0 + $0x1c8] sm:$0xff]  ;;  %v40_v56 = vld [vmem:[%s1595_s0 + $0xd0] sm:$0xff] }
  0x14   :  { %886 = vmatprep.mubr.msk.f32.mxu0 %vm89_vm0, %v20_v16  ;;  %934 = vmatprep.mubr.msk.f32.mxu1 %vm89_vm0, %v52_v17  ;;  %v72_v57 = vld [vmem:[%s1595_s0 + $0x1d0] sm:$0xff]  ;;  %v41_v58 = vld [vmem:[%s1595_s0 + $0xd8] sm:$0xff]  ;;  %v42_v60 = vld [vmem:[%s1595_s0 + $0xe0] sm:$0xff] }
  0x15   :  { %v73_v59 = vld [vmem:[%s1595_s0 + $0x1d8] sm:$0xff]  ;;  %v74_v61 = vld [vmem:[%s1595_s0 + $0x1e0] sm:$0xff]  ;;  %v43_v62 = vld [vmem:[%s1595_s0 + $0xe8] sm:$0xff] }
  0x16   :  { %v75_v63 = vld [vmem:[%s1595_s0 + $0x1e8] sm:$0xff]  ;;  %v44_v0 = vld [vmem:[%s1595_s0 + $0xf0] sm:$0xff]  ;;  %v45_v2 = vld [vmem:[%s1595_s0 + $0xf8] sm:$0xff] }
  0x17   :  { %887 = vmatmul.mubr.msk.f32.gmra.mxu0 %vm89_vm0, %v21_v18  ;;  %935 = vmatmul.mubr.msk.f32.gmra.mxu1 %vm89_vm0, %v53_v19  ;;  %v76_v1 = vld [vmem:[%s1595_s0 + $0x1f0] sm:$0xff]  ;;  %v77_v3 = vld [vmem:[%s1595_s0 + $0x1f8] sm:$0xff]  ;;  %v1272_v4 = vld [vmem:[%s1596_s2] ss:$0 sm:$0xff] }
  0x18   :  { %889 = vmatprep.mubr.msk.f32.mxu0 %vm89_vm0, %v22_v20  ;;  %937 = vmatprep.mubr.msk.f32.mxu1 %vm89_vm0, %v54_v21 }
  0x1b   :  { %890 = vmatmul.mubr.msk.f32.gmra.mxu0 %vm89_vm0, %v23_v22  ;;  %938 = vmatmul.mubr.msk.f32.gmra.mxu1 %vm89_vm0, %v55_v23 }
  0x1c   :  { %892 = vmatprep.mubr.msk.f32.mxu0 %vm89_vm0, %v24_v24  ;;  %940 = vmatprep.mubr.msk.f32.mxu1 %vm89_vm0, %v56_v25 }
  0x1f   :  { %893 = vmatmul.mubr.msk.f32.gmra.mxu0 %vm89_vm0, %v25_v26  ;;  %941 = vmatmul.mubr.msk.f32.gmra.mxu1 %vm89_vm0, %v57_v27 }
  0x20   :  { %895 = vmatprep.mubr.msk.f32.mxu0 %vm89_vm0, %v26_v28  ;;  %943 = vmatprep.mubr.msk.f32.mxu1 %vm89_vm0, %v58_v29 }
  0x23   :  { %896 = vmatmul.mubr.msk.f32.gmra.mxu0 %vm89_vm0, %v27_v30  ;;  %944 = vmatmul.mubr.msk.f32.gmra.mxu1 %vm89_vm0, %v59_v31 }
  0x24   :  { %898 = vmatprep.mubr.msk.f32.mxu0 %vm89_vm0, %v28_v32  ;;  %946 = vmatprep.mubr.msk.f32.mxu1 %vm89_vm0, %v60_v33 }
  0x27   :  { %899 = vmatmul.mubr.msk.f32.gmra.mxu0 %vm89_vm0, %v29_v34  ;;  %947 = vmatmul.mubr.msk.f32.gmra.mxu1 %vm89_vm0, %v61_v35 }
  0x28   :  { %901 = vmatprep.mubr.msk.f32.mxu0 %vm89_vm0, %v30_v36  ;;  %949 = vmatprep.mubr.msk.f32.mxu1 %vm89_vm0, %v62_v37 }
  0x2b   :  { %902 = vmatmul.mubr.msk.f32.gmra.mxu0 %vm89_vm0, %v31_v38  ;;  %950 = vmatmul.mubr.msk.f32.gmra.mxu1 %vm89_vm0, %v63_v39 }
  0x2c   :  { %904 = vmatprep.mubr.msk.f32.mxu0 %vm89_vm0, %v32_v40  ;;  %952 = vmatprep.mubr.msk.f32.mxu1 %vm89_vm0, %v64_v41 }
  0x2f   :  { %905 = vmatmul.mubr.msk.f32.gmra.mxu0 %vm89_vm0, %v33_v42  ;;  %953 = vmatmul.mubr.msk.f32.gmra.mxu1 %vm89_vm0, %v65_v43 }
  0x30   :  { %907 = vmatprep.mubr.msk.f32.mxu0 %vm89_vm0, %v34_v44  ;;  %955 = vmatprep.mubr.msk.f32.mxu1 %vm89_vm0, %v66_v45 }
  0x33   :  { %908 = vmatmul.mubr.msk.f32.gmra.mxu0 %vm89_vm0, %v35_v46  ;;  %956 = vmatmul.mubr.msk.f32.gmra.mxu1 %vm89_vm0, %v67_v47 }
  0x34   :  { %910 = vmatprep.mubr.msk.f32.mxu0 %vm89_vm0, %v36_v48  ;;  %958 = vmatprep.mubr.msk.f32.mxu1 %vm89_vm0, %v68_v49 }
  0x37   :  { %911 = vmatmul.mubr.msk.f32.gmra.mxu0 %vm89_vm0, %v37_v50  ;;  %959 = vmatmul.mubr.msk.f32.gmra.mxu1 %vm89_vm0, %v69_v51 }
  0x38   :  { %913 = vmatprep.mubr.msk.f32.mxu0 %vm89_vm0, %v38_v52  ;;  %961 = vmatprep.mubr.msk.f32.mxu1 %vm89_vm0, %v70_v53 }
  0x3b   :  { %914 = vmatmul.mubr.msk.f32.gmra.mxu0 %vm89_vm0, %v39_v54  ;;  %962 = vmatmul.mubr.msk.f32.gmra.mxu1 %vm89_vm0, %v71_v55 }
  0x3c   :  { %916 = vmatprep.mubr.msk.f32.mxu0 %vm89_vm0, %v40_v56  ;;  %964 = vmatprep.mubr.msk.f32.mxu1 %vm89_vm0, %v72_v57 }
  0x3f   :  { %917 = vmatmul.mubr.msk.f32.gmra.mxu0 %vm89_vm0, %v41_v58  ;;  %965 = vmatmul.mubr.msk.f32.gmra.mxu1 %vm89_vm0, %v73_v59 }
  0x40   :  { %919 = vmatprep.mubr.msk.f32.mxu0 %vm89_vm0, %v42_v60  ;;  %967 = vmatprep.mubr.msk.f32.mxu1 %vm89_vm0, %v74_v61 }
  0x43   :  { %920 = vmatmul.mubr.msk.f32.gmra.mxu0 %vm89_vm0, %v43_v62  ;;  %968 = vmatmul.mubr.msk.f32.gmra.mxu1 %vm89_vm0, %v75_v63 }
  0x44   :  { %922 = vmatprep.mubr.msk.f32.mxu0 %vm89_vm0, %v44_v0  ;;  %970 = vmatprep.mubr.msk.f32.mxu1 %vm89_vm0, %v76_v1 }
  0x47   :  { %923 = vmatmul.mubr.msk.f32.gmra.mxu0 %vm89_vm0, %v45_v2  ;;  %971 = vmatmul.mubr.msk.f32.gmra.mxu1 %vm89_vm0, %v77_v3 }
  0xcb   :  { %v879_v5 = vpop.f32.mrf.mxu0  ;;  %v927_v6 = vpop.f32.mrf.mxu1 }
  0xcc   :  { %v354_v7 = vadd.f32 %v879_v5, %v1272_v4  ;;  %v514_v8 = vadd.f32 %v927_v6, %v1272_v4 }
  0xcd   :  { %v348_v9 = vpop.f32.mrf.mxu0  ;;  %v508_v10 = vpop.f32.mrf.mxu1 }
  0xce   :  { %669 = vst.msk [vmem:[%s1597_s3 + $0x8] sm:$0xff] %vm667_vm1, %v354_v7  ;;  %701 = vst.msk [vmem:[%s1597_s3 + $0x108] sm:$0xff] %vm667_vm1, %v514_v8  ;;  %v349_v11 = vadd.f32 %v1272_v4, %v348_v9  ;;  %v509_v12 = vadd.f32 %v1272_v4, %v508_v10 }
  0xcf   :  { %v882_v13 = vpop.f32.mrf.mxu0  ;;  %v930_v14 = vpop.f32.mrf.mxu1 }
  0xd0   :  { %668 = vst.msk [vmem:[%s1597_s3] sm:$0xff] %vm667_vm1, %v349_v11  ;;  %700 = vst.msk [vmem:[%s1597_s3 + $0x100] sm:$0xff] %vm667_vm1, %v509_v12  ;;  %v364_v15 = vadd.f32 %v882_v13, %v1272_v4  ;;  %v524_v16 = vadd.f32 %v930_v14, %v1272_v4 }
  0xd1   :  { %v358_v17 = vpop.f32.mrf.mxu0  ;;  %v518_v18 = vpop.f32.mrf.mxu1 }
  0xd2   :  { %671 = vst.msk [vmem:[%s1597_s3 + $0x18] sm:$0xff] %vm667_vm1, %v364_v15  ;;  %703 = vst.msk [vmem:[%s1597_s3 + $0x118] sm:$0xff] %vm667_vm1, %v524_v16  ;;  %v359_v19 = vadd.f32 %v1272_v4, %v358_v17  ;;  %v519_v20 = vadd.f32 %v1272_v4, %v518_v18 }
  0xd3   :  { %v885_v21 = vpop.f32.mrf.mxu0  ;;  %v933_v22 = vpop.f32.mrf.mxu1 }
  0xd4   :  { %670 = vst.msk [vmem:[%s1597_s3 + $0x10] sm:$0xff] %vm667_vm1, %v359_v19  ;;  %702 = vst.msk [vmem:[%s1597_s3 + $0x110] sm:$0xff] %vm667_vm1, %v519_v20  ;;  %v374_v23 = vadd.f32 %v885_v21, %v1272_v4  ;;  %v534_v24 = vadd.f32 %v933_v22, %v1272_v4 }
  0xd5   :  { %v368_v25 = vpop.f32.mrf.mxu0  ;;  %v528_v26 = vpop.f32.mrf.mxu1 }
  0xd6   :  { %673 = vst.msk [vmem:[%s1597_s3 + $0x28] sm:$0xff] %vm667_vm1, %v374_v23  ;;  %705 = vst.msk [vmem:[%s1597_s3 + $0x128] sm:$0xff] %vm667_vm1, %v534_v24  ;;  %v369_v27 = vadd.f32 %v1272_v4, %v368_v25  ;;  %v529_v28 = vadd.f32 %v1272_v4, %v528_v26 }
  0xd7   :  { %v888_v29 = vpop.f32.mrf.mxu0  ;;  %v936_v30 = vpop.f32.mrf.mxu1 }
  0xd8   :  { %672 = vst.msk [vmem:[%s1597_s3 + $0x20] sm:$0xff] %vm667_vm1, %v369_v27  ;;  %704 = vst.msk [vmem:[%s1597_s3 + $0x120] sm:$0xff] %vm667_vm1, %v529_v28  ;;  %v384_v31 = vadd.f32 %v888_v29, %v1272_v4  ;;  %v544_v32 = vadd.f32 %v936_v30, %v1272_v4 }
  0xd9   :  { %v378_v33 = vpop.f32.mrf.mxu0  ;;  %v538_v34 = vpop.f32.mrf.mxu1 }
  0xda   :  { %675 = vst.msk [vmem:[%s1597_s3 + $0x38] sm:$0xff] %vm667_vm1, %v384_v31  ;;  %707 = vst.msk [vmem:[%s1597_s3 + $0x138] sm:$0xff] %vm667_vm1, %v544_v32  ;;  %v379_v35 = vadd.f32 %v1272_v4, %v378_v33  ;;  %v539_v36 = vadd.f32 %v1272_v4, %v538_v34 }
  0xdb   :  { %v891_v37 = vpop.f32.mrf.mxu0  ;;  %v939_v38 = vpop.f32.mrf.mxu1 }
  0xdc   :  { %674 = vst.msk [vmem:[%s1597_s3 + $0x30] sm:$0xff] %vm667_vm1, %v379_v35  ;;  %706 = vst.msk [vmem:[%s1597_s3 + $0x130] sm:$0xff] %vm667_vm1, %v539_v36  ;;  %v394_v39 = vadd.f32 %v891_v37, %v1272_v4  ;;  %v554_v40 = vadd.f32 %v939_v38, %v1272_v4 }
  0xdd   :  { %v388_v41 = vpop.f32.mrf.mxu0  ;;  %v548_v42 = vpop.f32.mrf.mxu1 }
  0xde   :  { %677 = vst.msk [vmem:[%s1597_s3 + $0x48] sm:$0xff] %vm667_vm1, %v394_v39  ;;  %709 = vst.msk [vmem:[%s1597_s3 + $0x148] sm:$0xff] %vm667_vm1, %v554_v40  ;;  %v389_v43 = vadd.f32 %v1272_v4, %v388_v41  ;;  %v549_v44 = vadd.f32 %v1272_v4, %v548_v42 }
  0xdf   :  { %v894_v45 = vpop.f32.mrf.mxu0  ;;  %v942_v46 = vpop.f32.mrf.mxu1 }
  0xe0   :  { %676 = vst.msk [vmem:[%s1597_s3 + $0x40] sm:$0xff] %vm667_vm1, %v389_v43  ;;  %708 = vst.msk [vmem:[%s1597_s3 + $0x140] sm:$0xff] %vm667_vm1, %v549_v44  ;;  %v404_v47 = vadd.f32 %v894_v45, %v1272_v4  ;;  %v564_v48 = vadd.f32 %v942_v46, %v1272_v4 }
  0xe1   :  { %v398_v49 = vpop.f32.mrf.mxu0  ;;  %v558_v50 = vpop.f32.mrf.mxu1 }
  0xe2   :  { %679 = vst.msk [vmem:[%s1597_s3 + $0x58] sm:$0xff] %vm667_vm1, %v404_v47  ;;  %711 = vst.msk [vmem:[%s1597_s3 + $0x158] sm:$0xff] %vm667_vm1, %v564_v48  ;;  %v399_v51 = vadd.f32 %v1272_v4, %v398_v49  ;;  %v559_v52 = vadd.f32 %v1272_v4, %v558_v50 }
  0xe3   :  { %v897_v53 = vpop.f32.mrf.mxu0  ;;  %v945_v54 = vpop.f32.mrf.mxu1 }
  0xe4   :  { %678 = vst.msk [vmem:[%s1597_s3 + $0x50] sm:$0xff] %vm667_vm1, %v399_v51  ;;  %710 = vst.msk [vmem:[%s1597_s3 + $0x150] sm:$0xff] %vm667_vm1, %v559_v52  ;;  %v414_v55 = vadd.f32 %v897_v53, %v1272_v4  ;;  %v574_v56 = vadd.f32 %v945_v54, %v1272_v4 }
  0xe5   :  { %v408_v57 = vpop.f32.mrf.mxu0  ;;  %v568_v58 = vpop.f32.mrf.mxu1 }
  0xe6   :  { %681 = vst.msk [vmem:[%s1597_s3 + $0x68] sm:$0xff] %vm667_vm1, %v414_v55  ;;  %713 = vst.msk [vmem:[%s1597_s3 + $0x168] sm:$0xff] %vm667_vm1, %v574_v56  ;;  %v409_v59 = vadd.f32 %v1272_v4, %v408_v57  ;;  %v569_v60 = vadd.f32 %v1272_v4, %v568_v58 }
  0xe7   :  { %v900_v61 = vpop.f32.mrf.mxu0  ;;  %v948_v62 = vpop.f32.mrf.mxu1 }
  0xe8   :  { %680 = vst.msk [vmem:[%s1597_s3 + $0x60] sm:$0xff] %vm667_vm1, %v409_v59  ;;  %712 = vst.msk [vmem:[%s1597_s3 + $0x160] sm:$0xff] %vm667_vm1, %v569_v60  ;;  %v424_v63 = vadd.f32 %v900_v61, %v1272_v4  ;;  %v584_v0 = vadd.f32 %v948_v62, %v1272_v4 }
  0xe9   :  { %v418_v1 = vpop.f32.mrf.mxu0  ;;  %v578_v2 = vpop.f32.mrf.mxu1 }
  0xea   :  { %683 = vst.msk [vmem:[%s1597_s3 + $0x78] sm:$0xff] %vm667_vm1, %v424_v63  ;;  %715 = vst.msk [vmem:[%s1597_s3 + $0x178] sm:$0xff] %vm667_vm1, %v584_v0  ;;  %v419_v3 = vadd.f32 %v1272_v4, %v418_v1  ;;  %v579_v5 = vadd.f32 %v1272_v4, %v578_v2 }
  0xeb   :  { %v903_v6 = vpop.f32.mrf.mxu0  ;;  %v951_v7 = vpop.f32.mrf.mxu1 }
  0xec   :  { %682 = vst.msk [vmem:[%s1597_s3 + $0x70] sm:$0xff] %vm667_vm1, %v419_v3  ;;  %714 = vst.msk [vmem:[%s1597_s3 + $0x170] sm:$0xff] %vm667_vm1, %v579_v5  ;;  %v434_v8 = vadd.f32 %v903_v6, %v1272_v4  ;;  %v594_v9 = vadd.f32 %v951_v7, %v1272_v4 }
  0xed   :  { %v428_v10 = vpop.f32.mrf.mxu0  ;;  %v588_v11 = vpop.f32.mrf.mxu1 }
  0xee   :  { %685 = vst.msk [vmem:[%s1597_s3 + $0x88] sm:$0xff] %vm667_vm1, %v434_v8  ;;  %717 = vst.msk [vmem:[%s1597_s3 + $0x188] sm:$0xff] %vm667_vm1, %v594_v9  ;;  %v429_v12 = vadd.f32 %v1272_v4, %v428_v10  ;;  %v589_v13 = vadd.f32 %v1272_v4, %v588_v11 }
  0xef   :  { %v906_v14 = vpop.f32.mrf.mxu0  ;;  %v954_v15 = vpop.f32.mrf.mxu1 }
  0xf0   :  { %684 = vst.msk [vmem:[%s1597_s3 + $0x80] sm:$0xff] %vm667_vm1, %v429_v12  ;;  %716 = vst.msk [vmem:[%s1597_s3 + $0x180] sm:$0xff] %vm667_vm1, %v589_v13  ;;  %v444_v16 = vadd.f32 %v906_v14, %v1272_v4  ;;  %v604_v17 = vadd.f32 %v954_v15, %v1272_v4 }
  0xf1   :  { %v438_v18 = vpop.f32.mrf.mxu0  ;;  %v598_v19 = vpop.f32.mrf.mxu1 }
  0xf2   :  { %687 = vst.msk [vmem:[%s1597_s3 + $0x98] sm:$0xff] %vm667_vm1, %v444_v16  ;;  %719 = vst.msk [vmem:[%s1597_s3 + $0x198] sm:$0xff] %vm667_vm1, %v604_v17  ;;  %v439_v20 = vadd.f32 %v1272_v4, %v438_v18  ;;  %v599_v21 = vadd.f32 %v1272_v4, %v598_v19 }
  0xf3   :  { %v909_v22 = vpop.f32.mrf.mxu0  ;;  %v957_v23 = vpop.f32.mrf.mxu1 }
  0xf4   :  { %686 = vst.msk [vmem:[%s1597_s3 + $0x90] sm:$0xff] %vm667_vm1, %v439_v20  ;;  %718 = vst.msk [vmem:[%s1597_s3 + $0x190] sm:$0xff] %vm667_vm1, %v599_v21  ;;  %v454_v24 = vadd.f32 %v909_v22, %v1272_v4  ;;  %v614_v25 = vadd.f32 %v957_v23, %v1272_v4 }
  0xf5   :  { %v448_v26 = vpop.f32.mrf.mxu0  ;;  %v608_v27 = vpop.f32.mrf.mxu1 }
  0xf6   :  { %689 = vst.msk [vmem:[%s1597_s3 + $0xa8] sm:$0xff] %vm667_vm1, %v454_v24  ;;  %721 = vst.msk [vmem:[%s1597_s3 + $0x1a8] sm:$0xff] %vm667_vm1, %v614_v25  ;;  %v449_v28 = vadd.f32 %v1272_v4, %v448_v26  ;;  %v609_v29 = vadd.f32 %v1272_v4, %v608_v27 }
  0xf7   :  { %v912_v30 = vpop.f32.mrf.mxu0  ;;  %v960_v31 = vpop.f32.mrf.mxu1 }
  0xf8   :  { %688 = vst.msk [vmem:[%s1597_s3 + $0xa0] sm:$0xff] %vm667_vm1, %v449_v28  ;;  %720 = vst.msk [vmem:[%s1597_s3 + $0x1a0] sm:$0xff] %vm667_vm1, %v609_v29  ;;  %v464_v32 = vadd.f32 %v912_v30, %v1272_v4  ;;  %v624_v33 = vadd.f32 %v960_v31, %v1272_v4 }
  0xf9   :  { %v458_v34 = vpop.f32.mrf.mxu0  ;;  %v618_v35 = vpop.f32.mrf.mxu1 }
  0xfa   :  { %691 = vst.msk [vmem:[%s1597_s3 + $0xb8] sm:$0xff] %vm667_vm1, %v464_v32  ;;  %723 = vst.msk [vmem:[%s1597_s3 + $0x1b8] sm:$0xff] %vm667_vm1, %v624_v33  ;;  %v459_v36 = vadd.f32 %v1272_v4, %v458_v34  ;;  %v619_v37 = vadd.f32 %v1272_v4, %v618_v35 }
  0xfb   :  { %v915_v38 = vpop.f32.mrf.mxu0  ;;  %v963_v39 = vpop.f32.mrf.mxu1 }
  0xfc   :  { %690 = vst.msk [vmem:[%s1597_s3 + $0xb0] sm:$0xff] %vm667_vm1, %v459_v36  ;;  %722 = vst.msk [vmem:[%s1597_s3 + $0x1b0] sm:$0xff] %vm667_vm1, %v619_v37  ;;  %v474_v40 = vadd.f32 %v915_v38, %v1272_v4  ;;  %v634_v41 = vadd.f32 %v963_v39, %v1272_v4 }
  0xfd   :  { %v468_v42 = vpop.f32.mrf.mxu0  ;;  %v628_v43 = vpop.f32.mrf.mxu1 }
  0xfe   :  { %693 = vst.msk [vmem:[%s1597_s3 + $0xc8] sm:$0xff] %vm667_vm1, %v474_v40  ;;  %725 = vst.msk [vmem:[%s1597_s3 + $0x1c8] sm:$0xff] %vm667_vm1, %v634_v41  ;;  %v469_v44 = vadd.f32 %v1272_v4, %v468_v42  ;;  %v629_v45 = vadd.f32 %v1272_v4, %v628_v43 }
  0xff   :  { %v918_v46 = vpop.f32.mrf.mxu0  ;;  %v966_v47 = vpop.f32.mrf.mxu1 }
 0x100   :  { %692 = vst.msk [vmem:[%s1597_s3 + $0xc0] sm:$0xff] %vm667_vm1, %v469_v44  ;;  %724 = vst.msk [vmem:[%s1597_s3 + $0x1c0] sm:$0xff] %vm667_vm1, %v629_v45  ;;  %v484_v48 = vadd.f32 %v918_v46, %v1272_v4  ;;  %v644_v49 = vadd.f32 %v966_v47, %v1272_v4 }
 0x101   :  { %v478_v50 = vpop.f32.mrf.mxu0  ;;  %v638_v51 = vpop.f32.mrf.mxu1 }
 0x102   :  { %695 = vst.msk [vmem:[%s1597_s3 + $0xd8] sm:$0xff] %vm667_vm1, %v484_v48  ;;  %727 = vst.msk [vmem:[%s1597_s3 + $0x1d8] sm:$0xff] %vm667_vm1, %v644_v49  ;;  %v479_v52 = vadd.f32 %v1272_v4, %v478_v50  ;;  %v639_v53 = vadd.f32 %v1272_v4, %v638_v51 }
 0x103   :  { %v921_v54 = vpop.f32.mrf.mxu0  ;;  %v969_v55 = vpop.f32.mrf.mxu1 }
 0x104   :  { %694 = vst.msk [vmem:[%s1597_s3 + $0xd0] sm:$0xff] %vm667_vm1, %v479_v52  ;;  %726 = vst.msk [vmem:[%s1597_s3 + $0x1d0] sm:$0xff] %vm667_vm1, %v639_v53  ;;  %v494_v56 = vadd.f32 %v921_v54, %v1272_v4  ;;  %v654_v57 = vadd.f32 %v969_v55, %v1272_v4 }
 0x105   :  { %v488_v58 = vpop.f32.mrf.mxu0  ;;  %v648_v59 = vpop.f32.mrf.mxu1 }
 0x106   :  { %697 = vst.msk [vmem:[%s1597_s3 + $0xe8] sm:$0xff] %vm667_vm1, %v494_v56  ;;  %729 = vst.msk [vmem:[%s1597_s3 + $0x1e8] sm:$0xff] %vm667_vm1, %v654_v57  ;;  %v489_v60 = vadd.f32 %v1272_v4, %v488_v58  ;;  %v649_v61 = vadd.f32 %v1272_v4, %v648_v59 }
 0x107   :  { %v924_v62 = vpop.f32.mrf.mxu0  ;;  %v972_v63 = vpop.f32.mrf.mxu1 }
 0x108   :  { %696 = vst.msk [vmem:[%s1597_s3 + $0xe0] sm:$0xff] %vm667_vm1, %v489_v60  ;;  %728 = vst.msk [vmem:[%s1597_s3 + $0x1e0] sm:$0xff] %vm667_vm1, %v649_v61  ;;  %v504_v0 = vadd.f32 %v924_v62, %v1272_v4  ;;  %v664_v1 = vadd.f32 %v972_v63, %v1272_v4 }
 0x109   :  { %v498_v2 = vpop.f32.mrf.mxu0  ;;  %v658_v3 = vpop.f32.mrf.mxu1 }
 0x10a   :  { %699 = vst.msk [vmem:[%s1597_s3 + $0xf8] sm:$0xff] %vm667_vm1, %v504_v0  ;;  %731 = vst.msk [vmem:[%s1597_s3 + $0x1f8] sm:$0xff] %vm667_vm1, %v664_v1  ;;  %v499_v5 = vadd.f32 %v1272_v4, %v498_v2  ;;  %v659_v6 = vadd.f32 %v1272_v4, %v658_v3 }
 0x10c   :  { %698 = vst.msk [vmem:[%s1597_s3 + $0xf0] sm:$0xff] %vm667_vm1, %v499_v5  ;;  %730 = vst.msk [vmem:[%s1597_s3 + $0x1f0] sm:$0xff] %vm667_vm1, %v659_v6 }

</bundles_post_ra>
